<compile_context>
chip_gen: v5e
topology: v5e:2x2
jax: 0.10.0
libtpu: 0.0.40
codegen_flags: <defaults>
</compile_context>

<pallas_src>
import functools

import jax
import jax.numpy as jnp
from jax import lax
from jax.experimental import pallas as pl
from jax.experimental.pallas import tpu as pltpu

KERNEL_SIZE = 7
PAD = KERNEL_SIZE // 2


def _spatial_attention_kernel(w_ref, b_ref, x_ref, o_ref,
                              max_acc, sum_acc, pad_ref, *, C):
    # w_ref   : SMEM (98,)  flattened Conv2d(1,2,7,7) weights [cin*49 + ki*7 + kj]
    # b_ref   : SMEM (1,)   conv bias
    # x_ref   : VMEM (Ct, H, W)  un-padded activation chunk (batch b, chunk c)
    # o_ref   : VMEM (H, W)      sigmoid(conv(...)) for batch b
    # max_acc : VMEM (H, W) f32  running channel max
    # sum_acc : VMEM (H, W) f32  running channel sum
    # pad_ref : VMEM (2, H+6, W+6) f32  zero-padded pooled maps (last step only)
    c = pl.program_id(1)
    nc = pl.num_programs(1)
    ct, H, W = x_ref.shape

    # Fused single-pass chunk reduction: one VMEM read per channel slice,
    # updating running max and running sum together.
    x0 = x_ref[0].astype(jnp.float32)

    def body(i, carry):
        m, s = carry
        xi = x_ref[i].astype(jnp.float32)
        return jnp.maximum(m, xi), s + xi

    if ct > 1:
        chunk_max, chunk_sum = lax.fori_loop(1, ct, body, (x0, x0),
                                             unroll=(ct <= 8))
    else:
        chunk_max, chunk_sum = x0, x0

    @pl.when(c == 0)
    def _():
        max_acc[...] = chunk_max
        sum_acc[...] = chunk_sum

    @pl.when(c > 0)
    def _():
        max_acc[...] = jnp.maximum(max_acc[...], chunk_max)
        sum_acc[...] = sum_acc[...] + chunk_sum

    @pl.when(c == nc - 1)
    def _():
        # Zero-padded pooled maps.  Padding the pooled maps with exact zeros is
        # identical to the conv's padding=3 on the concatenated (max, avg) maps.
        pad_ref[...] = jnp.zeros_like(pad_ref)
        pad_ref[0, PAD:PAD + H, PAD:PAD + W] = max_acc[...]
        pad_ref[1, PAD:PAD + H, PAD:PAD + W] = sum_acc[...] * (1.0 / C)

        acc = jnp.full((H, W), b_ref[0], dtype=jnp.float32)
        # Hoist the lane-direction (kj) shift: 7 lane-shifted views per map,
        # then the 49 taps only need cheap sublane-offset slices of those views.
        for kj in range(KERNEL_SIZE):
            m_kj = pad_ref[0, :, kj:kj + W]     # (H+6, W)
            a_kj = pad_ref[1, :, kj:kj + W]     # (H+6, W)
            for ki in range(KERNEL_SIZE):
                wm = w_ref[ki * KERNEL_SIZE + kj]
                wa = w_ref[KERNEL_SIZE * KERNEL_SIZE + ki * KERNEL_SIZE + kj]
                acc = acc + wm * m_kj[ki:ki + H, :]
                acc = acc + wa * a_kj[ki:ki + H, :]

        o_ref[...] = jax.nn.sigmoid(acc).astype(o_ref.dtype)


def _pick_c_tile(C, H, W, itemsize, vmem_budget_bytes):
    """Largest divisor of C whose double-buffered input block fits the budget."""
    max_ct = max(1, vmem_budget_bytes // (2 * H * W * itemsize))
    ct = min(C, int(max_ct))
    while C % ct != 0:
        ct -= 1
    return ct


def spatial_attention(x, weight, bias, *, c_tile=None,
                      vmem_budget_bytes=8 * 1024 * 1024):
    """x: (B, C, H, W); weight: (1, 2, 7, 7); bias: (1,). Returns (B, 1, H, W)."""
    B, C, H, W = x.shape
    Hp, Wp = H + 2 * PAD, W + 2 * PAD

    if c_tile is None:
        c_tile = _pick_c_tile(C, H, W, jnp.dtype(x.dtype).itemsize,
                              vmem_budget_bytes)
    num_c = C // c_tile

    # Flatten conv params to 1-D SMEM arrays (no 2-D/3-D SMEM tile padding).
    w_flat = weight.reshape(-1).astype(jnp.float32)   # (98,)
    b_flat = bias.reshape(-1).astype(jnp.float32)     # (1,)

    kernel = functools.partial(_spatial_attention_kernel, C=C)

    out = pl.pallas_call(
        kernel,
        out_shape=jax.ShapeDtypeStruct((B, H, W), x.dtype),
        grid_spec=pltpu.PrefetchScalarGridSpec(
            num_scalar_prefetch=0,
            grid=(B, num_c),
            in_specs=[
                pl.BlockSpec(memory_space=pltpu.SMEM),            # conv weights
                pl.BlockSpec(memory_space=pltpu.SMEM),            # conv bias
                pl.BlockSpec((pl.Squeezed(), c_tile, H, W),
                             lambda b, c: (b, c, 0, 0)),          # activations
            ],
            out_specs=pl.BlockSpec((pl.Squeezed(), H, W),
                                   lambda b, c: (b, 0, 0)),
            scratch_shapes=[
                pltpu.VMEM((H, W), jnp.float32),      # running channel max
                pltpu.VMEM((H, W), jnp.float32),      # running channel sum
                pltpu.VMEM((2, Hp, Wp), jnp.float32), # zero-padded pooled maps
            ],
        ),
        compiler_params=pltpu.CompilerParams(
            dimension_semantics=("parallel", "arbitrary"),
            vmem_limit_bytes=32 * 1024 * 1024,
        ),
    )(w_flat, b_flat, x)

    # Free metadata reshape back to NCHW with the singleton channel dim.
    return out.reshape(B, 1, H, W)


def _reference(x, weight, bias):
    """Pure-JAX reference mirroring the PyTorch forward."""
    max_map = jnp.max(x, axis=1, keepdims=True)
    avg_map = jnp.mean(x, axis=1, keepdims=True)
    stacked = jnp.concatenate([max_map, avg_map], axis=1)      # (B, 2, H, W)
    y = jax.lax.conv_general_dilated(
        stacked, weight,
        window_strides=(1, 1), padding=((PAD, PAD), (PAD, PAD)),
        dimension_numbers=("NCHW", "OIHW", "NCHW"))
    y = y + bias.reshape(1, 1, 1, 1)
    return jax.nn.sigmoid(y)


if __name__ == "__main__":
    key = jax.random.PRNGKey(0)
    kx, kw, kb = jax.random.split(key, 3)

    B, C, H, W = 2, 4, 16, 16
    x = jax.random.normal(kx, (B, C, H, W), dtype=jnp.float32)

    # Deterministic conv parameters (Conv2d(2, 1, 7) shapes: (1,2,7,7), (1,))
    fan_in = 2 * KERNEL_SIZE * KERNEL_SIZE
    bound = 1.0 / (fan_in ** 0.5)
    weight = jax.random.uniform(kw, (1, 2, KERNEL_SIZE, KERNEL_SIZE),
                                minval=-bound, maxval=bound, dtype=jnp.float32)
    bias = jax.random.uniform(kb, (1,), minval=-bound, maxval=bound,
                              dtype=jnp.float32)

    out = spatial_attention(x, weight, bias)
    out = jax.block_until_ready(out)

    ref = _reference(x, weight, bias)
    assert out.shape == (B, 1, H, W), out.shape
    assert jnp.allclose(out, ref, atol=1e-5, rtol=1e-5), (
        float(jnp.max(jnp.abs(out - ref))))

    print("KERNEL_OK")
</pallas_src>

<mosaic_0001>
module attributes {stable_mosaic.version = 11 : i64} {
  func.func @_spatial_attention_kernel(%arg0: i32, %arg1: i32, %arg2: memref<98xf32, #tpu.memory_space<smem>>, %arg3: memref<1xf32, #tpu.memory_space<smem>>, %arg4: memref<1x4x16x16xf32, #tpu.memory_space<vmem>>, %arg5: memref<1x16x16xf32, #tpu.memory_space<vmem>>, %arg6: memref<16x16xf32, #tpu.memory_space<vmem>>, %arg7: memref<16x16xf32, #tpu.memory_space<vmem>>, %arg8: memref<2x22x22xf32, #tpu.memory_space<vmem>>) attributes {dimension_semantics = [#tpu.dimension_semantics<parallel>, #tpu.dimension_semantics<arbitrary>], iteration_bounds = array<i64: 2, 1>, scalar_prefetch = 0 : i64, scratch_operands = 3 : i64, tpu.core_type = #tpu.core_type<tc>, window_params = [{transform_indices = @transform_0, window_bounds = array<i64: 98>}, {transform_indices = @transform_1, window_bounds = array<i64: 1>}, {transform_indices = @transform_2, window_bounds = array<i64: 1, 4, 16, 16>}, {transform_indices = @transform_3, window_bounds = array<i64: 1, 16, 16>}]} {
    %c0 = arith.constant 0 : index
    %c0_0 = arith.constant 0 : index
    %c0_1 = arith.constant 0 : index
    %c0_2 = arith.constant 0 : index
    %0 = vector.load %arg4[%c0, %c0_0, %c0_1, %c0_2] : memref<1x4x16x16xf32, #tpu.memory_space<vmem>>, vector<1x1x16x16xf32>
    %1 = vector.shape_cast %0 : vector<1x1x16x16xf32> to vector<16x16xf32>
    %c1_i32 = arith.constant 1 : i32
    %c0_3 = arith.constant 0 : index
    %2 = arith.index_cast %c1_i32 : i32 to index
    %c0_4 = arith.constant 0 : index
    %c0_5 = arith.constant 0 : index
    %3 = vector.load %arg4[%c0_3, %2, %c0_4, %c0_5] : memref<1x4x16x16xf32, #tpu.memory_space<vmem>>, vector<1x1x16x16xf32>
    %4 = vector.shape_cast %3 : vector<1x1x16x16xf32> to vector<16x16xf32>
    %5 = arith.maximumf %1, %4 : vector<16x16xf32>
    %6 = arith.addf %1, %4 : vector<16x16xf32>
    %c2_i32 = arith.constant 2 : i32
    %c0_6 = arith.constant 0 : index
    %7 = arith.index_cast %c2_i32 : i32 to index
    %c0_7 = arith.constant 0 : index
    %c0_8 = arith.constant 0 : index
    %8 = vector.load %arg4[%c0_6, %7, %c0_7, %c0_8] : memref<1x4x16x16xf32, #tpu.memory_space<vmem>>, vector<1x1x16x16xf32>
    %9 = vector.shape_cast %8 : vector<1x1x16x16xf32> to vector<16x16xf32>
    %10 = arith.maximumf %5, %9 : vector<16x16xf32>
    %11 = arith.addf %6, %9 : vector<16x16xf32>
    %c3_i32 = arith.constant 3 : i32
    %c0_9 = arith.constant 0 : index
    %12 = arith.index_cast %c3_i32 : i32 to index
    %c0_10 = arith.constant 0 : index
    %c0_11 = arith.constant 0 : index
    %13 = vector.load %arg4[%c0_9, %12, %c0_10, %c0_11] : memref<1x4x16x16xf32, #tpu.memory_space<vmem>>, vector<1x1x16x16xf32>
    %14 = vector.shape_cast %13 : vector<1x1x16x16xf32> to vector<16x16xf32>
    %15 = arith.maximumf %10, %14 : vector<16x16xf32>
    %16 = arith.addf %11, %14 : vector<16x16xf32>
    %c3_i32_12 = arith.constant 3 : i32
    %c0_i32 = arith.constant 0 : i32
    %17 = arith.cmpi eq, %arg1, %c0_i32 : i32
    %18 = arith.extui %17 : i1 to i32
    %c0_i32_13 = arith.constant 0 : i32
    %19 = arith.cmpi ne, %18, %c0_i32_13 : i32
    scf.if %19 {
      %c0_18 = arith.constant 0 : index
      %c0_19 = arith.constant 0 : index
      %26 = vector.load %arg6[%c0_18, %c0_19] : memref<16x16xf32, #tpu.memory_space<vmem>>, vector<16x16xf32>
      tpu.vector_store %arg6[%c0_18, %c0_19], %15 {strides = array<i32>} : memref<16x16xf32, #tpu.memory_space<vmem>>, vector<16x16xf32>,
      %c0_20 = arith.constant 0 : index
      %c0_21 = arith.constant 0 : index
      %27 = vector.load %arg7[%c0_20, %c0_21] : memref<16x16xf32, #tpu.memory_space<vmem>>, vector<16x16xf32>
      tpu.vector_store %arg7[%c0_20, %c0_21], %16 {strides = array<i32>} : memref<16x16xf32, #tpu.memory_space<vmem>>, vector<16x16xf32>,
    } else {
    }
    %c0_i32_14 = arith.constant 0 : i32
    %20 = arith.cmpi sgt, %arg1, %c0_i32_14 : i32
    %21 = arith.extui %20 : i1 to i32
    %c0_i32_15 = arith.constant 0 : i32
    %22 = arith.cmpi ne, %21, %c0_i32_15 : i32
    scf.if %22 {
      %c0_18 = arith.constant 0 : index
      %c0_19 = arith.constant 0 : index
      %26 = vector.load %arg6[%c0_18, %c0_19] : memref<16x16xf32, #tpu.memory_space<vmem>>, vector<16x16xf32>
      %27 = arith.maximumf %26, %15 : vector<16x16xf32>
      %c0_20 = arith.constant 0 : index
      %c0_21 = arith.constant 0 : index
      %28 = vector.load %arg6[%c0_20, %c0_21] : memref<16x16xf32, #tpu.memory_space<vmem>>, vector<16x16xf32>
      tpu.vector_store %arg6[%c0_20, %c0_21], %27 {strides = array<i32>} : memref<16x16xf32, #tpu.memory_space<vmem>>, vector<16x16xf32>,
      %c0_22 = arith.constant 0 : index
      %c0_23 = arith.constant 0 : index
      %29 = vector.load %arg7[%c0_22, %c0_23] : memref<16x16xf32, #tpu.memory_space<vmem>>, vector<16x16xf32>
      %30 = arith.addf %29, %16 : vector<16x16xf32>
      %c0_24 = arith.constant 0 : index
      %c0_25 = arith.constant 0 : index
      %31 = vector.load %arg7[%c0_24, %c0_25] : memref<16x16xf32, #tpu.memory_space<vmem>>, vector<16x16xf32>
      tpu.vector_store %arg7[%c0_24, %c0_25], %30 {strides = array<i32>} : memref<16x16xf32, #tpu.memory_space<vmem>>, vector<16x16xf32>,
    } else {
    }
    %c0_i32_16 = arith.constant 0 : i32
    %23 = arith.cmpi eq, %arg1, %c0_i32_16 : i32
    %24 = arith.extui %23 : i1 to i32
    %c0_i32_17 = arith.constant 0 : i32
    %25 = arith.cmpi ne, %24, %c0_i32_17 : i32
    scf.if %25 {
      %cst = arith.constant 0.000000e+00 : f32
      %26 = vector.broadcast %cst : f32 to vector<2x22x22xf32>
      %c0_18 = arith.constant 0 : index
      %c0_19 = arith.constant 0 : index
      %c0_20 = arith.constant 0 : index
      %27 = vector.load %arg8[%c0_18, %c0_19, %c0_20] : memref<2x22x22xf32, #tpu.memory_space<vmem>>, vector<2x22x22xf32>
      tpu.vector_store %arg8[%c0_18, %c0_19, %c0_20], %26 {strides = array<i32>} : memref<2x22x22xf32, #tpu.memory_space<vmem>>, vector<2x22x22xf32>,
      %c0_21 = arith.constant 0 : index
      %c0_22 = arith.constant 0 : index
      %28 = vector.load %arg6[%c0_21, %c0_22] : memref<16x16xf32, #tpu.memory_space<vmem>>, vector<16x16xf32>
      %c0_23 = arith.constant 0 : index
      %c3 = arith.constant 3 : index
      %c3_24 = arith.constant 3 : index
      %29 = vector.load %arg8[%c0_23, %c3, %c3_24] : memref<2x22x22xf32, #tpu.memory_space<vmem>>, vector<1x16x16xf32>
      %30 = vector.shape_cast %29 : vector<1x16x16xf32> to vector<16x16xf32>
      %31 = vector.shape_cast %28 : vector<16x16xf32> to vector<1x16x16xf32>
      tpu.vector_store %arg8[%c0_23, %c3, %c3_24], %31 {strides = array<i32>} : memref<2x22x22xf32, #tpu.memory_space<vmem>>, vector<1x16x16xf32>,
      %c0_25 = arith.constant 0 : index
      %c0_26 = arith.constant 0 : index
      %32 = vector.load %arg7[%c0_25, %c0_26] : memref<16x16xf32, #tpu.memory_space<vmem>>, vector<16x16xf32>
      %cst_27 = arith.constant 2.500000e-01 : f32
      %33 = vector.broadcast %cst_27 : f32 to vector<16x16xf32>
      %34 = arith.mulf %32, %33 : vector<16x16xf32>
      %c1 = arith.constant 1 : index
      %c3_28 = arith.constant 3 : index
      %c3_29 = arith.constant 3 : index
      %35 = vector.load %arg8[%c1, %c3_28, %c3_29] : memref<2x22x22xf32, #tpu.memory_space<vmem>>, vector<1x16x16xf32>
      %36 = vector.shape_cast %35 : vector<1x16x16xf32> to vector<16x16xf32>
      %37 = vector.shape_cast %34 : vector<16x16xf32> to vector<1x16x16xf32>
      tpu.vector_store %arg8[%c1, %c3_28, %c3_29], %37 {strides = array<i32>} : memref<2x22x22xf32, #tpu.memory_space<vmem>>, vector<1x16x16xf32>,
      %c0_30 = arith.constant 0 : index
      %38 = memref.load %arg3[%c0_30] : memref<1xf32, #tpu.memory_space<smem>>
      %39 = vector.broadcast %38 : f32 to vector<16x16xf32>
      %c0_31 = arith.constant 0 : index
      %c0_32 = arith.constant 0 : index
      %c0_33 = arith.constant 0 : index
      %40 = vector.load %arg8[%c0_31, %c0_32, %c0_33] : memref<2x22x22xf32, #tpu.memory_space<vmem>>, vector<1x22x16xf32>
      %41 = vector.shape_cast %40 : vector<1x22x16xf32> to vector<22x16xf32>
      %c1_34 = arith.constant 1 : index
      %c0_35 = arith.constant 0 : index
      %c0_36 = arith.constant 0 : index
      %42 = vector.load %arg8[%c1_34, %c0_35, %c0_36] : memref<2x22x22xf32, #tpu.memory_space<vmem>>, vector<1x22x16xf32>
      %43 = vector.shape_cast %42 : vector<1x22x16xf32> to vector<22x16xf32>
      %c0_37 = arith.constant 0 : index
      %44 = memref.load %arg2[%c0_37] : memref<98xf32, #tpu.memory_space<smem>>
      %c49 = arith.constant 49 : index
      %45 = memref.load %arg2[%c49] : memref<98xf32, #tpu.memory_space<smem>>
      %46 = vector.extract_strided_slice %41 {offsets = [0, 0], sizes = [16, 16], strides = [1, 1]} : vector<22x16xf32> to vector<16x16xf32>
      %47 = vector.broadcast %44 : f32 to vector<16x16xf32>
      %48 = arith.mulf %47, %46 : vector<16x16xf32>
      %49 = arith.addf %39, %48 : vector<16x16xf32>
      %50 = vector.extract_strided_slice %43 {offsets = [0, 0], sizes = [16, 16], strides = [1, 1]} : vector<22x16xf32> to vector<16x16xf32>
      %51 = vector.broadcast %45 : f32 to vector<16x16xf32>
      %52 = arith.mulf %51, %50 : vector<16x16xf32>
      %53 = arith.addf %49, %52 : vector<16x16xf32>
      %c7 = arith.constant 7 : index
      %54 = memref.load %arg2[%c7] : memref<98xf32, #tpu.memory_space<smem>>
      %c56 = arith.constant 56 : index
      %55 = memref.load %arg2[%c56] : memref<98xf32, #tpu.memory_space<smem>>
      %56 = vector.extract_strided_slice %41 {offsets = [1, 0], sizes = [16, 16], strides = [1, 1]} : vector<22x16xf32> to vector<16x16xf32>
      %57 = vector.broadcast %54 : f32 to vector<16x16xf32>
      %58 = arith.mulf %57, %56 : vector<16x16xf32>
      %59 = arith.addf %53, %58 : vector<16x16xf32>
      %60 = vector.extract_strided_slice %43 {offsets = [1, 0], sizes = [16, 16], strides = [1, 1]} : vector<22x16xf32> to vector<16x16xf32>
      %61 = vector.broadcast %55 : f32 to vector<16x16xf32>
      %62 = arith.mulf %61, %60 : vector<16x16xf32>
      %63 = arith.addf %59, %62 : vector<16x16xf32>
      %c14 = arith.constant 14 : index
      %64 = memref.load %arg2[%c14] : memref<98xf32, #tpu.memory_space<smem>>
      %c63 = arith.constant 63 : index
      %65 = memref.load %arg2[%c63] : memref<98xf32, #tpu.memory_space<smem>>
      %66 = vector.extract_strided_slice %41 {offsets = [2, 0], sizes = [16, 16], strides = [1, 1]} : vector<22x16xf32> to vector<16x16xf32>
      %67 = vector.broadcast %64 : f32 to vector<16x16xf32>
      %68 = arith.mulf %67, %66 : vector<16x16xf32>
      %69 = arith.addf %63, %68 : vector<16x16xf32>
      %70 = vector.extract_strided_slice %43 {offsets = [2, 0], sizes = [16, 16], strides = [1, 1]} : vector<22x16xf32> to vector<16x16xf32>
      %71 = vector.broadcast %65 : f32 to vector<16x16xf32>
      %72 = arith.mulf %71, %70 : vector<16x16xf32>
      %73 = arith.addf %69, %72 : vector<16x16xf32>
      %c21 = arith.constant 21 : index
      %74 = memref.load %arg2[%c21] : memref<98xf32, #tpu.memory_space<smem>>
      %c70 = arith.constant 70 : index
      %75 = memref.load %arg2[%c70] : memref<98xf32, #tpu.memory_space<smem>>
      %76 = vector.extract_strided_slice %41 {offsets = [3, 0], sizes = [16, 16], strides = [1, 1]} : vector<22x16xf32> to vector<16x16xf32>
      %77 = vector.broadcast %74 : f32 to vector<16x16xf32>
      %78 = arith.mulf %77, %76 : vector<16x16xf32>
      %79 = arith.addf %73, %78 : vector<16x16xf32>
      %80 = vector.extract_strided_slice %43 {offsets = [3, 0], sizes = [16, 16], strides = [1, 1]} : vector<22x16xf32> to vector<16x16xf32>
      %81 = vector.broadcast %75 : f32 to vector<16x16xf32>
      %82 = arith.mulf %81, %80 : vector<16x16xf32>
      %83 = arith.addf %79, %82 : vector<16x16xf32>
      %c28 = arith.constant 28 : index
      %84 = memref.load %arg2[%c28] : memref<98xf32, #tpu.memory_space<smem>>
      %c77 = arith.constant 77 : index
      %85 = memref.load %arg2[%c77] : memref<98xf32, #tpu.memory_space<smem>>
      %86 = vector.extract_strided_slice %41 {offsets = [4, 0], sizes = [16, 16], strides = [1, 1]} : vector<22x16xf32> to vector<16x16xf32>
      %87 = vector.broadcast %84 : f32 to vector<16x16xf32>
      %88 = arith.mulf %87, %86 : vector<16x16xf32>
      %89 = arith.addf %83, %88 : vector<16x16xf32>
      %90 = vector.extract_strided_slice %43 {offsets = [4, 0], sizes = [16, 16], strides = [1, 1]} : vector<22x16xf32> to vector<16x16xf32>
      %91 = vector.broadcast %85 : f32 to vector<16x16xf32>
      %92 = arith.mulf %91, %90 : vector<16x16xf32>
      %93 = arith.addf %89, %92 : vector<16x16xf32>
      %c35 = arith.constant 35 : index
      %94 = memref.load %arg2[%c35] : memref<98xf32, #tpu.memory_space<smem>>
      %c84 = arith.constant 84 : index
      %95 = memref.load %arg2[%c84] : memref<98xf32, #tpu.memory_space<smem>>
      %96 = vector.extract_strided_slice %41 {offsets = [5, 0], sizes = [16, 16], strides = [1, 1]} : vector<22x16xf32> to vector<16x16xf32>
      %97 = vector.broadcast %94 : f32 to vector<16x16xf32>
      %98 = arith.mulf %97, %96 : vector<16x16xf32>
      %99 = arith.addf %93, %98 : vector<16x16xf32>
      %100 = vector.extract_strided_slice %43 {offsets = [5, 0], sizes = [16, 16], strides = [1, 1]} : vector<22x16xf32> to vector<16x16xf32>
      %101 = vector.broadcast %95 : f32 to vector<16x16xf32>
      %102 = arith.mulf %101, %100 : vector<16x16xf32>
      %103 = arith.addf %99, %102 : vector<16x16xf32>
      %c42 = arith.constant 42 : index
      %104 = memref.load %arg2[%c42] : memref<98xf32, #tpu.memory_space<smem>>
      %c91 = arith.constant 91 : index
      %105 = memref.load %arg2[%c91] : memref<98xf32, #tpu.memory_space<smem>>
      %106 = vector.extract_strided_slice %41 {offsets = [6, 0], sizes = [16, 16], strides = [1, 1]} : vector<22x16xf32> to vector<16x16xf32>
      %107 = vector.broadcast %104 : f32 to vector<16x16xf32>
      %108 = arith.mulf %107, %106 : vector<16x16xf32>
      %109 = arith.addf %103, %108 : vector<16x16xf32>
      %110 = vector.extract_strided_slice %43 {offsets = [6, 0], sizes = [16, 16], strides = [1, 1]} : vector<22x16xf32> to vector<16x16xf32>
      %111 = vector.broadcast %105 : f32 to vector<16x16xf32>
      %112 = arith.mulf %111, %110 : vector<16x16xf32>
      %113 = arith.addf %109, %112 : vector<16x16xf32>
      %c0_38 = arith.constant 0 : index
      %c0_39 = arith.constant 0 : index
      %c1_40 = arith.constant 1 : index
      %114 = vector.load %arg8[%c0_38, %c0_39, %c1_40] : memref<2x22x22xf32, #tpu.memory_space<vmem>>, vector<1x22x16xf32>
      %115 = vector.shape_cast %114 : vector<1x22x16xf32> to vector<22x16xf32>
      %c1_41 = arith.constant 1 : index
      %c0_42 = arith.constant 0 : index
      %c1_43 = arith.constant 1 : index
      %116 = vector.load %arg8[%c1_41, %c0_42, %c1_43] : memref<2x22x22xf32, #tpu.memory_space<vmem>>, vector<1x22x16xf32>
      %117 = vector.shape_cast %116 : vector<1x22x16xf32> to vector<22x16xf32>
      %c1_44 = arith.constant 1 : index
      %118 = memref.load %arg2[%c1_44] : memref<98xf32, #tpu.memory_space<smem>>
      %c50 = arith.constant 50 : index
      %119 = memref.load %arg2[%c50] : memref<98xf32, #tpu.memory_space<smem>>
      %120 = vector.extract_strided_slice %115 {offsets = [0, 0], sizes = [16, 16], strides = [1, 1]} : vector<22x16xf32> to vector<16x16xf32>
      %121 = vector.broadcast %118 : f32 to vector<16x16xf32>
      %122 = arith.mulf %121, %120 : vector<16x16xf32>
      %123 = arith.addf %113, %122 : vector<16x16xf32>
      %124 = vector.extract_strided_slice %117 {offsets = [0, 0], sizes = [16, 16], strides = [1, 1]} : vector<22x16xf32> to vector<16x16xf32>
      %125 = vector.broadcast %119 : f32 to vector<16x16xf32>
      %126 = arith.mulf %125, %124 : vector<16x16xf32>
      %127 = arith.addf %123, %126 : vector<16x16xf32>
      %c8 = arith.constant 8 : index
      %128 = memref.load %arg2[%c8] : memref<98xf32, #tpu.memory_space<smem>>
      %c57 = arith.constant 57 : index
      %129 = memref.load %arg2[%c57] : memref<98xf32, #tpu.memory_space<smem>>
      %130 = vector.extract_strided_slice %115 {offsets = [1, 0], sizes = [16, 16], strides = [1, 1]} : vector<22x16xf32> to vector<16x16xf32>
      %131 = vector.broadcast %128 : f32 to vector<16x16xf32>
      %132 = arith.mulf %131, %130 : vector<16x16xf32>
      %133 = arith.addf %127, %132 : vector<16x16xf32>
      %134 = vector.extract_strided_slice %117 {offsets = [1, 0], sizes = [16, 16], strides = [1, 1]} : vector<22x16xf32> to vector<16x16xf32>
      %135 = vector.broadcast %129 : f32 to vector<16x16xf32>
      %136 = arith.mulf %135, %134 : vector<16x16xf32>
      %137 = arith.addf %133, %136 : vector<16x16xf32>
      %c15 = arith.constant 15 : index
      %138 = memref.load %arg2[%c15] : memref<98xf32, #tpu.memory_space<smem>>
      %c64 = arith.constant 64 : index
      %139 = memref.load %arg2[%c64] : memref<98xf32, #tpu.memory_space<smem>>
      %140 = vector.extract_strided_slice %115 {offsets = [2, 0], sizes = [16, 16], strides = [1, 1]} : vector<22x16xf32> to vector<16x16xf32>
      %141 = vector.broadcast %138 : f32 to vector<16x16xf32>
      %142 = arith.mulf %141, %140 : vector<16x16xf32>
      %143 = arith.addf %137, %142 : vector<16x16xf32>
      %144 = vector.extract_strided_slice %117 {offsets = [2, 0], sizes = [16, 16], strides = [1, 1]} : vector<22x16xf32> to vector<16x16xf32>
      %145 = vector.broadcast %139 : f32 to vector<16x16xf32>
      %146 = arith.mulf %145, %144 : vector<16x16xf32>
      %147 = arith.addf %143, %146 : vector<16x16xf32>
      %c22 = arith.constant 22 : index
      %148 = memref.load %arg2[%c22] : memref<98xf32, #tpu.memory_space<smem>>
      %c71 = arith.constant 71 : index
      %149 = memref.load %arg2[%c71] : memref<98xf32, #tpu.memory_space<smem>>
      %150 = vector.extract_strided_slice %115 {offsets = [3, 0], sizes = [16, 16], strides = [1, 1]} : vector<22x16xf32> to vector<16x16xf32>
      %151 = vector.broadcast %148 : f32 to vector<16x16xf32>
      %152 = arith.mulf %151, %150 : vector<16x16xf32>
      %153 = arith.addf %147, %152 : vector<16x16xf32>
      %154 = vector.extract_strided_slice %117 {offsets = [3, 0], sizes = [16, 16], strides = [1, 1]} : vector<22x16xf32> to vector<16x16xf32>
      %155 = vector.broadcast %149 : f32 to vector<16x16xf32>
      %156 = arith.mulf %155, %154 : vector<16x16xf32>
      %157 = arith.addf %153, %156 : vector<16x16xf32>
      %c29 = arith.constant 29 : index
      %158 = memref.load %arg2[%c29] : memref<98xf32, #tpu.memory_space<smem>>
      %c78 = arith.constant 78 : index
      %159 = memref.load %arg2[%c78] : memref<98xf32, #tpu.memory_space<smem>>
      %160 = vector.extract_strided_slice %115 {offsets = [4, 0], sizes = [16, 16], strides = [1, 1]} : vector<22x16xf32> to vector<16x16xf32>
      %161 = vector.broadcast %158 : f32 to vector<16x16xf32>
      %162 = arith.mulf %161, %160 : vector<16x16xf32>
      %163 = arith.addf %157, %162 : vector<16x16xf32>
      %164 = vector.extract_strided_slice %117 {offsets = [4, 0], sizes = [16, 16], strides = [1, 1]} : vector<22x16xf32> to vector<16x16xf32>
      %165 = vector.broadcast %159 : f32 to vector<16x16xf32>
      %166 = arith.mulf %165, %164 : vector<16x16xf32>
      %167 = arith.addf %163, %166 : vector<16x16xf32>
      %c36 = arith.constant 36 : index
      %168 = memref.load %arg2[%c36] : memref<98xf32, #tpu.memory_space<smem>>
      %c85 = arith.constant 85 : index
      %169 = memref.load %arg2[%c85] : memref<98xf32, #tpu.memory_space<smem>>
      %170 = vector.extract_strided_slice %115 {offsets = [5, 0], sizes = [16, 16], strides = [1, 1]} : vector<22x16xf32> to vector<16x16xf32>
      %171 = vector.broadcast %168 : f32 to vector<16x16xf32>
      %172 = arith.mulf %171, %170 : vector<16x16xf32>
      %173 = arith.addf %167, %172 : vector<16x16xf32>
      %174 = vector.extract_strided_slice %117 {offsets = [5, 0], sizes = [16, 16], strides = [1, 1]} : vector<22x16xf32> to vector<16x16xf32>
      %175 = vector.broadcast %169 : f32 to vector<16x16xf32>
      %176 = arith.mulf %175, %174 : vector<16x16xf32>
      %177 = arith.addf %173, %176 : vector<16x16xf32>
      %c43 = arith.constant 43 : index
      %178 = memref.load %arg2[%c43] : memref<98xf32, #tpu.memory_space<smem>>
      %c92 = arith.constant 92 : index
      %179 = memref.load %arg2[%c92] : memref<98xf32, #tpu.memory_space<smem>>
      %180 = vector.extract_strided_slice %115 {offsets = [6, 0], sizes = [16, 16], strides = [1, 1]} : vector<22x16xf32> to vector<16x16xf32>
      %181 = vector.broadcast %178 : f32 to vector<16x16xf32>
      %182 = arith.mulf %181, %180 : vector<16x16xf32>
      %183 = arith.addf %177, %182 : vector<16x16xf32>
      %184 = vector.extract_strided_slice %117 {offsets = [6, 0], sizes = [16, 16], strides = [1, 1]} : vector<22x16xf32> to vector<16x16xf32>
      %185 = vector.broadcast %179 : f32 to vector<16x16xf32>
      %186 = arith.mulf %185, %184 : vector<16x16xf32>
      %187 = arith.addf %183, %186 : vector<16x16xf32>
      %c0_45 = arith.constant 0 : index
      %c0_46 = arith.constant 0 : index
      %c2 = arith.constant 2 : index
      %188 = vector.load %arg8[%c0_45, %c0_46, %c2] : memref<2x22x22xf32, #tpu.memory_space<vmem>>, vector<1x22x16xf32>
      %189 = vector.shape_cast %188 : vector<1x22x16xf32> to vector<22x16xf32>
      %c1_47 = arith.constant 1 : index
      %c0_48 = arith.constant 0 : index
      %c2_49 = arith.constant 2 : index
      %190 = vector.load %arg8[%c1_47, %c0_48, %c2_49] : memref<2x22x22xf32, #tpu.memory_space<vmem>>, vector<1x22x16xf32>
      %191 = vector.shape_cast %190 : vector<1x22x16xf32> to vector<22x16xf32>
      %c2_50 = arith.constant 2 : index
      %192 = memref.load %arg2[%c2_50] : memref<98xf32, #tpu.memory_space<smem>>
      %c51 = arith.constant 51 : index
      %193 = memref.load %arg2[%c51] : memref<98xf32, #tpu.memory_space<smem>>
      %194 = vector.extract_strided_slice %189 {offsets = [0, 0], sizes = [16, 16], strides = [1, 1]} : vector<22x16xf32> to vector<16x16xf32>
      %195 = vector.broadcast %192 : f32 to vector<16x16xf32>
      %196 = arith.mulf %195, %194 : vector<16x16xf32>
      %197 = arith.addf %187, %196 : vector<16x16xf32>
      %198 = vector.extract_strided_slice %191 {offsets = [0, 0], sizes = [16, 16], strides = [1, 1]} : vector<22x16xf32> to vector<16x16xf32>
      %199 = vector.broadcast %193 : f32 to vector<16x16xf32>
      %200 = arith.mulf %199, %198 : vector<16x16xf32>
      %201 = arith.addf %197, %200 : vector<16x16xf32>
      %c9 = arith.constant 9 : index
      %202 = memref.load %arg2[%c9] : memref<98xf32, #tpu.memory_space<smem>>
      %c58 = arith.constant 58 : index
      %203 = memref.load %arg2[%c58] : memref<98xf32, #tpu.memory_space<smem>>
      %204 = vector.extract_strided_slice %189 {offsets = [1, 0], sizes = [16, 16], strides = [1, 1]} : vector<22x16xf32> to vector<16x16xf32>
      %205 = vector.broadcast %202 : f32 to vector<16x16xf32>
      %206 = arith.mulf %205, %204 : vector<16x16xf32>
      %207 = arith.addf %201, %206 : vector<16x16xf32>
      %208 = vector.extract_strided_slice %191 {offsets = [1, 0], sizes = [16, 16], strides = [1, 1]} : vector<22x16xf32> to vector<16x16xf32>
      %209 = vector.broadcast %203 : f32 to vector<16x16xf32>
      %210 = arith.mulf %209, %208 : vector<16x16xf32>
      %211 = arith.addf %207, %210 : vector<16x16xf32>
      %c16 = arith.constant 16 : index
      %212 = memref.load %arg2[%c16] : memref<98xf32, #tpu.memory_space<smem>>
      %c65 = arith.constant 65 : index
      %213 = memref.load %arg2[%c65] : memref<98xf32, #tpu.memory_space<smem>>
      %214 = vector.extract_strided_slice %189 {offsets = [2, 0], sizes = [16, 16], strides = [1, 1]} : vector<22x16xf32> to vector<16x16xf32>
      %215 = vector.broadcast %212 : f32 to vector<16x16xf32>
      %216 = arith.mulf %215, %214 : vector<16x16xf32>
      %217 = arith.addf %211, %216 : vector<16x16xf32>
      %218 = vector.extract_strided_slice %191 {offsets = [2, 0], sizes = [16, 16], strides = [1, 1]} : vector<22x16xf32> to vector<16x16xf32>
      %219 = vector.broadcast %213 : f32 to vector<16x16xf32>
      %220 = arith.mulf %219, %218 : vector<16x16xf32>
      %221 = arith.addf %217, %220 : vector<16x16xf32>
      %c23 = arith.constant 23 : index
      %222 = memref.load %arg2[%c23] : memref<98xf32, #tpu.memory_space<smem>>
      %c72 = arith.constant 72 : index
      %223 = memref.load %arg2[%c72] : memref<98xf32, #tpu.memory_space<smem>>
      %224 = vector.extract_strided_slice %189 {offsets = [3, 0], sizes = [16, 16], strides = [1, 1]} : vector<22x16xf32> to vector<16x16xf32>
      %225 = vector.broadcast %222 : f32 to vector<16x16xf32>
      %226 = arith.mulf %225, %224 : vector<16x16xf32>
      %227 = arith.addf %221, %226 : vector<16x16xf32>
      %228 = vector.extract_strided_slice %191 {offsets = [3, 0], sizes = [16, 16], strides = [1, 1]} : vector<22x16xf32> to vector<16x16xf32>
      %229 = vector.broadcast %223 : f32 to vector<16x16xf32>
      %230 = arith.mulf %229, %228 : vector<16x16xf32>
      %231 = arith.addf %227, %230 : vector<16x16xf32>
      %c30 = arith.constant 30 : index
      %232 = memref.load %arg2[%c30] : memref<98xf32, #tpu.memory_space<smem>>
      %c79 = arith.constant 79 : index
      %233 = memref.load %arg2[%c79] : memref<98xf32, #tpu.memory_space<smem>>
      %234 = vector.extract_strided_slice %189 {offsets = [4, 0], sizes = [16, 16], strides = [1, 1]} : vector<22x16xf32> to vector<16x16xf32>
      %235 = vector.broadcast %232 : f32 to vector<16x16xf32>
      %236 = arith.mulf %235, %234 : vector<16x16xf32>
      %237 = arith.addf %231, %236 : vector<16x16xf32>
      %238 = vector.extract_strided_slice %191 {offsets = [4, 0], sizes = [16, 16], strides = [1, 1]} : vector<22x16xf32> to vector<16x16xf32>
      %239 = vector.broadcast %233 : f32 to vector<16x16xf32>
      %240 = arith.mulf %239, %238 : vector<16x16xf32>
      %241 = arith.addf %237, %240 : vector<16x16xf32>
      %c37 = arith.constant 37 : index
      %242 = memref.load %arg2[%c37] : memref<98xf32, #tpu.memory_space<smem>>
      %c86 = arith.constant 86 : index
      %243 = memref.load %arg2[%c86] : memref<98xf32, #tpu.memory_space<smem>>
      %244 = vector.extract_strided_slice %189 {offsets = [5, 0], sizes = [16, 16], strides = [1, 1]} : vector<22x16xf32> to vector<16x16xf32>
      %245 = vector.broadcast %242 : f32 to vector<16x16xf32>
      %246 = arith.mulf %245, %244 : vector<16x16xf32>
      %247 = arith.addf %241, %246 : vector<16x16xf32>
      %248 = vector.extract_strided_slice %191 {offsets = [5, 0], sizes = [16, 16], strides = [1, 1]} : vector<22x16xf32> to vector<16x16xf32>
      %249 = vector.broadcast %243 : f32 to vector<16x16xf32>
      %250 = arith.mulf %249, %248 : vector<16x16xf32>
      %251 = arith.addf %247, %250 : vector<16x16xf32>
      %c44 = arith.constant 44 : index
      %252 = memref.load %arg2[%c44] : memref<98xf32, #tpu.memory_space<smem>>
      %c93 = arith.constant 93 : index
      %253 = memref.load %arg2[%c93] : memref<98xf32, #tpu.memory_space<smem>>
      %254 = vector.extract_strided_slice %189 {offsets = [6, 0], sizes = [16, 16], strides = [1, 1]} : vector<22x16xf32> to vector<16x16xf32>
      %255 = vector.broadcast %252 : f32 to vector<16x16xf32>
      %256 = arith.mulf %255, %254 : vector<16x16xf32>
      %257 = arith.addf %251, %256 : vector<16x16xf32>
      %258 = vector.extract_strided_slice %191 {offsets = [6, 0], sizes = [16, 16], strides = [1, 1]} : vector<22x16xf32> to vector<16x16xf32>
      %259 = vector.broadcast %253 : f32 to vector<16x16xf32>
      %260 = arith.mulf %259, %258 : vector<16x16xf32>
      %261 = arith.addf %257, %260 : vector<16x16xf32>
      %c0_51 = arith.constant 0 : index
      %c0_52 = arith.constant 0 : index
      %c3_53 = arith.constant 3 : index
      %262 = vector.load %arg8[%c0_51, %c0_52, %c3_53] : memref<2x22x22xf32, #tpu.memory_space<vmem>>, vector<1x22x16xf32>
      %263 = vector.shape_cast %262 : vector<1x22x16xf32> to vector<22x16xf32>
      %c1_54 = arith.constant 1 : index
      %c0_55 = arith.constant 0 : index
      %c3_56 = arith.constant 3 : index
      %264 = vector.load %arg8[%c1_54, %c0_55, %c3_56] : memref<2x22x22xf32, #tpu.memory_space<vmem>>, vector<1x22x16xf32>
      %265 = vector.shape_cast %264 : vector<1x22x16xf32> to vector<22x16xf32>
      %c3_57 = arith.constant 3 : index
      %266 = memref.load %arg2[%c3_57] : memref<98xf32, #tpu.memory_space<smem>>
      %c52 = arith.constant 52 : index
      %267 = memref.load %arg2[%c52] : memref<98xf32, #tpu.memory_space<smem>>
      %268 = vector.extract_strided_slice %263 {offsets = [0, 0], sizes = [16, 16], strides = [1, 1]} : vector<22x16xf32> to vector<16x16xf32>
      %269 = vector.broadcast %266 : f32 to vector<16x16xf32>
      %270 = arith.mulf %269, %268 : vector<16x16xf32>
      %271 = arith.addf %261, %270 : vector<16x16xf32>
      %272 = vector.extract_strided_slice %265 {offsets = [0, 0], sizes = [16, 16], strides = [1, 1]} : vector<22x16xf32> to vector<16x16xf32>
      %273 = vector.broadcast %267 : f32 to vector<16x16xf32>
      %274 = arith.mulf %273, %272 : vector<16x16xf32>
      %275 = arith.addf %271, %274 : vector<16x16xf32>
      %c10 = arith.constant 10 : index
      %276 = memref.load %arg2[%c10] : memref<98xf32, #tpu.memory_space<smem>>
      %c59 = arith.constant 59 : index
      %277 = memref.load %arg2[%c59] : memref<98xf32, #tpu.memory_space<smem>>
      %278 = vector.extract_strided_slice %263 {offsets = [1, 0], sizes = [16, 16], strides = [1, 1]} : vector<22x16xf32> to vector<16x16xf32>
      %279 = vector.broadcast %276 : f32 to vector<16x16xf32>
      %280 = arith.mulf %279, %278 : vector<16x16xf32>
      %281 = arith.addf %275, %280 : vector<16x16xf32>
      %282 = vector.extract_strided_slice %265 {offsets = [1, 0], sizes = [16, 16], strides = [1, 1]} : vector<22x16xf32> to vector<16x16xf32>
      %283 = vector.broadcast %277 : f32 to vector<16x16xf32>
      %284 = arith.mulf %283, %282 : vector<16x16xf32>
      %285 = arith.addf %281, %284 : vector<16x16xf32>
      %c17 = arith.constant 17 : index
      %286 = memref.load %arg2[%c17] : memref<98xf32, #tpu.memory_space<smem>>
      %c66 = arith.constant 66 : index
      %287 = memref.load %arg2[%c66] : memref<98xf32, #tpu.memory_space<smem>>
      %288 = vector.extract_strided_slice %263 {offsets = [2, 0], sizes = [16, 16], strides = [1, 1]} : vector<22x16xf32> to vector<16x16xf32>
      %289 = vector.broadcast %286 : f32 to vector<16x16xf32>
      %290 = arith.mulf %289, %288 : vector<16x16xf32>
      %291 = arith.addf %285, %290 : vector<16x16xf32>
      %292 = vector.extract_strided_slice %265 {offsets = [2, 0], sizes = [16, 16], strides = [1, 1]} : vector<22x16xf32> to vector<16x16xf32>
      %293 = vector.broadcast %287 : f32 to vector<16x16xf32>
      %294 = arith.mulf %293, %292 : vector<16x16xf32>
      %295 = arith.addf %291, %294 : vector<16x16xf32>
      %c24 = arith.constant 24 : index
      %296 = memref.load %arg2[%c24] : memref<98xf32, #tpu.memory_space<smem>>
      %c73 = arith.constant 73 : index
      %297 = memref.load %arg2[%c73] : memref<98xf32, #tpu.memory_space<smem>>
      %298 = vector.extract_strided_slice %263 {offsets = [3, 0], sizes = [16, 16], strides = [1, 1]} : vector<22x16xf32> to vector<16x16xf32>
      %299 = vector.broadcast %296 : f32 to vector<16x16xf32>
      %300 = arith.mulf %299, %298 : vector<16x16xf32>
      %301 = arith.addf %295, %300 : vector<16x16xf32>
      %302 = vector.extract_strided_slice %265 {offsets = [3, 0], sizes = [16, 16], strides = [1, 1]} : vector<22x16xf32> to vector<16x16xf32>
      %303 = vector.broadcast %297 : f32 to vector<16x16xf32>
      %304 = arith.mulf %303, %302 : vector<16x16xf32>
      %305 = arith.addf %301, %304 : vector<16x16xf32>
      %c31 = arith.constant 31 : index
      %306 = memref.load %arg2[%c31] : memref<98xf32, #tpu.memory_space<smem>>
      %c80 = arith.constant 80 : index
      %307 = memref.load %arg2[%c80] : memref<98xf32, #tpu.memory_space<smem>>
      %308 = vector.extract_strided_slice %263 {offsets = [4, 0], sizes = [16, 16], strides = [1, 1]} : vector<22x16xf32> to vector<16x16xf32>
      %309 = vector.broadcast %306 : f32 to vector<16x16xf32>
      %310 = arith.mulf %309, %308 : vector<16x16xf32>
      %311 = arith.addf %305, %310 : vector<16x16xf32>
      %312 = vector.extract_strided_slice %265 {offsets = [4, 0], sizes = [16, 16], strides = [1, 1]} : vector<22x16xf32> to vector<16x16xf32>
      %313 = vector.broadcast %307 : f32 to vector<16x16xf32>
      %314 = arith.mulf %313, %312 : vector<16x16xf32>
      %315 = arith.addf %311, %314 : vector<16x16xf32>
      %c38 = arith.constant 38 : index
      %316 = memref.load %arg2[%c38] : memref<98xf32, #tpu.memory_space<smem>>
      %c87 = arith.constant 87 : index
      %317 = memref.load %arg2[%c87] : memref<98xf32, #tpu.memory_space<smem>>
      %318 = vector.extract_strided_slice %263 {offsets = [5, 0], sizes = [16, 16], strides = [1, 1]} : vector<22x16xf32> to vector<16x16xf32>
      %319 = vector.broadcast %316 : f32 to vector<16x16xf32>
      %320 = arith.mulf %319, %318 : vector<16x16xf32>
      %321 = arith.addf %315, %320 : vector<16x16xf32>
      %322 = vector.extract_strided_slice %265 {offsets = [5, 0], sizes = [16, 16], strides = [1, 1]} : vector<22x16xf32> to vector<16x16xf32>
      %323 = vector.broadcast %317 : f32 to vector<16x16xf32>
      %324 = arith.mulf %323, %322 : vector<16x16xf32>
      %325 = arith.addf %321, %324 : vector<16x16xf32>
      %c45 = arith.constant 45 : index
      %326 = memref.load %arg2[%c45] : memref<98xf32, #tpu.memory_space<smem>>
      %c94 = arith.constant 94 : index
      %327 = memref.load %arg2[%c94] : memref<98xf32, #tpu.memory_space<smem>>
      %328 = vector.extract_strided_slice %263 {offsets = [6, 0], sizes = [16, 16], strides = [1, 1]} : vector<22x16xf32> to vector<16x16xf32>
      %329 = vector.broadcast %326 : f32 to vector<16x16xf32>
      %330 = arith.mulf %329, %328 : vector<16x16xf32>
      %331 = arith.addf %325, %330 : vector<16x16xf32>
      %332 = vector.extract_strided_slice %265 {offsets = [6, 0], sizes = [16, 16], strides = [1, 1]} : vector<22x16xf32> to vector<16x16xf32>
      %333 = vector.broadcast %327 : f32 to vector<16x16xf32>
      %334 = arith.mulf %333, %332 : vector<16x16xf32>
      %335 = arith.addf %331, %334 : vector<16x16xf32>
      %c0_58 = arith.constant 0 : index
      %c0_59 = arith.constant 0 : index
      %c4 = arith.constant 4 : index
      %336 = vector.load %arg8[%c0_58, %c0_59, %c4] : memref<2x22x22xf32, #tpu.memory_space<vmem>>, vector<1x22x16xf32>
      %337 = vector.shape_cast %336 : vector<1x22x16xf32> to vector<22x16xf32>
      %c1_60 = arith.constant 1 : index
      %c0_61 = arith.constant 0 : index
      %c4_62 = arith.constant 4 : index
      %338 = vector.load %arg8[%c1_60, %c0_61, %c4_62] : memref<2x22x22xf32, #tpu.memory_space<vmem>>, vector<1x22x16xf32>
      %339 = vector.shape_cast %338 : vector<1x22x16xf32> to vector<22x16xf32>
      %c4_63 = arith.constant 4 : index
      %340 = memref.load %arg2[%c4_63] : memref<98xf32, #tpu.memory_space<smem>>
      %c53 = arith.constant 53 : index
      %341 = memref.load %arg2[%c53] : memref<98xf32, #tpu.memory_space<smem>>
      %342 = vector.extract_strided_slice %337 {offsets = [0, 0], sizes = [16, 16], strides = [1, 1]} : vector<22x16xf32> to vector<16x16xf32>
      %343 = vector.broadcast %340 : f32 to vector<16x16xf32>
      %344 = arith.mulf %343, %342 : vector<16x16xf32>
      %345 = arith.addf %335, %344 : vector<16x16xf32>
      %346 = vector.extract_strided_slice %339 {offsets = [0, 0], sizes = [16, 16], strides = [1, 1]} : vector<22x16xf32> to vector<16x16xf32>
      %347 = vector.broadcast %341 : f32 to vector<16x16xf32>
      %348 = arith.mulf %347, %346 : vector<16x16xf32>
      %349 = arith.addf %345, %348 : vector<16x16xf32>
      %c11 = arith.constant 11 : index
      %350 = memref.load %arg2[%c11] : memref<98xf32, #tpu.memory_space<smem>>
      %c60 = arith.constant 60 : index
      %351 = memref.load %arg2[%c60] : memref<98xf32, #tpu.memory_space<smem>>
      %352 = vector.extract_strided_slice %337 {offsets = [1, 0], sizes = [16, 16], strides = [1, 1]} : vector<22x16xf32> to vector<16x16xf32>
      %353 = vector.broadcast %350 : f32 to vector<16x16xf32>
      %354 = arith.mulf %353, %352 : vector<16x16xf32>
      %355 = arith.addf %349, %354 : vector<16x16xf32>
      %356 = vector.extract_strided_slice %339 {offsets = [1, 0], sizes = [16, 16], strides = [1, 1]} : vector<22x16xf32> to vector<16x16xf32>
      %357 = vector.broadcast %351 : f32 to vector<16x16xf32>
      %358 = arith.mulf %357, %356 : vector<16x16xf32>
      %359 = arith.addf %355, %358 : vector<16x16xf32>
      %c18 = arith.constant 18 : index
      %360 = memref.load %arg2[%c18] : memref<98xf32, #tpu.memory_space<smem>>
      %c67 = arith.constant 67 : index
      %361 = memref.load %arg2[%c67] : memref<98xf32, #tpu.memory_space<smem>>
      %362 = vector.extract_strided_slice %337 {offsets = [2, 0], sizes = [16, 16], strides = [1, 1]} : vector<22x16xf32> to vector<16x16xf32>
      %363 = vector.broadcast %360 : f32 to vector<16x16xf32>
      %364 = arith.mulf %363, %362 : vector<16x16xf32>
      %365 = arith.addf %359, %364 : vector<16x16xf32>
      %366 = vector.extract_strided_slice %339 {offsets = [2, 0], sizes = [16, 16], strides = [1, 1]} : vector<22x16xf32> to vector<16x16xf32>
      %367 = vector.broadcast %361 : f32 to vector<16x16xf32>
      %368 = arith.mulf %367, %366 : vector<16x16xf32>
      %369 = arith.addf %365, %368 : vector<16x16xf32>
      %c25 = arith.constant 25 : index
      %370 = memref.load %arg2[%c25] : memref<98xf32, #tpu.memory_space<smem>>
      %c74 = arith.constant 74 : index
      %371 = memref.load %arg2[%c74] : memref<98xf32, #tpu.memory_space<smem>>
      %372 = vector.extract_strided_slice %337 {offsets = [3, 0], sizes = [16, 16], strides = [1, 1]} : vector<22x16xf32> to vector<16x16xf32>
      %373 = vector.broadcast %370 : f32 to vector<16x16xf32>
      %374 = arith.mulf %373, %372 : vector<16x16xf32>
      %375 = arith.addf %369, %374 : vector<16x16xf32>
      %376 = vector.extract_strided_slice %339 {offsets = [3, 0], sizes = [16, 16], strides = [1, 1]} : vector<22x16xf32> to vector<16x16xf32>
      %377 = vector.broadcast %371 : f32 to vector<16x16xf32>
      %378 = arith.mulf %377, %376 : vector<16x16xf32>
      %379 = arith.addf %375, %378 : vector<16x16xf32>
      %c32 = arith.constant 32 : index
      %380 = memref.load %arg2[%c32] : memref<98xf32, #tpu.memory_space<smem>>
      %c81 = arith.constant 81 : index
      %381 = memref.load %arg2[%c81] : memref<98xf32, #tpu.memory_space<smem>>
      %382 = vector.extract_strided_slice %337 {offsets = [4, 0], sizes = [16, 16], strides = [1, 1]} : vector<22x16xf32> to vector<16x16xf32>
      %383 = vector.broadcast %380 : f32 to vector<16x16xf32>
      %384 = arith.mulf %383, %382 : vector<16x16xf32>
      %385 = arith.addf %379, %384 : vector<16x16xf32>
      %386 = vector.extract_strided_slice %339 {offsets = [4, 0], sizes = [16, 16], strides = [1, 1]} : vector<22x16xf32> to vector<16x16xf32>
      %387 = vector.broadcast %381 : f32 to vector<16x16xf32>
      %388 = arith.mulf %387, %386 : vector<16x16xf32>
      %389 = arith.addf %385, %388 : vector<16x16xf32>
      %c39 = arith.constant 39 : index
      %390 = memref.load %arg2[%c39] : memref<98xf32, #tpu.memory_space<smem>>
      %c88 = arith.constant 88 : index
      %391 = memref.load %arg2[%c88] : memref<98xf32, #tpu.memory_space<smem>>
      %392 = vector.extract_strided_slice %337 {offsets = [5, 0], sizes = [16, 16], strides = [1, 1]} : vector<22x16xf32> to vector<16x16xf32>
      %393 = vector.broadcast %390 : f32 to vector<16x16xf32>
      %394 = arith.mulf %393, %392 : vector<16x16xf32>
      %395 = arith.addf %389, %394 : vector<16x16xf32>
      %396 = vector.extract_strided_slice %339 {offsets = [5, 0], sizes = [16, 16], strides = [1, 1]} : vector<22x16xf32> to vector<16x16xf32>
      %397 = vector.broadcast %391 : f32 to vector<16x16xf32>
      %398 = arith.mulf %397, %396 : vector<16x16xf32>
      %399 = arith.addf %395, %398 : vector<16x16xf32>
      %c46 = arith.constant 46 : index
      %400 = memref.load %arg2[%c46] : memref<98xf32, #tpu.memory_space<smem>>
      %c95 = arith.constant 95 : index
      %401 = memref.load %arg2[%c95] : memref<98xf32, #tpu.memory_space<smem>>
      %402 = vector.extract_strided_slice %337 {offsets = [6, 0], sizes = [16, 16], strides = [1, 1]} : vector<22x16xf32> to vector<16x16xf32>
      %403 = vector.broadcast %400 : f32 to vector<16x16xf32>
      %404 = arith.mulf %403, %402 : vector<16x16xf32>
      %405 = arith.addf %399, %404 : vector<16x16xf32>
      %406 = vector.extract_strided_slice %339 {offsets = [6, 0], sizes = [16, 16], strides = [1, 1]} : vector<22x16xf32> to vector<16x16xf32>
      %407 = vector.broadcast %401 : f32 to vector<16x16xf32>
      %408 = arith.mulf %407, %406 : vector<16x16xf32>
      %409 = arith.addf %405, %408 : vector<16x16xf32>
      %c0_64 = arith.constant 0 : index
      %c0_65 = arith.constant 0 : index
      %c5 = arith.constant 5 : index
      %410 = vector.load %arg8[%c0_64, %c0_65, %c5] : memref<2x22x22xf32, #tpu.memory_space<vmem>>, vector<1x22x16xf32>
      %411 = vector.shape_cast %410 : vector<1x22x16xf32> to vector<22x16xf32>
      %c1_66 = arith.constant 1 : index
      %c0_67 = arith.constant 0 : index
      %c5_68 = arith.constant 5 : index
      %412 = vector.load %arg8[%c1_66, %c0_67, %c5_68] : memref<2x22x22xf32, #tpu.memory_space<vmem>>, vector<1x22x16xf32>
      %413 = vector.shape_cast %412 : vector<1x22x16xf32> to vector<22x16xf32>
      %c5_69 = arith.constant 5 : index
      %414 = memref.load %arg2[%c5_69] : memref<98xf32, #tpu.memory_space<smem>>
      %c54 = arith.constant 54 : index
      %415 = memref.load %arg2[%c54] : memref<98xf32, #tpu.memory_space<smem>>
      %416 = vector.extract_strided_slice %411 {offsets = [0, 0], sizes = [16, 16], strides = [1, 1]} : vector<22x16xf32> to vector<16x16xf32>
      %417 = vector.broadcast %414 : f32 to vector<16x16xf32>
      %418 = arith.mulf %417, %416 : vector<16x16xf32>
      %419 = arith.addf %409, %418 : vector<16x16xf32>
      %420 = vector.extract_strided_slice %413 {offsets = [0, 0], sizes = [16, 16], strides = [1, 1]} : vector<22x16xf32> to vector<16x16xf32>
      %421 = vector.broadcast %415 : f32 to vector<16x16xf32>
      %422 = arith.mulf %421, %420 : vector<16x16xf32>
      %423 = arith.addf %419, %422 : vector<16x16xf32>
      %c12 = arith.constant 12 : index
      %424 = memref.load %arg2[%c12] : memref<98xf32, #tpu.memory_space<smem>>
      %c61 = arith.constant 61 : index
      %425 = memref.load %arg2[%c61] : memref<98xf32, #tpu.memory_space<smem>>
      %426 = vector.extract_strided_slice %411 {offsets = [1, 0], sizes = [16, 16], strides = [1, 1]} : vector<22x16xf32> to vector<16x16xf32>
      %427 = vector.broadcast %424 : f32 to vector<16x16xf32>
      %428 = arith.mulf %427, %426 : vector<16x16xf32>
      %429 = arith.addf %423, %428 : vector<16x16xf32>
      %430 = vector.extract_strided_slice %413 {offsets = [1, 0], sizes = [16, 16], strides = [1, 1]} : vector<22x16xf32> to vector<16x16xf32>
      %431 = vector.broadcast %425 : f32 to vector<16x16xf32>
      %432 = arith.mulf %431, %430 : vector<16x16xf32>
      %433 = arith.addf %429, %432 : vector<16x16xf32>
      %c19 = arith.constant 19 : index
      %434 = memref.load %arg2[%c19] : memref<98xf32, #tpu.memory_space<smem>>
      %c68 = arith.constant 68 : index
      %435 = memref.load %arg2[%c68] : memref<98xf32, #tpu.memory_space<smem>>
      %436 = vector.extract_strided_slice %411 {offsets = [2, 0], sizes = [16, 16], strides = [1, 1]} : vector<22x16xf32> to vector<16x16xf32>
      %437 = vector.broadcast %434 : f32 to vector<16x16xf32>
      %438 = arith.mulf %437, %436 : vector<16x16xf32>
      %439 = arith.addf %433, %438 : vector<16x16xf32>
      %440 = vector.extract_strided_slice %413 {offsets = [2, 0], sizes = [16, 16], strides = [1, 1]} : vector<22x16xf32> to vector<16x16xf32>
      %441 = vector.broadcast %435 : f32 to vector<16x16xf32>
      %442 = arith.mulf %441, %440 : vector<16x16xf32>
      %443 = arith.addf %439, %442 : vector<16x16xf32>
      %c26 = arith.constant 26 : index
      %444 = memref.load %arg2[%c26] : memref<98xf32, #tpu.memory_space<smem>>
      %c75 = arith.constant 75 : index
      %445 = memref.load %arg2[%c75] : memref<98xf32, #tpu.memory_space<smem>>
      %446 = vector.extract_strided_slice %411 {offsets = [3, 0], sizes = [16, 16], strides = [1, 1]} : vector<22x16xf32> to vector<16x16xf32>
      %447 = vector.broadcast %444 : f32 to vector<16x16xf32>
      %448 = arith.mulf %447, %446 : vector<16x16xf32>
      %449 = arith.addf %443, %448 : vector<16x16xf32>
      %450 = vector.extract_strided_slice %413 {offsets = [3, 0], sizes = [16, 16], strides = [1, 1]} : vector<22x16xf32> to vector<16x16xf32>
      %451 = vector.broadcast %445 : f32 to vector<16x16xf32>
      %452 = arith.mulf %451, %450 : vector<16x16xf32>
      %453 = arith.addf %449, %452 : vector<16x16xf32>
      %c33 = arith.constant 33 : index
      %454 = memref.load %arg2[%c33] : memref<98xf32, #tpu.memory_space<smem>>
      %c82 = arith.constant 82 : index
      %455 = memref.load %arg2[%c82] : memref<98xf32, #tpu.memory_space<smem>>
      %456 = vector.extract_strided_slice %411 {offsets = [4, 0], sizes = [16, 16], strides = [1, 1]} : vector<22x16xf32> to vector<16x16xf32>
      %457 = vector.broadcast %454 : f32 to vector<16x16xf32>
      %458 = arith.mulf %457, %456 : vector<16x16xf32>
      %459 = arith.addf %453, %458 : vector<16x16xf32>
      %460 = vector.extract_strided_slice %413 {offsets = [4, 0], sizes = [16, 16], strides = [1, 1]} : vector<22x16xf32> to vector<16x16xf32>
      %461 = vector.broadcast %455 : f32 to vector<16x16xf32>
      %462 = arith.mulf %461, %460 : vector<16x16xf32>
      %463 = arith.addf %459, %462 : vector<16x16xf32>
      %c40 = arith.constant 40 : index
      %464 = memref.load %arg2[%c40] : memref<98xf32, #tpu.memory_space<smem>>
      %c89 = arith.constant 89 : index
      %465 = memref.load %arg2[%c89] : memref<98xf32, #tpu.memory_space<smem>>
      %466 = vector.extract_strided_slice %411 {offsets = [5, 0], sizes = [16, 16], strides = [1, 1]} : vector<22x16xf32> to vector<16x16xf32>
      %467 = vector.broadcast %464 : f32 to vector<16x16xf32>
      %468 = arith.mulf %467, %466 : vector<16x16xf32>
      %469 = arith.addf %463, %468 : vector<16x16xf32>
      %470 = vector.extract_strided_slice %413 {offsets = [5, 0], sizes = [16, 16], strides = [1, 1]} : vector<22x16xf32> to vector<16x16xf32>
      %471 = vector.broadcast %465 : f32 to vector<16x16xf32>
      %472 = arith.mulf %471, %470 : vector<16x16xf32>
      %473 = arith.addf %469, %472 : vector<16x16xf32>
      %c47 = arith.constant 47 : index
      %474 = memref.load %arg2[%c47] : memref<98xf32, #tpu.memory_space<smem>>
      %c96 = arith.constant 96 : index
      %475 = memref.load %arg2[%c96] : memref<98xf32, #tpu.memory_space<smem>>
      %476 = vector.extract_strided_slice %411 {offsets = [6, 0], sizes = [16, 16], strides = [1, 1]} : vector<22x16xf32> to vector<16x16xf32>
      %477 = vector.broadcast %474 : f32 to vector<16x16xf32>
      %478 = arith.mulf %477, %476 : vector<16x16xf32>
      %479 = arith.addf %473, %478 : vector<16x16xf32>
      %480 = vector.extract_strided_slice %413 {offsets = [6, 0], sizes = [16, 16], strides = [1, 1]} : vector<22x16xf32> to vector<16x16xf32>
      %481 = vector.broadcast %475 : f32 to vector<16x16xf32>
      %482 = arith.mulf %481, %480 : vector<16x16xf32>
      %483 = arith.addf %479, %482 : vector<16x16xf32>
      %c0_70 = arith.constant 0 : index
      %c0_71 = arith.constant 0 : index
      %c6 = arith.constant 6 : index
      %484 = vector.load %arg8[%c0_70, %c0_71, %c6] : memref<2x22x22xf32, #tpu.memory_space<vmem>>, vector<1x22x16xf32>
      %485 = vector.shape_cast %484 : vector<1x22x16xf32> to vector<22x16xf32>
      %c1_72 = arith.constant 1 : index
      %c0_73 = arith.constant 0 : index
      %c6_74 = arith.constant 6 : index
      %486 = vector.load %arg8[%c1_72, %c0_73, %c6_74] : memref<2x22x22xf32, #tpu.memory_space<vmem>>, vector<1x22x16xf32>
      %487 = vector.shape_cast %486 : vector<1x22x16xf32> to vector<22x16xf32>
      %c6_75 = arith.constant 6 : index
      %488 = memref.load %arg2[%c6_75] : memref<98xf32, #tpu.memory_space<smem>>
      %c55 = arith.constant 55 : index
      %489 = memref.load %arg2[%c55] : memref<98xf32, #tpu.memory_space<smem>>
      %490 = vector.extract_strided_slice %485 {offsets = [0, 0], sizes = [16, 16], strides = [1, 1]} : vector<22x16xf32> to vector<16x16xf32>
      %491 = vector.broadcast %488 : f32 to vector<16x16xf32>
      %492 = arith.mulf %491, %490 : vector<16x16xf32>
      %493 = arith.addf %483, %492 : vector<16x16xf32>
      %494 = vector.extract_strided_slice %487 {offsets = [0, 0], sizes = [16, 16], strides = [1, 1]} : vector<22x16xf32> to vector<16x16xf32>
      %495 = vector.broadcast %489 : f32 to vector<16x16xf32>
      %496 = arith.mulf %495, %494 : vector<16x16xf32>
      %497 = arith.addf %493, %496 : vector<16x16xf32>
      %c13 = arith.constant 13 : index
      %498 = memref.load %arg2[%c13] : memref<98xf32, #tpu.memory_space<smem>>
      %c62 = arith.constant 62 : index
      %499 = memref.load %arg2[%c62] : memref<98xf32, #tpu.memory_space<smem>>
      %500 = vector.extract_strided_slice %485 {offsets = [1, 0], sizes = [16, 16], strides = [1, 1]} : vector<22x16xf32> to vector<16x16xf32>
      %501 = vector.broadcast %498 : f32 to vector<16x16xf32>
      %502 = arith.mulf %501, %500 : vector<16x16xf32>
      %503 = arith.addf %497, %502 : vector<16x16xf32>
      %504 = vector.extract_strided_slice %487 {offsets = [1, 0], sizes = [16, 16], strides = [1, 1]} : vector<22x16xf32> to vector<16x16xf32>
      %505 = vector.broadcast %499 : f32 to vector<16x16xf32>
      %506 = arith.mulf %505, %504 : vector<16x16xf32>
      %507 = arith.addf %503, %506 : vector<16x16xf32>
      %c20 = arith.constant 20 : index
      %508 = memref.load %arg2[%c20] : memref<98xf32, #tpu.memory_space<smem>>
      %c69 = arith.constant 69 : index
      %509 = memref.load %arg2[%c69] : memref<98xf32, #tpu.memory_space<smem>>
      %510 = vector.extract_strided_slice %485 {offsets = [2, 0], sizes = [16, 16], strides = [1, 1]} : vector<22x16xf32> to vector<16x16xf32>
      %511 = vector.broadcast %508 : f32 to vector<16x16xf32>
      %512 = arith.mulf %511, %510 : vector<16x16xf32>
      %513 = arith.addf %507, %512 : vector<16x16xf32>
      %514 = vector.extract_strided_slice %487 {offsets = [2, 0], sizes = [16, 16], strides = [1, 1]} : vector<22x16xf32> to vector<16x16xf32>
      %515 = vector.broadcast %509 : f32 to vector<16x16xf32>
      %516 = arith.mulf %515, %514 : vector<16x16xf32>
      %517 = arith.addf %513, %516 : vector<16x16xf32>
      %c27 = arith.constant 27 : index
      %518 = memref.load %arg2[%c27] : memref<98xf32, #tpu.memory_space<smem>>
      %c76 = arith.constant 76 : index
      %519 = memref.load %arg2[%c76] : memref<98xf32, #tpu.memory_space<smem>>
      %520 = vector.extract_strided_slice %485 {offsets = [3, 0], sizes = [16, 16], strides = [1, 1]} : vector<22x16xf32> to vector<16x16xf32>
      %521 = vector.broadcast %518 : f32 to vector<16x16xf32>
      %522 = arith.mulf %521, %520 : vector<16x16xf32>
      %523 = arith.addf %517, %522 : vector<16x16xf32>
      %524 = vector.extract_strided_slice %487 {offsets = [3, 0], sizes = [16, 16], strides = [1, 1]} : vector<22x16xf32> to vector<16x16xf32>
      %525 = vector.broadcast %519 : f32 to vector<16x16xf32>
      %526 = arith.mulf %525, %524 : vector<16x16xf32>
      %527 = arith.addf %523, %526 : vector<16x16xf32>
      %c34 = arith.constant 34 : index
      %528 = memref.load %arg2[%c34] : memref<98xf32, #tpu.memory_space<smem>>
      %c83 = arith.constant 83 : index
      %529 = memref.load %arg2[%c83] : memref<98xf32, #tpu.memory_space<smem>>
      %530 = vector.extract_strided_slice %485 {offsets = [4, 0], sizes = [16, 16], strides = [1, 1]} : vector<22x16xf32> to vector<16x16xf32>
      %531 = vector.broadcast %528 : f32 to vector<16x16xf32>
      %532 = arith.mulf %531, %530 : vector<16x16xf32>
      %533 = arith.addf %527, %532 : vector<16x16xf32>
      %534 = vector.extract_strided_slice %487 {offsets = [4, 0], sizes = [16, 16], strides = [1, 1]} : vector<22x16xf32> to vector<16x16xf32>
      %535 = vector.broadcast %529 : f32 to vector<16x16xf32>
      %536 = arith.mulf %535, %534 : vector<16x16xf32>
      %537 = arith.addf %533, %536 : vector<16x16xf32>
      %c41 = arith.constant 41 : index
      %538 = memref.load %arg2[%c41] : memref<98xf32, #tpu.memory_space<smem>>
      %c90 = arith.constant 90 : index
      %539 = memref.load %arg2[%c90] : memref<98xf32, #tpu.memory_space<smem>>
      %540 = vector.extract_strided_slice %485 {offsets = [5, 0], sizes = [16, 16], strides = [1, 1]} : vector<22x16xf32> to vector<16x16xf32>
      %541 = vector.broadcast %538 : f32 to vector<16x16xf32>
      %542 = arith.mulf %541, %540 : vector<16x16xf32>
      %543 = arith.addf %537, %542 : vector<16x16xf32>
      %544 = vector.extract_strided_slice %487 {offsets = [5, 0], sizes = [16, 16], strides = [1, 1]} : vector<22x16xf32> to vector<16x16xf32>
      %545 = vector.broadcast %539 : f32 to vector<16x16xf32>
      %546 = arith.mulf %545, %544 : vector<16x16xf32>
      %547 = arith.addf %543, %546 : vector<16x16xf32>
      %c48 = arith.constant 48 : index
      %548 = memref.load %arg2[%c48] : memref<98xf32, #tpu.memory_space<smem>>
      %c97 = arith.constant 97 : index
      %549 = memref.load %arg2[%c97] : memref<98xf32, #tpu.memory_space<smem>>
      %550 = vector.extract_strided_slice %485 {offsets = [6, 0], sizes = [16, 16], strides = [1, 1]} : vector<22x16xf32> to vector<16x16xf32>
      %551 = vector.broadcast %548 : f32 to vector<16x16xf32>
      %552 = arith.mulf %551, %550 : vector<16x16xf32>
      %553 = arith.addf %547, %552 : vector<16x16xf32>
      %554 = vector.extract_strided_slice %487 {offsets = [6, 0], sizes = [16, 16], strides = [1, 1]} : vector<22x16xf32> to vector<16x16xf32>
      %555 = vector.broadcast %549 : f32 to vector<16x16xf32>
      %556 = arith.mulf %555, %554 : vector<16x16xf32>
      %557 = arith.addf %553, %556 : vector<16x16xf32>
      %558 = arith.negf %557 : vector<16x16xf32>
      %559 = math.exp %558 : vector<16x16xf32>
      %cst_76 = arith.constant 1.000000e+00 : f32
      %560 = vector.broadcast %cst_76 : f32 to vector<16x16xf32>
      %561 = arith.addf %560, %559 : vector<16x16xf32>
      %562 = arith.divf %560, %561 : vector<16x16xf32>
      %c0_77 = arith.constant 0 : index
      %c0_78 = arith.constant 0 : index
      %c0_79 = arith.constant 0 : index
      %563 = vector.load %arg5[%c0_77, %c0_78, %c0_79] : memref<1x16x16xf32, #tpu.memory_space<vmem>>, vector<1x16x16xf32>
      %564 = vector.shape_cast %563 : vector<1x16x16xf32> to vector<16x16xf32>
      %565 = vector.shape_cast %562 : vector<16x16xf32> to vector<1x16x16xf32>
      tpu.vector_store %arg5[%c0_77, %c0_78, %c0_79], %565 {strides = array<i32>} : memref<1x16x16xf32, #tpu.memory_space<vmem>>, vector<1x16x16xf32>,
    } else {
    }
    return
  }
  func.func @transform_0(%arg0: i32, %arg1: i32) -> i32 {
    %c0_i32 = arith.constant 0 : i32
    %c0_i32_0 = arith.constant 0 : i32
    return %c0_i32 : i32
  }
  func.func @transform_1(%arg0: i32, %arg1: i32) -> i32 {
    %c0_i32 = arith.constant 0 : i32
    %c0_i32_0 = arith.constant 0 : i32
    return %c0_i32 : i32
  }
  func.func @transform_2(%arg0: i32, %arg1: i32) -> (i32, i32, i32, i32) {
    %c0_i32 = arith.constant 0 : i32
    %c0_i32_0 = arith.constant 0 : i32
    %c0_i32_1 = arith.constant 0 : i32
    return %arg0, %arg1, %c0_i32, %c0_i32_0 : i32, i32, i32, i32
  }
  func.func @transform_3(%arg0: i32, %arg1: i32) -> (i32, i32, i32) {
    %c0_i32 = arith.constant 0 : i32
    %c0_i32_0 = arith.constant 0 : i32
    %c0_i32_1 = arith.constant 0 : i32
    return %arg0, %c0_i32, %c0_i32_0 : i32, i32, i32
  }
}

</mosaic_0001>

<bundles_post_ra>
// kernel: tpu_custom_call.1
= control target key start
LH: loop header
LB: loop body
LE: loop exit
PB: predicated region body
PF: predicated region fallthrough
CT: control target
= control target key end

     0   :  { %s3972_s0 = inlined_call_operand.vmem [shape: f32[98], index: 0, kind: input, shape index: {}]   ;;  %s3973_s1 = inlined_call_operand.<no memory space> [shape: f32[1], index: 1, kind: input, shape index: {}]   ;;  %s3974_s2 = inlined_call_operand.hbm [shape: f32[2,4,16,16], index: 2, kind: input, shape index: {}]   ;;  %s3975_s3 = inlined_call_operand.hbm [shape: f32[2,16,16], index: 3, kind: output, shape index: {}]  }
   0x1   :  { %8 = sst [smem:[#allocation5]] %s3973_s1 }
   0x2   :  { %9 = vsyncpa [#allocation9], 0 }
   0x3   :  { %10 = vsyncpa [#allocation7], 0 }
   0x4   :  { %12 = vsyncpa [#allocation7 + $0x1], 0 }
   0x5   :  { %13 = vsyncpa [#allocation8], 0 }
   0x6   :  { %15 = vsyncpa [#allocation8 + $0x1], 0  ;;  %s2773_s14 = smov 0   ;;  %s2775_s15 = smov 0  }
   0x7   :  { %s2777_s16 = smov 0   ;;  %s2779_s17 = smov 0  }
   0x8   :  { %s2781_s18 = smov 0   ;;  %s2783_s19 = smov 0  }
   0x9 LB: > { %s2375_s1 = sadd.s32 4294967295, %s2735_s19   ;;  %s2376_s20 = sadd.s32 4294967294, %s2735_s19   ;;  %s2735_s19 = sphi %s2783_s19, %s21_s19   ;;  %s2731_s18 = sphi %s2781_s18, %s3993_s18   ;;  %s2727_s17 = sphi %s2779_s17, %s3992_s17   ;;  %s2723_s16 = sphi %s2777_s16, %s3991_s16   ;;  %s2719_s15 = sphi %s2775_s15, %s3990_s15   ;;  %s2715_s14 = sphi %s2773_s14, %s3989_s14  }
   0xa   : > { %s84_s21 = sadd.s32 1, %s2723_s16  ;;  %p91_p0 = scmp.ne.s32.totalorder %s2723_s16, %s2719_s15 }
   0xb   : > { %p92_p1 = scmp.eq.s32.totalorder %s2735_s19, 0  ;;  %p97_p2 = scmp.ne.s32.totalorder %s2719_s15, %s2715_s14 }
   0xc   : > { %p2811_p3 = scmp.eq.s32.totalorder %s2375_s1, 0  ;;  %p121_p4 = scmp.eq.s32.totalorder %s2375_s1, 1 }
   0xd   : > { %p2815_p5 = por %p92_p1, %p91_p0  ;;  %p127_p6 = scmp.eq.s32.totalorder %s2376_s20, 1 }
   0xe   : > { %p2821_p7 = por %p2811_p3, %p97_p2  ;;  %p2825_p8 = por %p121_p4, %p91_p0 }
   0xf   : > { %p2829_p9 = por %p127_p6, %p97_p2  ;;  %p2377_p10 = scmp.ge.s32.totalorder %s2735_s19, 1 }
  0x10   : > { %p134_p11 = scmp.lt.s32.totalorder %s2735_s19, 3  ;;  %s146_s29 = sshll.u32 %s3972_s0, 4  ;;  %s147_s29 = int_to_ptr.vmem [resolvable:$true] %s146_s29 }
  0x11   : > { %p2379_p13 = scmp.ge.s32.totalorder %s2735_s19, 2  ;;  %p2520_p0 = scmp.lt.s32.totalorder %s2735_s19, 2 }
  0x12   : > { %p2838_p12 = pnand %p2377_p10, %p134_p11  ;;  %s33_s5 = sadd.s32 1, %s2731_s18 }
  0x13   : > { %p2848_p2 = pnand %p2520_p0, %p2815_p5  ;;  %p35_p6 = scmp.ge.s32.totalorder %s33_s5, 2 }
  0x14   : > { %p2507_p1 = pneg %p2838_p12  ;;  %s160_s6 = sand.u32 1, %s2723_s16  }
  0x15   : > { %s2737_s7 = smov [#allocation6]   ;;  %s3995_s5 = smov (%p35_p6, %s33_s5), 0 }
  0x16   : > { %p2508_p4 = pnand %p2507_p1, %p2811_p3  ;;  %s2380_s8 = sshll.u32 %s160_s6, 6 }
  0x17   : > { %s79_s9 = ssub.s32 %s2731_s18, %s3995_s5  ;;  %s2497_s10 = sshll.u32 %s2731_s18, 6 }
  0x18   : > { %2510 = dma.vmem_to_smem (!%p2508_p4), %s147_s29, 16, %s2737_s7, [#allocation9]  }
  0x19   : > { %p82_p10 = scmp.eq.s32.totalorder %s79_s9, 0  ;;  %s172_s13 = scalar_lea.hbm %s3974_s2, %s2497_s10 }
  0x1a   : > { %s164_s1 = scalar_lea.vmem [#allocation10], %s2380_s8  ;;  %s173_s27 = sshll.u32 %s172_s13, 4  ;;  %s174_s27 = int_to_ptr.hbm [resolvable:$true] %s173_s27 }
  0x1b   : > { %s175_s20 = sshll.u32 %s164_s1, 4  ;;  %s161_s28 = scalar_lea.sflag [#allocation7], %s160_s6  ;;  %s176_s20 = int_to_ptr.vmem [resolvable:$true] %s175_s20 }
  0x1c   : > { %s2867_s23 = scalar_select %p82_p10, %s2723_s16, %s84_s21  }
  0x1d   : > { %s2738_s29 = smov 128   ;;  %s2739_s7 = smov 8  }
  0x1e   : > { %2514 = dma.hbm_to_vmem [thread:$0]  (!%p2848_p2), %s174_s27, 1024, %s176_s20, %s161_s28, %s2738_s29, %s2738_s29, %s2739_s7  }
  0x1f   : > { %187 = sbr.rel (%p2838_p12) target bundleno = 780 (0x30c), region = 32 }
  0x24   : > { %2702 = dma.done.wait (%p2811_p3), [#allocation9], 16  }
  0x25   : > { %2704 = vsyncadd (%p2811_p3), [#allocation9], 4294967280  ;;  %s2878_s21 = sand.u32 1, %s2719_s15  }
  0x26   : > { %s2385_s6 = sshll.u32 %s2878_s21, 6  ;;  %s195_s8 = scalar_lea.sflag [#allocation7], %s2878_s21 }
  0x27   : > { %s198_s9 = scalar_lea.vmem [#allocation10], %s2385_s6 }
  0x28   : > { %2706 = dma.done.wait (%p2821_p7), %s195_s8, 1024  }
  0x29   : > { %2708 = vsyncadd (%p2821_p7), %s195_s8, 4294966272 }
  0x2a   : > { %204 = sfence }
  0x2b   : > { %v224_v0 = vld [vmem:[%s198_s9] sm:$0xff]  ;;  %v2387_v1 = vld [vmem:[%s198_s9 + $0x10] sm:$0xff]  ;;  %vm276_vm0 = vcmask 179200   ;;  %v225_v5 = vld [vmem:[%s198_s9 + $0x8] sm:$0xff]  ;;  %v2740_v11 = vmov 0.0   ;;  %vm251_vm1 = vcmask 130048  }
  0x2c   : > { %v2389_v2 = vld [vmem:[%s198_s9 + $0x20] sm:$0xff]  ;;  %v229_v3 = vmax.f32 %v224_v0, %v2387_v1  ;;  %v231_v4 = vadd.f32 %v2387_v1, %v224_v0  ;;  %v2388_v6 = vld [vmem:[%s198_s9 + $0x18] sm:$0xff]  ;;  %v2391_v7 = vld [vmem:[%s198_s9 + $0x30] sm:$0xff]  ;;  %277 = vst.msk [vmem:[#allocation4] sm:$0xff] %vm276_vm0, %v2740_v11  ;;  %s2741_s22 = smov 3   ;;  %vm279_vm2 = vcmask 177152  }
  0x2d   : > { %v230_v8 = vmax.f32 %v225_v5, %v2388_v6  ;;  %v232_v9 = vadd.f32 %v2388_v6, %v225_v5  ;;  %v2390_v10 = vld [vmem:[%s198_s9 + $0x28] sm:$0xff]  ;;  %v2392_v14 = vld [vmem:[%s198_s9 + $0x38] sm:$0xff]  ;;  %278 = vst.msk [vmem:[#allocation4 + $0x8] sm:$0xff] %vm276_vm0, %v2740_v11  ;;  %vm294_vm3 = vcmask 154648   ;;  %s2406_s24 = sld [smem:[#allocation6 + $0x1]]  ;;  %s2742_s4 = smov 127  }
  0x2e   : > { %v236_v12 = vmax.f32 %v229_v3, %v2389_v2  ;;  %v238_v13 = vadd.f32 %v2389_v2, %v231_v4  ;;  %281 = vst.msk [vmem:[#allocation4 + $0x18] sm:$0xff] %vm276_vm0, %v2740_v11  ;;  %s2420_s30 = sld [smem:[#allocation6 + $0x2]]  ;;  %s2743_s13 = smov 126   ;;  %vm341_vm4 = vcmask 1046528   ;;  %vm376_vm5 = vcmask 1045504  }
  0x2f   : > { %v237_v15 = vmax.f32 %v230_v8, %v2390_v10  ;;  %v239_v16 = vadd.f32 %v2390_v10, %v232_v9  ;;  %282 = vst.msk [vmem:[#allocation4 + $0x20] sm:$0xff] %vm276_vm0, %v2740_v11  ;;  %s2407_s10 = sld [smem:[#allocation6 + $0x32]]  ;;  %vm411_vm6 = vcmask 1044480   ;;  %vm446_vm7 = vcmask 1043456  }
  0x30   : > { %v243_v17 = vmax.f32 %v236_v12, %v2391_v7  ;;  %v245_v18 = vadd.f32 %v2391_v7, %v238_v13  ;;  %280 = vst.msk [vmem:[#allocation4 + $0x10] sm:$0x3f] %vm279_vm2, %v2740_v11  ;;  %s2408_s11 = sld [smem:[#allocation6 + $0x8]]  ;;  %vm481_vm8 = vcmask 1042432   ;;  %vm516_vm9 = vcmask 1041408  }
  0x31   : > { %v244_v19 = vmax.f32 %v237_v15, %v2392_v14  ;;  %v246_v20 = vadd.f32 %v2392_v14, %v239_v16  ;;  %283 = vst.msk [vmem:[#allocation4 + $0x28] sm:$0x3f] %vm279_vm2, %v2740_v11  ;;  %s2421_s12 = sld [smem:[#allocation6 + $0x33]] }
  0x32   : > { %252 = vst.msk [vmem:[#allocation2] sm:$0xff] %vm251_vm1, %v243_v17  ;;  %s2410_s1 = sld [smem:[#allocation6 + $0xf]] }
  0x33   : > { %254 = vst.msk [vmem:[#allocation3] sm:$0xff] %vm251_vm1, %v245_v18  ;;  %v544_v29 = vstv %s2406_s24  ;;  %s2412_s20 = sld [smem:[#allocation6 + $0x16]] }
  0x34   : > { %253 = vst.msk [vmem:[#allocation2 + $0x8] sm:$0xff] %vm251_vm1, %v244_v19  ;;  %v824_v35 = vstv %s2420_s30  ;;  %s2414_s27 = sld [smem:[#allocation6 + $0x1d]] }
  0x35   : > { %255 = vst.msk [vmem:[#allocation3 + $0x8] sm:$0xff] %vm251_vm1, %v246_v20  ;;  %v557_v39 = vstv %s2407_s10  ;;  %s2416_s28 = sld [smem:[#allocation6 + $0x24]] }
  0x36   : > { %v572_v46 = vstv %s2408_s11  ;;  %s2418_s29 = sld [smem:[#allocation6 + $0x2b]] }
  0x37   : > { %v837_v45 = vstv %s2421_s12  ;;  %s2422_s7 = sld [smem:[#allocation6 + $0x9]] }
  0x38   : > { %v614_v50 = vstv %s2410_s1  ;;  %s2426_s6 = sld [smem:[#allocation6 + $0x17]] }
  0x39   : > { %v284_v21 = vld [vmem:[#allocation2] sm:$0xff]  ;;  %v656_v61 = vstv %s2412_s20  ;;  %s2424_s8 = sld [smem:[#allocation6 + $0x10]] }
  0x3a   : > { %288 = vrot.lane.b32.xlu0 %v284_v21, %s2741_s22  ;;  %v297_v22 = vld [vmem:[#allocation3] sm:$0xff]  ;;  %v698_v3 = vstv %s2414_s27  ;;  %s2428_s9 = sld [smem:[#allocation6 + $0x1e]] }
  0x3b   : > { %v299_v23 = vmul.f32 0.25, %v297_v22  ;;  %v285_v25 = vld [vmem:[#allocation2 + $0x8] sm:$0xff]  ;;  %v740_v11 = vstv %s2416_s28  ;;  %s2430_s24 = sld [smem:[#allocation6 + $0x25]] }
  0x3c   : > { %v298_v24 = vld [vmem:[#allocation3 + $0x8] sm:$0xff]  ;;  %s2413_s30 = sld [smem:[#allocation6 + $0x47]] }
  0x3d   : > { %303 = vrot.lane.b32.xlu1 %v299_v23, %s2741_s22  ;;  %v300_v26 = vmul.f32 0.25, %v298_v24  ;;  %v782_v24 = vstv %s2418_s29  ;;  %s2432_s10 = sld [smem:[#allocation6 + $0x2c]] }
  0x3e   : > { %s2409_s11 = sld [smem:[#allocation6 + $0x39]] }
  0x3f   : > { %s2417_s12 = sld [smem:[#allocation6 + $0x55]] }
  0x40   : > { %s2419_s1 = sld [smem:[#allocation6 + $0x5c]] }
  0x41   : > { %s2415_s20 = sld [smem:[#allocation6 + $0x4e]] }
  0x42   : > { %290 = vrot.lane.b32.xlu0 %v285_v25, %s2741_s22  ;;  %s2423_s27 = sld [smem:[#allocation6 + $0x3a]] }
  0x43   : > { %s2425_s28 = sld [smem:[#allocation6 + $0x41]] }
  0x44   : > { %s2429_s29 = sld [smem:[#allocation6 + $0x4f]] }
  0x45   : > { %305 = vrot.lane.b32.xlu1 %v300_v26, %s2741_s22  ;;  %s2411_s22 = sld [smem:[#allocation6 + $0x40]] }
  0xac   : > { %v289_v27 = vpop.permute.xlu0 %288 }
  0xad   : > { %295 = vst.msk [vmem:[#allocation4 + $0x3] sm:$0xff] %vm294_vm3, %v289_v27 }
  0xaf   : > { %v304_v28 = vpop.permute.xlu1 %303 }
  0xb0   : > { %310 = vst.msk [vmem:[#allocation4 + $0x1b] sm:$0xff] %vm294_vm3, %v304_v28 }
  0xb4   : > { %v2896_v30 = vld [vmem:[#allocation4] sm:$0xff]  ;;  %v291_v31 = vpop.permute.xlu0 %290 }
  0xb5   : > { %296 = vst.msk [vmem:[#allocation4 + $0xb] sm:$0xff] %vm294_vm3, %v291_v31  ;;  %v545_v32 = vmul.f32 %v544_v29, %v2896_v30  ;;  %v825_v44 = vmul.f32 %v824_v35, %v2896_v30  ;;  %v615_v59 = vmul.f32 %v614_v50, %v2896_v30  ;;  %v573_v60 = vmul.f32 %v572_v46, %v2896_v30 }
  0xb6   : > { %v657_v0 = vmul.f32 %v656_v61, %v2896_v30  ;;  %v741_v22 = vmul.f32 %v740_v11, %v2896_v30  ;;  %v699_v23 = vmul.f32 %v698_v3, %v2896_v30  ;;  %v783_v27 = vmul.f32 %v782_v24, %v2896_v30 }
  0xb7   : > { %v306_v33 = vpop.permute.xlu1 %305  ;;  %549 = vrot.lane.b32.xlu2 %v545_v32, %s2742_s4  ;;  %v2914_v42 = vld [vmem:[#allocation4 + $0x18] sm:$0xff]  ;;  %v621_v1 = vrot.slane %v615_v59, 2  ;;  %v579_v2 = vrot.slane %v573_v60, 1  ;;  %v852_v32 = vstv %s2422_s7  ;;  %s2427_s7 = sld [smem:[#allocation6 + $0x48]] }
  0xb8   : > { %311 = vst.msk [vmem:[#allocation4 + $0x23] sm:$0xff] %vm294_vm3, %v306_v33  ;;  %v558_v43 = vmul.f32 %v557_v39, %v2914_v42  ;;  %v838_v49 = vmul.f32 %v837_v45, %v2914_v42  ;;  %v663_v10 = vrot.slane %v657_v0, 3  ;;  %v747_v28 = vrot.slane %v741_v22, 5 }
  0xbc   : > { %v2902_v34 = vld [vmem:[#allocation4 + $0x8] sm:$0xff]  ;;  %v2912_v41 = vld [vmem:[#allocation4 + $0x10] sm:$0x3f] }
  0xbd   : > { %v546_v36 = vmul.f32 %v544_v29, %v2902_v34  ;;  %v826_v37 = vmul.f32 %v824_v35, %v2902_v34  ;;  %v574_v47 = vmul.f32 %v572_v46, %v2902_v34  ;;  %v575_v48 = vmul.f32 %v572_v46, %v2912_v41 }
  0xbe   : > { %v616_v51 = vmul.f32 %v614_v50, %v2902_v34  ;;  %v617_v52 = vmul.f32 %v614_v50, %v2912_v41  ;;  %v658_v63 = vmul.f32 %v656_v61, %v2902_v34  ;;  %v700_v5 = vmul.f32 %v698_v3, %v2902_v34 }
  0xbf   : > { %v2906_v38 = vld [vmem:[#allocation4 + $0x20] sm:$0xff]  ;;  %831 = vrot.lane.b32.xlu0 %v826_v37, %s2743_s13  ;;  %551 = vrot.lane.b32.xlu2 %v546_v36, %s2742_s4  ;;  %v580_v53 = vrot.slane %v574_v47, 1  ;;  %v582_v54 = vrot.slane %v575_v48, 1  ;;  %v701_v8 = vmul.f32 %v698_v3, %v2912_v41  ;;  %v659_v9 = vmul.f32 %v656_v61, %v2912_v41 }
  0xc0   : > { %v559_v40 = vmul.f32 %v557_v39, %v2906_v38  ;;  %v839_v55 = vmul.f32 %v837_v45, %v2906_v38  ;;  %v622_v56 = vrot.slane %v616_v51, 2  ;;  %v624_v57 = vrot.slane %v617_v52, 2 }
  0xc1   : > { %v583_v58 = vsel %vm341_vm4, %v580_v53, %v582_v54  ;;  %v664_v4 = vrot.slane %v658_v63, 3  ;;  %v581_v7 = vsel %vm341_vm4, %v579_v2, %v580_v53  ;;  %v742_v13 = vmul.f32 %v740_v11, %v2902_v34 }
  0xc2   : > { %564 = vrot.lane.b32.xlu1 %v559_v40, %s2742_s4  ;;  %v625_v62 = vsel %vm376_vm5, %v622_v56, %v624_v57  ;;  %v623_v6 = vsel %vm376_vm5, %v621_v1, %v622_v56  ;;  %v743_v14 = vmul.f32 %v740_v11, %v2912_v41  ;;  %v706_v15 = vrot.slane %v700_v5, 4 }
  0xc3   : > { %v665_v12 = vsel %vm411_vm6, %v663_v10, %v664_v4  ;;  %v708_v16 = vrot.slane %v701_v8, 4  ;;  %v666_v17 = vrot.slane %v659_v9, 3  ;;  %v748_v18 = vrot.slane %v742_v13, 5  ;;  %v2988_v9 = vld [vmem:[#allocation4 + $0x28] sm:$0x3f] }
  0xc4   : > { %v750_v19 = vrot.slane %v743_v14, 5  ;;  %v784_v26 = vmul.f32 %v782_v24, %v2902_v34  ;;  %v705_v29 = vrot.slane %v699_v23, 4  ;;  %v854_v36 = vmul.f32 %v852_v32, %v2902_v34 }
  0xc5   : > { %v709_v20 = vsel %vm446_vm7, %v706_v15, %v708_v16  ;;  %v667_v21 = vsel %vm411_vm6, %v664_v4, %v666_v17  ;;  %v749_v33 = vsel %vm481_vm8, %v747_v28, %v748_v18  ;;  %v785_v37 = vmul.f32 %v782_v24, %v2912_v41 }
  0xc6   : > { %v751_v25 = vsel %vm481_vm8, %v748_v18, %v750_v19  ;;  %v790_v31 = vrot.slane %v784_v26, 6  ;;  %v707_v35 = vsel %vm446_vm7, %v705_v29, %v706_v15  ;;  %v789_v39 = vrot.slane %v783_v27, 6 }
  0xc7   : > { %562 = vrot.lane.b32.xlu0 %v558_v43, %s2742_s4  ;;  %829 = vrot.lane.b32.xlu2 %v825_v44, %s2743_s13  ;;  %v853_v40 = vmul.f32 %v852_v32, %v2896_v30  ;;  %v855_v44 = vmul.f32 %v852_v32, %v2912_v41  ;;  %v860_v45 = vrot.slane %v854_v36, 1  ;;  %v792_v46 = vrot.slane %v785_v37, 6 }
  0xc8   : > { %v791_v43 = vsel %vm516_vm9, %v789_v39, %v790_v31  ;;  %v936_v48 = vstv %s2426_s6  ;;  %v894_v52 = vstv %s2424_s8  ;;  %v978_v63 = vstv %s2428_s9  ;;  %s3095_s6 = sld [smem:[#allocation6]] }
  0xc9   : > { %v859_v47 = vrot.slane %v853_v40, 1  ;;  %v938_v50 = vmul.f32 %v936_v48, %v2902_v34  ;;  %v939_v51 = vmul.f32 %v936_v48, %v2912_v41  ;;  %v793_v54 = vsel %vm516_vm9, %v790_v31, %v792_v46  ;;  %s2394_s8 = sld [smem:[#allocation6 + $0x7]] }
  0xca   : > { %842 = vrot.lane.b32.xlu1 %v838_v49, %s2743_s13  ;;  %v862_v49 = vrot.slane %v855_v44, 1  ;;  %v897_v56 = vmul.f32 %v894_v52, %v2912_v41  ;;  %v980_v2 = vmul.f32 %v978_v63, %v2902_v34  ;;  %v937_v4 = vmul.f32 %v936_v48, %v2896_v30  ;;  %s3098_s9 = sld [smem:[#allocation6 + $0x38]] }
  0xcb   : > { %v861_v53 = vsel %vm341_vm4, %v859_v47, %v860_v45  ;;  %v946_v59 = vrot.slane %v939_v51, 3  ;;  %v979_v5 = vmul.f32 %v978_v63, %v2896_v30  ;;  %v1020_v16 = vstv %s2430_s24  ;;  %s3102_s24 = sld [smem:[#allocation5]] }
  0xcc   : > { %v863_v57 = vsel %vm341_vm4, %v860_v45, %v862_v49  ;;  %v904_v61 = vrot.slane %v897_v56, 2  ;;  %v986_v8 = vrot.slane %v980_v2, 4  ;;  %v943_v10 = vrot.slane %v937_v4, 3 }
  0xcd   : > { %v985_v11 = vrot.slane %v979_v5, 4  ;;  %v1022_v19 = vmul.f32 %v1020_v16, %v2902_v34  ;;  %v1021_v26 = vmul.f32 %v1020_v16, %v2896_v30  ;;  %v676_v27 = vstv %s2413_s30  ;;  %s3114_s30 = sld [smem:[#allocation6 + $0x31]] }
  0xce   : > { %v678_v28 = vmul.f32 %v676_v27, %v2906_v38  ;;  %v3009_v29 = vstv %s2432_s10  ;;  %v677_v36 = vmul.f32 %v676_v27, %v2914_v42  ;;  %v592_v39 = vstv %s2409_s11  ;;  %s3141_s10 = sld [smem:[#allocation6 + $0x3f]] }
  0xcf   : > { %586 = vrot.lane.b32.xlu0 %v583_v58, %s2742_s4  ;;  %844 = vrot.lane.b32.xlu2 %v839_v55, %s2743_s13  ;;  %v896_v55 = vmul.f32 %v894_v52, %v2902_v34  ;;  %v944_v58 = vrot.slane %v938_v50, 3  ;;  %v987_v17 = vsel %vm446_vm7, %v985_v11, %v986_v8  ;;  %v1028_v24 = vrot.slane %v1022_v19, 5  ;;  %s3162_s11 = sld [smem:[#allocation6 + $0x5d]] }
  0xd0   : > { %v1063_v37 = vmul.f32 %v3009_v29, %v2896_v30  ;;  %v594_v44 = vmul.f32 %v592_v39, %v2906_v38  ;;  %v683_v46 = vrot.slane %v677_v36, 3  ;;  %v593_v47 = vmul.f32 %v592_v39, %v2914_v42 }
  0xd1   : > { %v902_v60 = vrot.slane %v896_v55, 2  ;;  %v947_v0 = vsel %vm411_vm6, %v944_v58, %v946_v59  ;;  %v945_v13 = vsel %vm411_vm6, %v943_v10, %v944_v58  ;;  %v3030_v51 = vstv %s2417_s12  ;;  %s3172_s12 = sld [smem:[#allocation6 + $0x15]] }
  0xd2   : > { %628 = vrot.lane.b32.xlu1 %v625_v62, %s2742_s4  ;;  %v895_v62 = vmul.f32 %v894_v52, %v2896_v30  ;;  %v1069_v48 = vrot.slane %v1063_v37, 6  ;;  %v600_v50 = vrot.slane %v594_v44, 1  ;;  %v595_v55 = vmul.f32 %v592_v39, %v2988_v9 }
  0xd3   : > { %v905_v1 = vsel %vm376_vm5, %v902_v60, %v904_v61  ;;  %v599_v56 = vrot.slane %v593_v47, 1  ;;  %v679_v59 = vmul.f32 %v676_v27, %v2988_v9 }
  0xd4   : > { %v901_v3 = vrot.slane %v895_v62, 2  ;;  %v602_v62 = vrot.slane %v595_v55, 1 }
  0xd5   : > { %v601_v58 = vsel %vm341_vm4, %v599_v56, %v600_v50 }
  0xd6   : > { %v603_v2 = vsel %vm341_vm4, %v600_v50, %v602_v62 }
  0xd7   : > { %626 = vrot.lane.b32.xlu0 %v623_v6, %s2742_s4  ;;  %584 = vrot.lane.b32.xlu2 %v581_v7, %s2742_s4  ;;  %v903_v6 = vsel %vm376_vm5, %v901_v3, %v902_v60  ;;  %v981_v7 = vmul.f32 %v978_v63, %v2912_v41  ;;  %v686_v63 = vrot.slane %v679_v59, 3  ;;  %v956_v59 = vstv %s2427_s7  ;;  %s3257_s7 = sld [smem:[#allocation6 + $0x54]] }
  0xd8   : > { %v958_v62 = vmul.f32 %v956_v59, %v2906_v38 }
  0xd9   : > { %v988_v14 = vrot.slane %v981_v7, 4 }
  0xda   : > { %668 = vrot.lane.b32.xlu1 %v665_v12, %s2742_s4  ;;  %v2990_v12 = vstv %s2411_s22  ;;  %s2431_s22 = sld [smem:[#allocation6 + $0x56]] }
  0xdb   : > { %v2995_v15 = vmul.f32 %v2990_v12, %v2906_v38  ;;  %v637_v18 = vmul.f32 %v2990_v12, %v2988_v9  ;;  %v635_v5 = vmul.f32 %v2990_v12, %v2914_v42 }
  0xdd   : > { %v642_v22 = vrot.slane %v2995_v15, 2  ;;  %v644_v23 = vrot.slane %v637_v18, 2 }
  0xdf   : > { %712 = vrot.lane.b32.xlu0 %v709_v20, %s2742_s4  ;;  %670 = vrot.lane.b32.xlu2 %v667_v21, %s2742_s4  ;;  %v1023_v20 = vmul.f32 %v1020_v16, %v2912_v41  ;;  %v989_v21 = vsel %vm446_vm7, %v986_v8, %v988_v14  ;;  %v645_v31 = vsel %vm376_vm5, %v642_v22, %v644_v23  ;;  %v641_v16 = vrot.slane %v635_v5, 2 }
  0xe2   : > { %754 = vrot.lane.b32.xlu1 %v751_v25, %s2742_s4  ;;  %v1030_v25 = vrot.slane %v1023_v20, 5  ;;  %v643_v20 = vsel %vm376_vm5, %v641_v16, %v642_v22 }
  0xe4   : > { %v1031_v32 = vsel %vm481_vm8, %v1028_v24, %v1030_v25 }
  0xe7   : > { %752 = vrot.lane.b32.xlu0 %v749_v33, %s2742_s4  ;;  %710 = vrot.lane.b32.xlu2 %v707_v35, %s2742_s4  ;;  %v3017_v33 = vmul.f32 %v3009_v29, %v2902_v34  ;;  %v1027_v35 = vrot.slane %v1021_v26, 5 }
  0xe9   : > { %v1029_v40 = vsel %vm481_vm8, %v1027_v35, %v1028_v24  ;;  %v1070_v45 = vrot.slane %v3017_v33, 6 }
  0xea   : > { %794 = vrot.lane.b32.xlu1 %v791_v43, %s2742_s4  ;;  %v684_v43 = vrot.slane %v678_v28, 3 }
  0xeb   : > { %v1071_v52 = vsel %vm516_vm9, %v1069_v48, %v1070_v45 }
  0xec   : > { %v685_v49 = vsel %vm411_vm6, %v683_v46, %v684_v43  ;;  %v687_v7 = vsel %vm411_vm6, %v684_v43, %v686_v63 }
  0xef   : > { %864 = vrot.lane.b32.xlu0 %v861_v53, %s2743_s13  ;;  %796 = vrot.lane.b32.xlu2 %v793_v54, %s2742_s4  ;;  %v3037_v53 = vmul.f32 %v3030_v51, %v2906_v38  ;;  %v763_v54 = vmul.f32 %v3030_v51, %v2988_v9 }
  0xf1   : > { %v768_v60 = vrot.slane %v3037_v53, 5  ;;  %v770_v61 = vrot.slane %v763_v54, 5 }
  0xf2   : > { %866 = vrot.lane.b32.xlu1 %v863_v57, %s2743_s13 }
  0xf7   : > { %950 = vrot.lane.b32.xlu0 %v947_v0, %s2743_s13  ;;  %908 = vrot.lane.b32.xlu2 %v905_v1, %s2743_s13  ;;  %v802_v0 = vstv %s2419_s1  ;;  %v771_v1 = vsel %vm481_vm8, %v768_v60, %v770_v61  ;;  %s3203_s1 = sld [smem:[#allocation6 + $0x46]] }
  0xf8   : > { %v804_v3 = vmul.f32 %v802_v0, %v2906_v38  ;;  %v803_v4 = vmul.f32 %v802_v0, %v2914_v42  ;;  %v805_v27 = vmul.f32 %v802_v0, %v2988_v9 }
  0xfa   : > { %906 = vrot.lane.b32.xlu1 %v903_v6, %s2743_s13  ;;  %v718_v6 = vstv %s2415_s20  ;;  %v810_v11 = vrot.slane %v804_v3, 6  ;;  %v809_v14 = vrot.slane %v803_v4, 6  ;;  %v957_v3 = vmul.f32 %v956_v59, %v2914_v42  ;;  %s3225_s20 = sld [smem:[#allocation6 + $0x3]] }
  0xfb   : > { %v720_v10 = vmul.f32 %v718_v6, %v2906_v38  ;;  %v721_v23 = vmul.f32 %v718_v6, %v2988_v9 }
  0xfc   : > { %v811_v12 = vsel %vm516_vm9, %v809_v14, %v810_v11  ;;  %v1040_v14 = vstv %s2431_s22  ;;  %s3307_s22 = sld [smem:[#allocation6 + $0x3b]] }
  0xfd   : > { %v726_v18 = vrot.slane %v720_v10, 4  ;;  %v728_v28 = vrot.slane %v721_v23, 4  ;;  %v3138_v10 = vstv %s3098_s9  ;;  %v963_v23 = vrot.slane %v957_v3, 3  ;;  %s3286_s9 = sld [smem:[#allocation6 + $0x34]] }
  0xff   : > { %990 = vrot.lane.b32.xlu0 %v987_v17, %s2743_s13  ;;  %948 = vrot.lane.b32.xlu2 %v945_v13, %s2743_s13  ;;  %v719_v13 = vmul.f32 %v718_v6, %v2914_v42  ;;  %v872_v17 = vstv %s2423_s27  ;;  %v729_v36 = vsel %vm446_vm7, %v726_v18, %v728_v28  ;;  %v354_v28 = vmul.f32 %v3138_v10, %v2988_v9  ;;  %s3234_s27 = sld [smem:[#allocation6 + $0x1c]] }
 0x100   : > { %v3067_v19 = vmul.f32 %v872_v17, %v2906_v38 }
 0x101   : > { %v725_v24 = vrot.slane %v719_v13, 4  ;;  %v964_v13 = vrot.slane %v958_v62, 3 }
 0x102   : > { %992 = vrot.lane.b32.xlu1 %v989_v21, %s2743_s13  ;;  %v875_v21 = vmul.f32 %v872_v17, %v2988_v9  ;;  %v880_v15 = vrot.slane %v3067_v19, 1  ;;  %v959_v19 = vmul.f32 %v956_v59, %v2988_v9  ;;  %v1065_v59 = vmul.f32 %v3009_v29, %v2912_v41 }
 0x103   : > { %v727_v25 = vsel %vm446_vm7, %v725_v24, %v726_v18  ;;  %v1042_v18 = vmul.f32 %v1040_v14, %v2906_v38 }
 0x104   : > { %v882_v22 = vrot.slane %v875_v21, 1  ;;  %v3153_v21 = vmul.f32 %v3138_v10, %v2906_v38 }
 0x106   : > { %v883_v35 = vsel %vm341_vm4, %v880_v15, %v882_v22 }
 0x107   : > { %648 = vrot.lane.b32.xlu0 %v645_v31, %s2742_s4  ;;  %1034 = vrot.lane.b32.xlu2 %v1031_v32, %s2743_s13  ;;  %v812_v31 = vrot.slane %v805_v27, 6  ;;  %v914_v32 = vstv %s2425_s28  ;;  %s3239_s28 = sld [smem:[#allocation6 + $0x4d]] }
 0x108   : > { %v916_v37 = vmul.f32 %v914_v32, %v2906_v38  ;;  %v915_v39 = vmul.f32 %v914_v32, %v2914_v42  ;;  %v917_v46 = vmul.f32 %v914_v32, %v2988_v9  ;;  %v965_v32 = vsel %vm411_vm6, %v963_v23, %v964_v13 }
 0x109   : > { %v813_v43 = vsel %vm516_vm9, %v810_v11, %v812_v31 }
 0x10a   : > { %1032 = vrot.lane.b32.xlu1 %v1029_v40, %s2743_s13  ;;  %v761_v40 = vmul.f32 %v3030_v51, %v2914_v42  ;;  %v922_v47 = vrot.slane %v916_v37, 2  ;;  %v921_v48 = vrot.slane %v915_v39, 2  ;;  %v924_v50 = vrot.slane %v917_v46, 2 }
 0x10b   : > { %v1048_v37 = vrot.slane %v1042_v18, 5  ;;  %v966_v39 = vrot.slane %v959_v19, 3 }
 0x10c   : > { %v923_v51 = vsel %vm376_vm5, %v921_v48, %v922_v47  ;;  %v359_v48 = vrot.slane %v3153_v21, 1 }
 0x10f   : > { %688 = vrot.lane.b32.xlu0 %v685_v49, %s2742_s4  ;;  %1074 = vrot.lane.b32.xlu2 %v1071_v52, %s2743_s13  ;;  %v767_v49 = vrot.slane %v761_v40, 5  ;;  %v3100_v52 = vstv %s2429_s29  ;;  %s3244_s29 = sld [smem:[#allocation6 + $0x23]] }
 0x110   : > { %v3110_v55 = vmul.f32 %v3100_v52, %v2906_v38  ;;  %v1001_v56 = vmul.f32 %v3100_v52, %v2988_v9 }
 0x111   : > { %v3044_v57 = vpop.permute.xlu2 %549  ;;  %v769_v54 = vsel %vm481_vm8, %v767_v49, %v768_v60  ;;  %v925_v60 = vsel %vm376_vm5, %v922_v47, %v924_v50  ;;  %v361_v49 = vrot.slane %v354_v28, 1 }
 0x112   : > { %604 = vrot.lane.b32.xlu1 %v601_v58, %s2742_s4  ;;  %v873_v58 = vmul.f32 %v872_v17, %v2914_v42  ;;  %v1006_v63 = vrot.slane %v3110_v55, 4  ;;  %v1008_v0 = vrot.slane %v1001_v56, 4 }
 0x114   : > { %v1009_v16 = vsel %vm446_vm7, %v1006_v63, %v1008_v0 }
 0x117   : > { %774 = vrot.lane.b32.xlu0 %v771_v1, %s2742_s4  ;;  %606 = vrot.lane.b32.xlu2 %v603_v2, %s2742_s4  ;;  %v322_v1 = vstv %s3095_s6  ;;  %v334_v2 = vstv %s2394_s8  ;;  %s3267_s6 = sld [smem:[#allocation6 + $0xa]] }
 0x118   : > { %v3132_v4 = vmul.f32 %v334_v2, %v2902_v34  ;;  %v324_v5 = vmul.f32 %v322_v1, %v2902_v34  ;;  %v337_v11 = vmul.f32 %v334_v2, %v2912_v41  ;;  %v323_v29 = vmul.f32 %v322_v1, %v2896_v30  ;;  %s3272_s8 = sld [smem:[#allocation6 + $0x2a]] }
 0x119   : > { %v3061_v8 = vpop.permute.xlu2 %551  ;;  %v3222_v1 = vstv %s3172_s12  ;;  %s3488_s12 = sld [smem:[#allocation6 + $0x1f]] }
 0x11a   : > { %690 = vrot.lane.b32.xlu1 %v687_v7, %s2742_s4  ;;  %v879_v7 = vrot.slane %v873_v58, 1  ;;  %v343_v24 = vrot.slane %v3132_v4, 1  ;;  %v345_v22 = vrot.slane %v337_v11, 1  ;;  %v967_v58 = vsel %vm411_vm6, %v964_v13, %v966_v39 }
 0x11b   : > { %v335_v11 = vmul.f32 %v334_v2, %v2896_v30  ;;  %v362_v13 = vsel %vm341_vm4, %v359_v48, %v361_v49 }
 0x11c   : > { %v881_v17 = vsel %vm341_vm4, %v879_v7, %v880_v15  ;;  %v1041_v15 = vmul.f32 %v1040_v14, %v2914_v42  ;;  %v346_v50 = vsel %vm341_vm4, %v343_v24, %v345_v22  ;;  %v1082_v7 = vstv %s3162_s11  ;;  %s3468_s11 = sld [smem:[#allocation6 + $0x49]] }
 0x11d   : > { %v3219_v18 = vmul.f32 %v1082_v7, %v2906_v38  ;;  %v342_v39 = vrot.slane %v335_v11, 1  ;;  %v1085_v49 = vmul.f32 %v1082_v7, %v2988_v9 }
 0x11e   : > { %v1047_v47 = vrot.slane %v1041_v15, 5  ;;  %v352_v15 = vmul.f32 %v3138_v10, %v2914_v42  ;;  %v3248_v10 = vmul.f32 %v3222_v1, %v2902_v34 }
 0x11f   : > { %814 = vrot.lane.b32.xlu0 %v811_v12, %s2742_s4  ;;  %646 = vrot.lane.b32.xlu2 %v643_v20, %s2742_s4  ;;  %v313_v12 = vstv %s3102_s24  ;;  %v327_v20 = vstv %s3114_s30  ;;  %v1092_v11 = vrot.slane %v1085_v49, 6  ;;  %s2744_s24 = smov 125   ;;  %s3326_s30 = sld [smem:[#allocation6 + $0x5b]] }
 0x120   : > { %v326_v27 = vadd.f32 %v324_v5, %v313_v12  ;;  %v1049_v56 = vsel %vm481_vm8, %v1047_v47, %v1048_v37  ;;  %v999_v5 = vmul.f32 %v3100_v52, %v2914_v42  ;;  %v1072_v52 = vrot.slane %v1065_v59, 6 }
 0x121   : > { %v3078_v26 = vpop.permute.xlu2 %829  ;;  %v413_v4 = vrot.slane %v3248_v10, 3 }
 0x122   : > { %730 = vrot.lane.b32.xlu1 %v727_v25, %s2742_s4  ;;  %v329_v25 = vmul.f32 %v327_v20, %v2906_v38 }
 0x127   : > { %886 = vrot.lane.b32.xlu0 %v883_v35, %s2743_s13  ;;  %732 = vrot.lane.b32.xlu2 %v729_v36, %s2742_s4  ;;  %v1043_v36 = vmul.f32 %v1040_v14, %v2988_v9 }
 0x129   : > { %v3092_v44 = vpop.permute.xlu2 %844 }
 0x12a   : > { %816 = vrot.lane.b32.xlu1 %v813_v43, %s2742_s4  ;;  %v331_v43 = vadd.f32 %v329_v25, %v326_v27  ;;  %v1083_v25 = vmul.f32 %v1082_v7, %v2914_v42  ;;  %v328_v27 = vmul.f32 %v327_v20, %v2914_v42  ;;  %v1073_v20 = vsel %vm516_vm9, %v1070_v45, %v1072_v52 }
 0x12b   : > { %v421_v45 = vstv %s3203_s1  ;;  %v1104_v7 = vstv %s3225_s20  ;;  %s3518_s1 = sld [smem:[#allocation6 + $0x50]] }
 0x12c   : > { %v350_v3 = vadd.f32 %v346_v50, %v331_v43  ;;  %v1090_v43 = vrot.slane %v3219_v18, 6  ;;  %v407_v50 = vmul.f32 %v3222_v1, %v2912_v41  ;;  %v1089_v33 = vrot.slane %v1083_v25, 6  ;;  %s2444_s20 = sld [smem:[#allocation6 + $0x26]] }
 0x12d   : > { %v3294_v18 = vstv %s3234_s27  ;;  %s2445_s27 = sld [smem:[#allocation6 + $0x57]] }
 0x12e   : > { %v366_v22 = vadd.f32 %v362_v13, %v350_v3  ;;  %v1091_v59 = vsel %vm516_vm9, %v1089_v33, %v1090_v43  ;;  %v415_v13 = vrot.slane %v407_v50, 3  ;;  %v3316_v21 = vmul.f32 %v3294_v18, %v2902_v34 }
 0x12f   : > { %926 = vrot.lane.b32.xlu0 %v923_v51, %s2743_s13  ;;  %772 = vrot.lane.b32.xlu2 %v769_v54, %s2742_s4  ;;  %s3129_s4 = sld [smem:[#allocation6 + $0xe]]  ;;  %v1050_v51 = vrot.slane %v1043_v36, 5  ;;  %v3185_v54 = vstv %s3141_s10  ;;  %v3331_v50 = vstv %s3244_s29 }
 0x130   : > { %v389_v23 = vmul.f32 %v3185_v54, %v2988_v9  ;;  %v387_v25 = vmul.f32 %v3185_v54, %v2914_v42  ;;  %v3337_v33 = vstv %s3272_s8  ;;  %s3424_s10 = sld [smem:[#allocation6 + $0x18]] }
 0x131   : > { %v3119_v53 = vpop.permute.xlu0 %831  ;;  %v3122_v61 = vpop.permute.xlu2 %584  ;;  %v1051_v14 = vsel %vm481_vm8, %v1048_v37, %v1050_v51  ;;  %v325_v37 = vadd.f32 %v323_v29, %v313_v12  ;;  %s2447_s29 = sld [smem:[#allocation6 + $0x5e]] }
 0x132   : > { %928 = vrot.lane.b32.xlu1 %v925_v60, %s2743_s13  ;;  %v3193_v60 = vmul.f32 %v3185_v54, %v2906_v38  ;;  %v396_v12 = vrot.slane %v389_v23, 2  ;;  %s2450_s8 = sld [smem:[#allocation6 + $0xb]] }
 0x133   : > { %v330_v3 = vadd.f32 %v328_v27, %v325_v37  ;;  %v3304_v27 = vstv %s3239_s28  ;;  %s2446_s28 = sld [smem:[#allocation6 + $0x2d]] }
 0x134   : > { %v3135_v6 = vpop.permute.xlu1 %564  ;;  %v394_v36 = vrot.slane %v3193_v60, 2 }
 0x135   : > { %v3176_v40 = vstv %s3129_s4  ;;  %s3392_s4 = sld [smem:[#allocation6 + $0x42]] }
 0x136   : > { %v3197_v62 = vmul.f32 %v3176_v40, %v2902_v34  ;;  %v372_v0 = vmul.f32 %v3176_v40, %v2912_v41 }
 0x137   : > { %1012 = vrot.lane.b32.xlu0 %v1009_v16, %s2743_s13  ;;  %884 = vrot.lane.b32.xlu2 %v881_v17, %s2743_s13 }
 0x138   : > { %v378_v2 = vrot.slane %v3197_v62, 2  ;;  %v380_v19 = vrot.slane %v372_v0, 2 }
 0x139   : > { %v3166_v31 = vpop.permute.xlu0 %562  ;;  %v3169_v35 = vpop.permute.xlu2 %670 }
 0x13a   : > { %968 = vrot.lane.b32.xlu1 %v965_v32, %s2743_s13  ;;  %v1005_v32 = vrot.slane %v999_v5, 4  ;;  %v381_v51 = vsel %vm376_vm5, %v378_v2, %v380_v19  ;;  %v370_v5 = vmul.f32 %v3176_v40, %v2896_v30 }
 0x13b   : > { %v385_v55 = vadd.f32 %v381_v51, %v366_v22  ;;  %v3334_v51 = vstv %s3257_s7  ;;  %s3592_s7 = sld [smem:[#allocation6 + $0x4]] }
 0x13c   : > { %v3178_v46 = vpop.permute.xlu1 %842  ;;  %v1007_v47 = vsel %vm446_vm7, %v1005_v32, %v1006_v63  ;;  %v358_v63 = vrot.slane %v352_v15, 1  ;;  %v1105_v15 = vmul.f32 %v1104_v7, %v2896_v30  ;;  %v3312_v32 = vmul.f32 %v3304_v27, %v2906_v38 }
 0x13d   : > { %v377_v54 = vrot.slane %v370_v5, 2  ;;  %v3976_v5 = vrot.slane %v3316_v21, 4 }
 0x13e   : > { %v360_v23 = vsel %vm341_vm4, %v358_v63, %v359_v48  ;;  %v1093_v48 = vsel %vm516_vm9, %v1090_v43, %v1092_v11  ;;  %v1106_v43 = vmul.f32 %v1104_v7, %v2902_v34  ;;  %v1117_v7 = vstv %s3286_s9  ;;  %s2451_s9 = sld [smem:[#allocation6 + $0x3c]] }
 0x13f   : > { %1052 = vrot.lane.b32.xlu0 %v1049_v56, %s2743_s13  ;;  %970 = vrot.lane.b32.xlu2 %v967_v58, %s2743_s13  ;;  %v3270_v56 = vmul.f32 %v421_v45, %v2906_v38  ;;  %v344_v58 = vsel %vm341_vm4, %v342_v39, %v343_v24  ;;  %v397_v24 = vsel %vm376_vm5, %v394_v36, %v396_v12  ;;  %v1132_v12 = vstv %s3267_s6  ;;  %s3606_s6 = sld [smem:[#allocation6 + $0x35]] }
 0x140   : > { %v349_v52 = vadd.f32 %v344_v58, %v330_v3  ;;  %v401_v19 = vadd.f32 %v397_v24, %v385_v55  ;;  %v442_v39 = vmul.f32 %v3294_v18, %v2912_v41  ;;  %v3344_v58 = vmul.f32 %v1132_v12, %v2902_v34 }
 0x141   : > { %v3214_v16 = vpop.permute.xlu0 %586  ;;  %v3216_v17 = vpop.permute.xlu2 %710  ;;  %v429_v22 = vrot.slane %v3270_v56, 3  ;;  %v379_v3 = vsel %vm376_vm5, %v377_v54, %v378_v2  ;;  %v464_v62 = vrot.slane %v3312_v32, 4  ;;  %v1152_v54 = vstv %s3307_s22  ;;  %s2745_s22 = smov 124  }
 0x142   : > { %1054 = vrot.lane.b32.xlu1 %v1051_v14, %s2743_s13  ;;  %v424_v14 = vmul.f32 %v421_v45, %v2988_v9  ;;  %v450_v24 = vrot.slane %v442_v39, 4  ;;  %v1154_v39 = vmul.f32 %v1152_v54, %v2906_v38  ;;  %v1155_v60 = vmul.f32 %v1152_v54, %v2988_v9 }
 0x144   : > { %v3236_v28 = vpop.permute.xlu1 %628  ;;  %v431_v37 = vrot.slane %v424_v14, 3  ;;  %v393_v14 = vrot.slane %v387_v25, 2  ;;  %v3374_v25 = vmul.f32 %v3331_v50, %v2902_v34 }
 0x146   : > { %v432_v11 = vsel %vm411_vm6, %v429_v22, %v431_v37  ;;  %v405_v37 = vmul.f32 %v3222_v1, %v2896_v30 }
 0x147   : > { %1076 = vrot.lane.b32.xlu0 %v1073_v20, %s2743_s13  ;;  %1010 = vrot.lane.b32.xlu2 %v1007_v47, %s2743_s13  ;;  %v416_v20 = vsel %vm411_vm6, %v413_v4, %v415_v13  ;;  %v365_v47 = vadd.f32 %v360_v23, %v349_v52  ;;  %v459_v13 = vmul.f32 %v3304_v27, %v2988_v9 }
 0x148   : > { %v420_v49 = vadd.f32 %v416_v20, %v401_v19  ;;  %v1119_v23 = vmul.f32 %v1117_v7, %v2906_v38  ;;  %v1135_v20 = vmul.f32 %v1132_v12, %v2912_v41 }
 0x149   : > { %v3278_v0 = vpop.permute.xlu0 %626  ;;  %v3280_v29 = vpop.permute.xlu2 %796  ;;  %v384_v2 = vadd.f32 %v379_v3, %v365_v47  ;;  %v466_v47 = vrot.slane %v459_v13, 4  ;;  %v3389_v3 = vstv %s3326_s30  ;;  %s2453_s30 = sld [smem:[#allocation6 + $0x43]] }
 0x14a   : > { %1094 = vrot.lane.b32.xlu1 %v1091_v59, %s2743_s13  ;;  %v3347_v59 = vmul.f32 %v421_v45, %v2914_v42  ;;  %v1133_v45 = vmul.f32 %v1132_v12, %v2896_v30  ;;  %v436_v52 = vadd.f32 %v432_v11, %v420_v49  ;;  %v477_v49 = vmul.f32 %v3331_v50, %v2912_v41 }
 0x14c   : > { %v3296_v40 = vpop.permute.xlu1 %668  ;;  %v1139_v1 = vrot.slane %v1133_v45, 1  ;;  %v428_v11 = vrot.slane %v3347_v59, 3  ;;  %v412_v45 = vrot.slane %v405_v37, 3  ;;  %v3978_v59 = vrot.slane %v3374_v25, 5 }
 0x14d   : > { %v440_v37 = vmul.f32 %v3294_v18, %v2896_v30 }
 0x14f   : > { %1109 = vrot.lane.b32.xlu0 %v1105_v15, %s2744_s24  ;;  %1096 = vrot.lane.b32.xlu2 %v1093_v48, %s2743_s13  ;;  %v1118_v15 = vmul.f32 %v1117_v7, %v2914_v42  ;;  %v1140_v48 = vrot.slane %v3344_v58, 1  ;;  %s3368_s13 = sld [smem:[#allocation6 + $0x11]]  ;;  %v395_v58 = vsel %vm376_vm5, %v393_v14, %v394_v36  ;;  %v1153_v7 = vmul.f32 %v1152_v54, %v2914_v42 }
 0x150   : > { %v400_v13 = vadd.f32 %v395_v58, %v384_v2  ;;  %v3403_v36 = vmul.f32 %v3334_v51, %v2906_v38  ;;  %v1160_v14 = vrot.slane %v1154_v39, 1  ;;  %v467_v2 = vsel %vm446_vm7, %v464_v62, %v466_v47 }
 0x151   : > { %v3339_v55 = vpop.permute.xlu0 %712  ;;  %v3341_v63 = vpop.permute.xlu2 %908  ;;  %v494_v54 = vmul.f32 %v3334_v51, %v2988_v9  ;;  %v1162_v47 = vrot.slane %v1155_v60, 1 }
 0x152   : > { %1111 = vrot.lane.b32.xlu1 %v1106_v43, %s2744_s24  ;;  %v451_v43 = vsel %vm446_vm7, %v3976_v5, %v450_v24  ;;  %v1141_v24 = vsel %vm341_vm4, %v1139_v1, %v1140_v48  ;;  %v414_v1 = vsel %vm411_vm6, %v412_v45, %v413_v4  ;;  %v3421_v5 = vmul.f32 %v3337_v33, %v2902_v34  ;;  %v3442_v45 = vld [vmem:[#allocation4] sm:$0xff] }
 0x153   : > { %v455_v12 = vadd.f32 %v451_v43, %v436_v52  ;;  %v1142_v52 = vrot.slane %v1135_v20, 1  ;;  %v485_v43 = vrot.slane %v477_v49, 5  ;;  %v1159_v20 = vrot.slane %v1153_v7, 1 }
 0x154   : > { %v3362_v19 = vpop.permute.xlu1 %754  ;;  %v501_v7 = vrot.slane %v494_v54, 5  ;;  %v447_v54 = vrot.slane %v440_v37, 4 }
 0x155   : > { %v471_v58 = vadd.f32 %v467_v2, %v455_v12  ;;  %v1174_v49 = vstv %s3368_s13  ;;  %v1161_v10 = vsel %vm341_vm4, %v1159_v20, %v1160_v14  ;;  %v1143_v4 = vsel %vm341_vm4, %v1140_v48, %v1142_v52  ;;  %s2454_s13 = sld [smem:[#allocation6 + $0x19]] }
 0x156   : > { %v1176_v30 = vmul.f32 %v1174_v49, %v2902_v34  ;;  %v1177_v18 = vmul.f32 %v1174_v49, %v2912_v41  ;;  %v3977_v12 = vrot.slane %v3403_v36, 5  ;;  %v486_v60 = vsel %vm481_vm8, %v3978_v59, %v485_v43 }
 0x157   : > { %1124 = vrot.lane.b32.xlu0 %v1119_v23, %s2744_s24  ;;  %1122 = vrot.lane.b32.xlu2 %v1118_v15, %s2744_s24  ;;  %v3440_v48 = vmul.f32 %v3389_v3, %v2906_v38  ;;  %v490_v34 = vadd.f32 %v486_v60, %v471_v58  ;;  %v1175_v52 = vmul.f32 %v3442_v45, %v1174_v49  ;;  %v1194_v2 = vstv %s3392_s4  ;;  %s2455_s4 = sld [smem:[#allocation6 + $0x4a]] }
 0x158   : > { %v1163_v43 = vsel %vm341_vm4, %v1160_v14, %v1162_v47  ;;  %v518_v58 = vrot.slane %v3421_v5, 6  ;;  %v1182_v49 = vrot.slane %v1176_v30, 2  ;;  %v1184_v60 = vrot.slane %v1177_v18, 2 }
 0x159   : > { %v3396_v23 = vpop.permute.xlu0 %752  ;;  %v3398_v15 = vpop.permute.xlu2 %948  ;;  %v502_v56 = vsel %vm481_vm8, %v3977_v12, %v501_v7  ;;  %v1195_v14 = vmul.f32 %v1194_v2, %v2914_v42  ;;  %v534_v37 = vrot.slane %v3440_v48, 6  ;;  %v1181_v30 = vrot.slane %v1175_v52, 2 }
 0x15a   : > { %1144 = vrot.lane.b32.xlu1 %v1141_v24, %s2744_s24  ;;  %v419_v24 = vadd.f32 %v414_v1, %v400_v13  ;;  %v512_v13 = vmul.f32 %v3337_v33, %v2912_v41  ;;  %v430_v41 = vsel %vm411_vm6, %v428_v11, %v429_v22  ;;  %v529_v11 = vmul.f32 %v3389_v3, %v2988_v9 }
 0x15b   : > { %v3986_v18 = vrot.slane %v3316_v21, 4  ;;  %v1185_v12 = vsel %vm376_vm5, %v1182_v49, %v1184_v60  ;;  %v1197_v52 = vmul.f32 %v1194_v2, %v2988_v9 }
 0x15c   : > { %v3417_v39 = vpop.permute.xlu1 %794  ;;  %v520_v22 = vrot.slane %v512_v13, 6  ;;  %v475_v13 = vmul.f32 %v3442_v45, %v3331_v50  ;;  %v536_v59 = vrot.slane %v529_v11, 6  ;;  %v1201_v50 = vrot.slane %v1195_v14, 2  ;;  %v3495_v11 = vld [vmem:[#allocation4 + $0x10] sm:$0x3f] }
 0x15d   : > { %v449_v7 = vsel %vm446_vm7, %v447_v54, %v3986_v18 }
 0x15e   : > { %v521_v21 = vsel %vm516_vm9, %v518_v58, %v520_v22  ;;  %v537_v18 = vsel %vm516_vm9, %v534_v37, %v536_v59 }
 0x15f   : > { %1164 = vrot.lane.b32.xlu0 %v1161_v10, %s2744_s24  ;;  %1146 = vrot.lane.b32.xlu2 %v1143_v4, %s2744_s24  ;;  %v1196_v10 = vmul.f32 %v1194_v2, %v2906_v38  ;;  %v435_v4 = vadd.f32 %v430_v41, %v419_v24  ;;  %v457_v38 = vmul.f32 %v3304_v27, %v2914_v42  ;;  %v3478_v27 = vld [vmem:[#allocation4 + $0x8] sm:$0xff] }
 0x160   : > { %v506_v24 = vadd.f32 %v502_v56, %v490_v34  ;;  %v1183_v42 = vsel %vm376_vm5, %v1181_v30, %v1182_v49  ;;  %v482_v30 = vrot.slane %v475_v13, 5 }
 0x161   : > { %v3450_v1 = vpop.permute.xlu0 %864  ;;  %v3452_v20 = vpop.permute.xlu2 %1034  ;;  %v1202_v41 = vrot.slane %v1196_v10, 2  ;;  %v454_v56 = vadd.f32 %v449_v7, %v435_v4  ;;  %v463_v54 = vrot.slane %v457_v38, 4  ;;  %v1204_v38 = vrot.slane %v1197_v52, 2  ;;  %v3505_v7 = vld [vmem:[#allocation4 + $0x18] sm:$0xff]  ;;  %v3515_v52 = vld [vmem:[#allocation4 + $0x20] sm:$0xff] }
 0x162   : > { %1166 = vrot.lane.b32.xlu1 %v1163_v43, %s2744_s24  ;;  %v1216_v43 = vstv %s3424_s10  ;;  %v525_v10 = vadd.f32 %v521_v21, %v506_v24  ;;  %s2456_s10 = sld [smem:[#allocation6 + $0x20]] }
 0x163   : > { %v1218_v34 = vmul.f32 %v3478_v27, %v1216_v43  ;;  %v1217_v49 = vmul.f32 %v3442_v45, %v1216_v43  ;;  %v1203_v60 = vsel %vm376_vm5, %v1201_v50, %v1202_v41  ;;  %v465_v22 = vsel %vm446_vm7, %v463_v54, %v464_v62 }
 0x164   : > { %v3466_v47 = vpop.permute.xlu1 %866  ;;  %v470_v24 = vadd.f32 %v465_v22, %v454_v56  ;;  %v1236_v62 = vstv %s3468_s11  ;;  %v3987_v50 = vrot.slane %v3374_v25, 5  ;;  %v1205_v54 = vsel %vm376_vm5, %v1202_v41, %v1204_v38  ;;  %s2457_s11 = sld [smem:[#allocation6 + $0x51]] }
 0x165   : > { %v1224_v14 = vrot.slane %v1218_v34, 3  ;;  %v1223_v32 = vrot.slane %v1217_v49, 3  ;;  %v1238_v59 = vmul.f32 %v3515_v52, %v1236_v62  ;;  %v510_v25 = vmul.f32 %v3442_v45, %v3337_v33 }
 0x166   : > { %v484_v34 = vsel %vm481_vm8, %v482_v30, %v3987_v50  ;;  %v1237_v22 = vmul.f32 %v3505_v7, %v1236_v62  ;;  %v3988_v33 = vrot.slane %v3403_v36, 5  ;;  %v527_v50 = vmul.f32 %v3505_v7, %v3389_v3 }
 0x167   : > { %1188 = vrot.lane.b32.xlu0 %v1185_v12, %s2744_s24  ;;  %1186 = vrot.lane.b32.xlu2 %v1183_v42, %s2744_s24  ;;  %v1219_v12 = vmul.f32 %v3495_v11, %v1216_v43  ;;  %v492_v42 = vmul.f32 %v3505_v7, %v3334_v51  ;;  %v541_v43 = vadd.f32 %v537_v18, %v525_v10 }
 0x168   : > { %v1225_v51 = vsel %vm411_vm6, %v1223_v32, %v1224_v14  ;;  %v1239_v10 = vmul.f32 %v1236_v62, %v2988_v9  ;;  %v489_v49 = vadd.f32 %v484_v34, %v470_v24  ;;  %v517_v62 = vrot.slane %v510_v25, 6 }
 0x169   : > { %v3491_v2 = vpop.permute.xlu0 %950  ;;  %v3493_v4 = vpop.permute.xlu2 %1074  ;;  %v1226_v13 = vrot.slane %v1219_v12, 3  ;;  %v556_v56 = vadd.f32 %v3061_v8, %v541_v43  ;;  %v1258_v8 = vstv %s3488_s12  ;;  %v533_v5 = vrot.slane %v527_v50, 6  ;;  %s2458_s12 = sld [smem:[#allocation6 + $0x27]] }
 0x16a   : > { %1206 = vrot.lane.b32.xlu1 %v1203_v60, %s2744_s24  ;;  %v498_v60 = vrot.slane %v492_v42, 5  ;;  %v1260_v38 = vmul.f32 %v3478_v27, %v1258_v8  ;;  %v1246_v42 = vrot.slane %v1239_v10, 3  ;;  %v519_v36 = vsel %vm516_vm9, %v517_v62, %v518_v58 }
 0x16b   : > { %v569_v12 = vadd.f32 %v3135_v6, %v556_v56  ;;  %v1227_v30 = vsel %vm411_vm6, %v1224_v14, %v1226_v13  ;;  %v1244_v6 = vrot.slane %v1238_v59, 3  ;;  %v1259_v14 = vmul.f32 %v3442_v45, %v1258_v8 }
 0x16c   : > { %v3509_v21 = vpop.permute.xlu1 %906  ;;  %v500_v24 = vsel %vm481_vm8, %v498_v60, %v3988_v33  ;;  %v1243_v56 = vrot.slane %v1237_v22, 3  ;;  %v1300_v62 = vstv %s2444_s20  ;;  %s2460_s20 = sld [smem:[#allocation6 + $0x2e]] }
 0x16d   : > { %v591_v43 = vadd.f32 %v3214_v16, %v569_v12  ;;  %v505_v32 = vadd.f32 %v500_v24, %v489_v49  ;;  %v1266_v16 = vrot.slane %v1260_v38, 4  ;;  %v1247_v59 = vsel %vm411_vm6, %v1244_v6, %v1246_v42 }
 0x16e   : > { %v1261_v49 = vmul.f32 %v3495_v11, %v1258_v8  ;;  %v1265_v25 = vrot.slane %v1259_v14, 4  ;;  %v535_v8 = vsel %vm516_vm9, %v533_v5, %v534_v37  ;;  %v1302_v37 = vmul.f32 %v3478_v27, %v1300_v62 }
 0x16f   : > { %1228 = vrot.lane.b32.xlu0 %v1225_v51, %s2744_s24  ;;  %1208 = vrot.lane.b32.xlu2 %v1205_v54, %s2744_s24  ;;  %v1278_v51 = vstv %s3518_s1  ;;  %v1245_v54 = vsel %vm411_vm6, %v1243_v56, %v1244_v6  ;;  %v524_v3 = vadd.f32 %v519_v36, %v505_v32  ;;  %v1303_v50 = vmul.f32 %v3495_v11, %v1300_v62  ;;  %s2459_s1 = sld [smem:[#allocation6 + $0x58]] }
 0x170   : > { %v1280_v10 = vmul.f32 %v3515_v52, %v1278_v51  ;;  %v1279_v60 = vmul.f32 %v3505_v7, %v1278_v51  ;;  %v1267_v12 = vsel %vm446_vm7, %v1265_v25, %v1266_v16  ;;  %v1268_v24 = vrot.slane %v1261_v49, 4 }
 0x171   : > { %v3532_v18 = vpop.permute.xlu0 %990  ;;  %v607_v41 = vpop.permute.xlu2 %606  ;;  %v1301_v56 = vmul.f32 %v3442_v45, %v1300_v62 }
 0x172   : > { %1230 = vrot.lane.b32.xlu1 %v1227_v30, %s2744_s24  ;;  %v611_v34 = vadd.f32 %v607_v41, %v591_v43  ;;  %v1281_v41 = vmul.f32 %v1278_v51, %v2988_v9  ;;  %v1286_v33 = vrot.slane %v1280_v10, 4  ;;  %v540_v43 = vadd.f32 %v535_v8, %v524_v3 }
 0x173   : > { %v1285_v6 = vrot.slane %v1279_v60, 4  ;;  %v1269_v48 = vsel %vm446_vm7, %v1266_v16, %v1268_v24  ;;  %v1308_v16 = vrot.slane %v1302_v37, 5  ;;  %v1310_v10 = vrot.slane %v1303_v50, 5 }
 0x174   : > { %v3543_v13 = vpop.permute.xlu1 %992  ;;  %v633_v58 = vadd.f32 %v3236_v28, %v611_v34  ;;  %v555_v42 = vadd.f32 %v3044_v57, %v540_v43  ;;  %v1288_v32 = vrot.slane %v1281_v41, 4  ;;  %v1320_v57 = vstv %s2445_s27  ;;  %s2461_s27 = sld [smem:[#allocation6 + $0x5f]] }
 0x175   : > { %v1287_v14 = vsel %vm446_vm7, %v1285_v6, %v1286_v33  ;;  %v1307_v25 = vrot.slane %v1301_v56, 5  ;;  %v1342_v60 = vstv %s2446_s28  ;;  %v1323_v8 = vmul.f32 %v1320_v57, %v2988_v9  ;;  %s2462_s28 = sld [smem:[#allocation6 + $0x5]] }
 0x176   : > { %v568_v34 = vadd.f32 %v3166_v31, %v555_v42  ;;  %v1289_v36 = vsel %vm446_vm7, %v1286_v33, %v1288_v32  ;;  %v1321_v31 = vmul.f32 %v3505_v7, %v1320_v57  ;;  %v1344_v41 = vmul.f32 %v3478_v27, %v1342_v60 }
 0x177   : > { %1250 = vrot.lane.b32.xlu0 %v1247_v59, %s2744_s24  ;;  %1248 = vrot.lane.b32.xlu2 %v1245_v54, %s2744_s24  ;;  %v1322_v54 = vmul.f32 %v3515_v52, %v1320_v57  ;;  %v1343_v24 = vmul.f32 %v3442_v45, %v1342_v60  ;;  %v1345_v62 = vmul.f32 %v3495_v11, %v1342_v60  ;;  %v1330_v9 = vrot.slane %v1323_v8, 5 }
 0x178   : > { %v590_v49 = vadd.f32 %v3122_v61, %v568_v34  ;;  %v1327_v61 = vrot.slane %v1321_v31, 5 }
 0x179   : > { %v649_v22 = vpop.permute.xlu0 %648  ;;  %v647_v30 = vpop.permute.xlu2 %646  ;;  %v1349_v50 = vrot.slane %v1343_v24, 6  ;;  %v1352_v57 = vrot.slane %v1345_v62, 6 }
 0x17a   : > { %1270 = vrot.lane.b32.xlu1 %v1267_v12, %s2744_s24  ;;  %v653_v38 = vadd.f32 %v649_v22, %v633_v58  ;;  %v1328_v58 = vrot.slane %v1322_v54, 5  ;;  %v1311_v12 = vsel %vm481_vm8, %v1308_v16, %v1310_v10  ;;  %v1309_v22 = vsel %vm481_vm8, %v1307_v25, %v1308_v16  ;;  %v3597_v10 = vld [vmem:[#allocation4 + $0x28] sm:$0x3f] }
 0x17c   : > { %v3563_v28 = vpop.permute.xlu1 %1032  ;;  %v1329_v6 = vsel %vm481_vm8, %v1327_v61, %v1328_v58  ;;  %v1331_v54 = vsel %vm481_vm8, %v1328_v58, %v1330_v9 }
 0x17f   : > { %1290 = vrot.lane.b32.xlu0 %v1287_v14, %s2744_s24  ;;  %1272 = vrot.lane.b32.xlu2 %v1269_v48, %s2744_s24  ;;  %v1350_v14 = vrot.slane %v1344_v41, 6 }
 0x181   : > { %v689_v51 = vpop.permute.xlu0 %688  ;;  %v733_v59 = vpop.permute.xlu2 %732 }
 0x182   : > { %1292 = vrot.lane.b32.xlu1 %v1289_v36, %s2744_s24  ;;  %v1351_v36 = vsel %vm516_vm9, %v1349_v50, %v1350_v14 }
 0x184   : > { %v605_v3 = vpop.permute.xlu1 %604 }
 0x185   : > { %v610_v5 = vadd.f32 %v605_v3, %v590_v49  ;;  %v1353_v49 = vsel %vm516_vm9, %v1350_v14, %v1352_v57  ;;  %v1432_v57 = vstv %s2451_s9  ;;  %s2466_s9 = sld [smem:[#allocation6 + $0x13]] }
 0x187   : > { %v632_v33 = vadd.f32 %v3278_v0, %v610_v5  ;;  %1314 = vrot.lane.b32.xlu0 %v1311_v12, %s2744_s24  ;;  %1312 = vrot.lane.b32.xlu2 %v1309_v22, %s2744_s24  ;;  %v675_v0 = vadd.f32 %v3169_v35, %v653_v38 }
 0x189   : > { %v652_v43 = vadd.f32 %v647_v30, %v632_v33  ;;  %v775_v42 = vpop.permute.xlu0 %774  ;;  %v773_v32 = vpop.permute.xlu2 %772  ;;  %v1362_v30 = vstv %s2447_s29  ;;  %s2464_s29 = sld [smem:[#allocation6 + $0xc]] }
 0x18a   : > { %1332 = vrot.lane.b32.xlu1 %v1329_v6, %s2744_s24  ;;  %v1364_v16 = vmul.f32 %v3515_v52, %v1362_v30  ;;  %v1365_v35 = vmul.f32 %v3597_v10, %v1362_v30  ;;  %v1363_v38 = vmul.f32 %v3505_v7, %v1362_v30  ;;  %v1397_v6 = vstv %s3606_s6  ;;  %s2465_s6 = sld [smem:[#allocation6 + $0x3d]] }
 0x18b   : > { %v674_v48 = vadd.f32 %v3296_v40, %v652_v43 }
 0x18c   : > { %v691_v37 = vpop.permute.xlu1 %690  ;;  %v1370_v25 = vrot.slane %v1364_v16, 6  ;;  %v1372_v5 = vrot.slane %v1365_v35, 6  ;;  %v1369_v12 = vrot.slane %v1363_v38, 6  ;;  %v1434_v35 = vmul.f32 %v3515_v52, %v1432_v57 }
 0x18d   : > { %v694_v34 = vadd.f32 %v689_v51, %v674_v48  ;;  %v695_v56 = vadd.f32 %v691_v37, %v675_v0  ;;  %v1398_v48 = vmul.f32 %v3505_v7, %v1397_v6  ;;  %v1412_v37 = vstv %s2450_s8  ;;  %s2746_s8 = smov 123  }
 0x18e   : > { %v1373_v8 = vsel %vm516_vm9, %v1370_v25, %v1372_v5  ;;  %v1371_v33 = vsel %vm516_vm9, %v1369_v12, %v1370_v25  ;;  %v1415_v50 = vmul.f32 %v3495_v11, %v1412_v37  ;;  %v1440_v5 = vrot.slane %v1434_v35, 1 }
 0x18f   : > { %v717_v40 = vadd.f32 %v3339_v55, %v695_v56  ;;  %1354 = vrot.lane.b32.xlu0 %v1351_v36, %s2744_s24  ;;  %1334 = vrot.lane.b32.xlu2 %v1331_v54, %s2744_s24  ;;  %v716_v55 = vadd.f32 %v3216_v17, %v694_v34  ;;  %v1435_v12 = vmul.f32 %v3597_v10, %v1432_v57 }
 0x191   : > { %v737_v51 = vadd.f32 %v733_v59, %v717_v40  ;;  %v815_v31 = vpop.permute.xlu0 %814  ;;  %v885_v3 = vpop.permute.xlu2 %884  ;;  %v1384_v59 = vstv %s3592_s7  ;;  %s3723_s7 = sld [smem:[#allocation6 + $0x36]] }
 0x192   : > { %1356 = vrot.lane.b32.xlu1 %v1353_v49, %s2744_s24  ;;  %v1385_v17 = vmul.f32 %v3442_v45, %v1384_v59  ;;  %v1386_v14 = vmul.f32 %v3478_v27, %v1384_v59 }
 0x193   : > { %v759_v58 = vadd.f32 %v3362_v19, %v737_v51  ;;  %v1433_v51 = vmul.f32 %v3505_v7, %v1432_v57 }
 0x194   : > { %v731_v60 = vpop.permute.xlu1 %730 }
 0x195   : > { %v779_v22 = vadd.f32 %v775_v42, %v759_v58  ;;  %v736_v41 = vadd.f32 %v731_v60, %v716_v55 }
 0x197   : > { %v758_v61 = vadd.f32 %v3396_v23, %v736_v41  ;;  %1376 = vrot.lane.b32.xlu0 %v1373_v8, %s2744_s24  ;;  %1374 = vrot.lane.b32.xlu2 %v1371_v33, %s2744_s24  ;;  %v801_v42 = vadd.f32 %v3280_v29, %v779_v22  ;;  %s2452_s24 = sld [smem:[#allocation6 + $0x12]]  ;;  %v1399_v29 = vmul.f32 %v3515_v52, %v1397_v6 }
 0x199   : > { %v778_v19 = vadd.f32 %v773_v32, %v758_v61  ;;  %v887_v24 = vpop.permute.xlu0 %886  ;;  %v3617_v43 = vpop.permute.xlu2 %970  ;;  %v1414_v32 = vmul.f32 %v3478_v27, %v1412_v37 }
 0x19a   : > { %1389 = vrot.lane.b32.xlu1 %v1385_v17, %s2745_s22 }
 0x19b   : > { %v800_v62 = vadd.f32 %v3417_v39, %v778_v19  ;;  %v1413_v39 = vmul.f32 %v3442_v45, %v1412_v37 }
 0x19c   : > { %v817_v23 = vpop.permute.xlu1 %816 }
 0x19d   : > { %v820_v9 = vadd.f32 %v815_v31, %v800_v62  ;;  %v821_v0 = vadd.f32 %v817_v23, %v801_v42  ;;  %v1419_v31 = vrot.slane %v1413_v39, 1 }
 0x19f   : > { %v835_v34 = vadd.f32 %v3078_v26, %v820_v9  ;;  %v836_v56 = vadd.f32 %v3119_v53, %v821_v0  ;;  %1402 = vrot.lane.b32.xlu0 %v1398_v48, %s2745_s22  ;;  %1391 = vrot.lane.b32.xlu2 %v1386_v14, %s2745_s22  ;;  %v1420_v26 = vrot.slane %v1414_v32, 1  ;;  %v1422_v53 = vrot.slane %v1415_v50, 1 }
 0x1a0   : > { %v1474_v9 = vstv %s2453_s30  ;;  %v1496_v50 = vstv %s2454_s13  ;;  %s2469_s30 = sld [smem:[#allocation6 + $0x4b]] }
 0x1a1   : > { %v848_v30 = vadd.f32 %v3178_v46, %v835_v34  ;;  %v849_v36 = vadd.f32 %v3092_v44, %v836_v56  ;;  %v927_v54 = vpop.permute.xlu0 %926  ;;  %v1011_v16 = vpop.permute.xlu2 %1010  ;;  %v1454_v44 = vstv %s2452_s24  ;;  %v1423_v55 = vsel %vm341_vm4, %v1420_v26, %v1422_v53  ;;  %s2468_s24 = sld [smem:[#allocation6 + $0x1a]] }
 0x1a2   : > { %1404 = vrot.lane.b32.xlu1 %v1399_v29, %s2745_s22  ;;  %v1421_v58 = vsel %vm341_vm4, %v1419_v31, %v1420_v26  ;;  %v1456_v60 = vmul.f32 %v3478_v27, %v1454_v44  ;;  %v1455_v22 = vmul.f32 %v3442_v45, %v1454_v44  ;;  %v1457_v17 = vmul.f32 %v3495_v11, %v1454_v44  ;;  %s2470_s13 = sld [smem:[#allocation6 + $0x21]] }
 0x1a3   : > { %v870_v40 = vadd.f32 %v3450_v1, %v848_v30  ;;  %v871_v38 = vadd.f32 %v3466_v47, %v849_v36  ;;  %v1476_v37 = vmul.f32 %v3515_v52, %v1474_v9  ;;  %v1477_v32 = vmul.f32 %v3597_v10, %v1474_v9 }
 0x1a4   : > { %v929_v49 = vpop.permute.xlu1 %928  ;;  %v1461_v42 = vrot.slane %v1455_v22, 2  ;;  %v1464_v14 = vrot.slane %v1457_v17, 2  ;;  %v1498_v30 = vmul.f32 %v3478_v27, %v1496_v50  ;;  %v1497_v35 = vmul.f32 %v3442_v45, %v1496_v50 }
 0x1a5   : > { %v890_v25 = vadd.f32 %v885_v3, %v870_v40  ;;  %v891_v46 = vadd.f32 %v887_v24, %v871_v38  ;;  %v1439_v3 = vrot.slane %v1433_v51, 1  ;;  %v1484_v36 = vrot.slane %v1477_v32, 2 }
 0x1a6   : > { %v1504_v38 = vrot.slane %v1498_v30, 3  ;;  %v1516_v51 = vstv %s2455_s4  ;;  %s2471_s4 = sld [smem:[#allocation6 + $0x52]] }
 0x1a7   : > { %v912_v1 = vadd.f32 %v3509_v21, %v890_v25  ;;  %v913_v47 = vadd.f32 %v3341_v63, %v891_v46  ;;  %1426 = vrot.lane.b32.xlu0 %v1423_v55, %s2745_s22  ;;  %1424 = vrot.lane.b32.xlu2 %v1421_v58, %s2745_s22  ;;  %v1441_v8 = vsel %vm341_vm4, %v1439_v3, %v1440_v5  ;;  %v1462_v21 = vrot.slane %v1456_v60, 2 }
 0x1a8   : > { %v1442_v63 = vrot.slane %v1435_v12, 1  ;;  %v1518_v25 = vmul.f32 %v3515_v52, %v1516_v51  ;;  %v1499_v46 = vmul.f32 %v3495_v11, %v1496_v50  ;;  %v1519_v58 = vmul.f32 %v3597_v10, %v1516_v51 }
 0x1a9   : > { %v932_v41 = vadd.f32 %v927_v54, %v912_v1  ;;  %v933_v59 = vadd.f32 %v929_v49, %v913_v47  ;;  %v1013_v33 = vpop.permute.xlu0 %1012  ;;  %v1097_v61 = vpop.permute.xlu2 %1096  ;;  %v1463_v0 = vsel %vm376_vm5, %v1461_v42, %v1462_v21  ;;  %v1465_v29 = vsel %vm376_vm5, %v1462_v21, %v1464_v14 }
 0x1aa   : > { %1444 = vrot.lane.b32.xlu1 %v1441_v8, %s2745_s22  ;;  %v1443_v48 = vsel %vm341_vm4, %v1440_v5, %v1442_v63  ;;  %v1524_v12 = vrot.slane %v1518_v25, 3  ;;  %v1506_v1 = vrot.slane %v1499_v46, 3  ;;  %v1526_v8 = vrot.slane %v1519_v58, 3 }
 0x1ab   : > { %v954_v19 = vadd.f32 %v3398_v15, %v932_v41  ;;  %v955_v24 = vadd.f32 %v3491_v2, %v933_v59 }
 0x1ac   : > { %v969_v6 = vpop.permute.xlu1 %968  ;;  %v1507_v21 = vsel %vm411_vm6, %v1504_v38, %v1506_v1 }
 0x1ad   : > { %v975_v62 = vadd.f32 %v3617_v43, %v955_v24  ;;  %v974_v23 = vadd.f32 %v969_v6, %v954_v19  ;;  %v1475_v43 = vmul.f32 %v3505_v7, %v1474_v9  ;;  %v1527_v24 = vsel %vm411_vm6, %v1524_v12, %v1526_v8 }
 0x1af   : > { %v997_v15 = vadd.f32 %v3543_v13, %v975_v62  ;;  %v996_v2 = vadd.f32 %v3532_v18, %v974_v23  ;;  %1466 = vrot.lane.b32.xlu0 %v1463_v0, %s2745_s22  ;;  %1446 = vrot.lane.b32.xlu2 %v1443_v48, %s2745_s22  ;;  %v1482_v13 = vrot.slane %v1476_v37, 2  ;;  %v1481_v53 = vrot.slane %v1475_v43, 2 }
 0x1b0   : > { %v1580_v43 = vstv %s2458_s12  ;;  %s2474_s12 = sld [smem:[#allocation6 + $0x2f]] }
 0x1b1   : > { %v1017_v34 = vadd.f32 %v1013_v33, %v997_v15  ;;  %v1016_v56 = vadd.f32 %v1011_v16, %v996_v2  ;;  %v1053_v39 = vpop.permute.xlu0 %1052  ;;  %v1123_v57 = vpop.permute.xlu2 %1122  ;;  %v1485_v49 = vsel %vm376_vm5, %v1482_v13, %v1484_v36  ;;  %v1483_v31 = vsel %vm376_vm5, %v1481_v53, %v1482_v13 }
 0x1b2   : > { %1468 = vrot.lane.b32.xlu1 %v1465_v29, %s2745_s22  ;;  %v1538_v33 = vstv %s2456_s10  ;;  %s2472_s10 = sld [smem:[#allocation6 + $0x28]] }
 0x1b3   : > { %v1039_v18 = vadd.f32 %v3452_v20, %v1017_v34  ;;  %v1038_v54 = vadd.f32 %v3563_v28, %v1016_v56  ;;  %v1503_v20 = vrot.slane %v1497_v35, 3  ;;  %v1517_v28 = vmul.f32 %v3505_v7, %v1516_v51 }
 0x1b4   : > { %v1055_v26 = vpop.permute.xlu1 %1054  ;;  %v1540_v63 = vmul.f32 %v3478_v27, %v1538_v33  ;;  %v1541_v19 = vmul.f32 %v3495_v11, %v1538_v33  ;;  %v1582_v56 = vmul.f32 %v3478_v27, %v1580_v43 }
 0x1b5   : > { %v1058_v40 = vadd.f32 %v1053_v39, %v1038_v54  ;;  %v1059_v16 = vadd.f32 %v1055_v26, %v1039_v18  ;;  %v1505_v5 = vsel %vm411_vm6, %v1503_v20, %v1504_v38  ;;  %v1523_v41 = vrot.slane %v1517_v28, 3 }
 0x1b6   : > { %v1546_v14 = vrot.slane %v1540_v63, 4  ;;  %v1548_v9 = vrot.slane %v1541_v19, 4  ;;  %v1583_v18 = vmul.f32 %v3495_v11, %v1580_v43  ;;  %v1588_v35 = vrot.slane %v1582_v56, 5 }
 0x1b7   : > { %1488 = vrot.lane.b32.xlu0 %v1485_v49, %s2745_s22  ;;  %1486 = vrot.lane.b32.xlu2 %v1483_v31, %s2745_s22  ;;  %v1080_v47 = vadd.f32 %v3493_v4, %v1058_v40  ;;  %v1525_v17 = vsel %vm411_vm6, %v1523_v41, %v1524_v12  ;;  %v1539_v4 = vmul.f32 %v3442_v45, %v1538_v33  ;;  %v1600_v49 = vstv %s2459_s1  ;;  %s2475_s1 = sld [smem:[#allocation6 + $0x60]] }
 0x1b8   : > { %v1549_v50 = vsel %vm446_vm7, %v1546_v14, %v1548_v9  ;;  %v1590_v51 = vrot.slane %v1583_v18, 5  ;;  %v1602_v46 = vmul.f32 %v3515_v52, %v1600_v49  ;;  %v1603_v20 = vmul.f32 %v3597_v10, %v1600_v49 }
 0x1b9   : > { %v1077_v44 = vpop.permute.xlu0 %1076  ;;  %v1147_v55 = vpop.permute.xlu2 %1146  ;;  %v1545_v32 = vrot.slane %v1539_v4, 4  ;;  %v1601_v28 = vmul.f32 %v3505_v7, %v1600_v49 }
 0x1ba   : > { %1508 = vrot.lane.b32.xlu1 %v1505_v5, %s2745_s22  ;;  %v1081_v60 = vadd.f32 %v1077_v44, %v1059_v16  ;;  %v1622_v5 = vstv %s2460_s20  ;;  %v1591_v44 = vsel %vm481_vm8, %v1588_v35, %v1590_v51  ;;  %v1608_v1 = vrot.slane %v1602_v46, 5  ;;  %s3824_s20 = sld [smem:[#allocation6 + $0x6]] }
 0x1bb   : > { %v1547_v34 = vsel %vm446_vm7, %v1545_v32, %v1546_v14  ;;  %v1625_v4 = vmul.f32 %v3495_v11, %v1622_v5 }
 0x1bc   : > { %v1101_v3 = vadd.f32 %v1097_v61, %v1081_v60  ;;  %v1095_v22 = vpop.permute.xlu1 %1094  ;;  %v1558_v61 = vstv %s2457_s11  ;;  %v1624_v60 = vmul.f32 %v3478_v27, %v1622_v5  ;;  %s2473_s11 = sld [smem:[#allocation6 + $0x59]] }
 0x1bd   : > { %v1100_v59 = vadd.f32 %v1095_v22, %v1080_v47  ;;  %v1560_v62 = vmul.f32 %v3515_v52, %v1558_v61  ;;  %v1559_v0 = vmul.f32 %v3505_v7, %v1558_v61  ;;  %v1561_v29 = vmul.f32 %v3597_v10, %v1558_v61 }
 0x1be   : > { %v1610_v47 = vrot.slane %v1603_v20, 5  ;;  %v1630_v33 = vrot.slane %v1624_v60, 6 }
 0x1bf   : > { %1528 = vrot.lane.b32.xlu0 %v1525_v17, %s2745_s22  ;;  %1510 = vrot.lane.b32.xlu2 %v1507_v21, %s2745_s22  ;;  %v1566_v2 = vrot.slane %v1560_v62, 4  ;;  %v1565_v39 = vrot.slane %v1559_v0, 4  ;;  %v1568_v26 = vrot.slane %v1561_v29, 4  ;;  %v1642_v17 = vstv %s2461_s27  ;;  %s2478_s27 = sld [smem:[#allocation6 + $0xd]] }
 0x1c0   : > { %v1611_v21 = vsel %vm481_vm8, %v1608_v1, %v1610_v47  ;;  %v1644_v19 = vmul.f32 %v3515_v52, %v1642_v17  ;;  %v1632_v0 = vrot.slane %v1625_v4, 6 }
 0x1c1   : > { %v1110_v6 = vpop.permute.xlu0 %1109  ;;  %v1187_v42 = vpop.permute.xlu2 %1186  ;;  %v1567_v30 = vsel %vm446_vm7, %v1565_v39, %v1566_v2  ;;  %v1569_v25 = vsel %vm446_vm7, %v1566_v2, %v1568_v26  ;;  %v1692_v26 = vstv %s2464_s29  ;;  %s2479_s29 = sld [smem:[#allocation6 + $0x3e]] }
 0x1c2   : > { %1530 = vrot.lane.b32.xlu1 %v1527_v24, %s2745_s22  ;;  %v1115_v23 = vadd.f32 %v1110_v6, %v1100_v59  ;;  %v1607_v59 = vrot.slane %v1601_v28, 5  ;;  %v1643_v24 = vmul.f32 %v3505_v7, %v1642_v17  ;;  %v1650_v9 = vrot.slane %v1644_v19, 6 }
 0x1c3   : > { %v1695_v49 = vmul.f32 %v3495_v11, %v1692_v26 }
 0x1c4   : > { %v1128_v48 = vadd.f32 %v1123_v57, %v1115_v23  ;;  %v1112_v37 = vpop.permute.xlu1 %1111  ;;  %v1581_v57 = vmul.f32 %v3442_v45, %v1580_v43  ;;  %v1609_v63 = vsel %vm481_vm8, %v1607_v59, %v1608_v1  ;;  %v1645_v23 = vmul.f32 %v3597_v10, %v1642_v17 }
 0x1c5   : > { %v1116_v15 = vadd.f32 %v1112_v37, %v1101_v3  ;;  %v1623_v3 = vmul.f32 %v3442_v45, %v1622_v5  ;;  %v1649_v32 = vrot.slane %v1643_v24, 6 }
 0x1c6   : > { %v1587_v16 = vrot.slane %v1581_v57, 5  ;;  %v1652_v2 = vrot.slane %v1645_v23, 6  ;;  %v1664_v57 = vstv %s2462_s28  ;;  %s2477_s28 = sld [smem:[#allocation6 + $0x37]] }
 0x1c7   : > { %1552 = vrot.lane.b32.xlu0 %v1549_v50, %s2745_s22  ;;  %1550 = vrot.lane.b32.xlu2 %v1547_v34, %s2745_s22  ;;  %v1629_v61 = vrot.slane %v1623_v3, 6  ;;  %v1651_v43 = vsel %vm516_vm9, %v1649_v32, %v1650_v9  ;;  %v1633_v50 = vsel %vm516_vm9, %v1630_v33, %v1632_v0  ;;  %v1734_v3 = vstv %s2466_s9  ;;  %s2482_s9 = sld [smem:[#allocation6 + $0x1b]] }
 0x1c8   : > { %v1589_v31 = vsel %vm481_vm8, %v1587_v16, %v1588_v35  ;;  %v1653_v34 = vsel %vm516_vm9, %v1650_v9, %v1652_v2  ;;  %v1677_v35 = vstv %s3723_s7  ;;  %v1693_v16 = vmul.f32 %v3442_v45, %v1692_v26  ;;  %s2747_s7 = smov 122  }
 0x1c9   : > { %v1125_v13 = vpop.permute.xlu0 %1124  ;;  %v1209_v36 = vpop.permute.xlu2 %1208  ;;  %v1631_v6 = vsel %vm516_vm9, %v1629_v61, %v1630_v33  ;;  %v1737_v9 = vmul.f32 %v3495_v11, %v1734_v3 }
 0x1ca   : > { %1570 = vrot.lane.b32.xlu1 %v1567_v30, %s2745_s22  ;;  %v1129_v54 = vadd.f32 %v1125_v13, %v1116_v15  ;;  %v1699_v28 = vrot.slane %v1693_v16, 1 }
 0x1cc   : > { %v1151_v53 = vadd.f32 %v1147_v55, %v1129_v54  ;;  %v1145_v40 = vpop.permute.xlu1 %1144  ;;  %v1665_v54 = vmul.f32 %v3442_v45, %v1664_v57 }
 0x1cd   : > { %v1150_v38 = vadd.f32 %v1145_v40, %v1128_v48  ;;  %v1678_v40 = vmul.f32 %v3505_v7, %v1677_v35 }
 0x1cf   : > { %1592 = vrot.lane.b32.xlu0 %v1589_v31, %s2745_s22  ;;  %1572 = vrot.lane.b32.xlu2 %v1569_v25, %s2745_s22 }
 0x1d1   : > { %v1165_v55 = vpop.permute.xlu0 %1164  ;;  %v1249_v58 = vpop.permute.xlu2 %1248 }
 0x1d2   : > { %1594 = vrot.lane.b32.xlu1 %v1591_v44, %s2745_s22  ;;  %v1170_v12 = vadd.f32 %v1165_v55, %v1150_v38  ;;  %v1679_v44 = vmul.f32 %v3515_v52, %v1677_v35  ;;  %v1702_v55 = vrot.slane %v1695_v49, 1  ;;  %v3768_v35 = vld [vmem:[#allocation4] sm:$0xff] }
 0x1d4   : > { %v1192_v22 = vadd.f32 %v1187_v42, %v1170_v12  ;;  %v1167_v41 = vpop.permute.xlu1 %1166 }
 0x1d5   : > { %v1171_v8 = vadd.f32 %v1167_v41, %v1151_v53  ;;  %v1694_v53 = vmul.f32 %v3478_v27, %v1692_v26 }
 0x1d7   : > { %1614 = vrot.lane.b32.xlu0 %v1611_v21, %s2745_s22  ;;  %1612 = vrot.lane.b32.xlu2 %v1609_v63, %s2745_s22  ;;  %v1700_v25 = vrot.slane %v1694_v53, 1  ;;  %v1735_v63 = vmul.f32 %v3442_v45, %v1734_v3  ;;  %v1796_v53 = vstv %s2469_s30  ;;  %s2485_s30 = sld [smem:[#allocation6 + $0x53]] }
 0x1d9   : > { %v1189_v42 = vpop.permute.xlu0 %1188  ;;  %v1273_v62 = vpop.permute.xlu2 %1272  ;;  %v1701_v60 = vsel %vm341_vm4, %v1699_v28, %v1700_v25  ;;  %v1741_v45 = vrot.slane %v1735_v63, 2 }
 0x1da   : > { %1634 = vrot.lane.b32.xlu1 %v1631_v6, %s2745_s22  ;;  %v1193_v14 = vadd.f32 %v1189_v42, %v1171_v8  ;;  %v1736_v8 = vmul.f32 %v3478_v27, %v1734_v3 }
 0x1dc   : > { %v1213_v48 = vadd.f32 %v1209_v36, %v1193_v14  ;;  %v1207_v37 = vpop.permute.xlu1 %1206  ;;  %v1666_v36 = vmul.f32 %v3478_v27, %v1664_v57  ;;  %v1742_v6 = vrot.slane %v1736_v8, 2 }
 0x1dd   : > { %v1212_v15 = vadd.f32 %v1207_v37, %v1192_v22  ;;  %v1703_v22 = vsel %vm341_vm4, %v1700_v25, %v1702_v55 }
 0x1df   : > { %1654 = vrot.lane.b32.xlu0 %v1651_v43, %s2745_s22  ;;  %1636 = vrot.lane.b32.xlu2 %v1633_v50, %s2745_s22  ;;  %v1744_v50 = vrot.slane %v1737_v9, 2  ;;  %v1860_v9 = vstv %s2472_s10  ;;  %s2488_s10 = sld [smem:[#allocation6 + $0x30]] }
 0x1e1   : > { %v1229_v56 = vpop.permute.xlu0 %1228  ;;  %v1313_v29 = vpop.permute.xlu2 %1312 }
 0x1e2   : > { %1656 = vrot.lane.b32.xlu1 %v1653_v34, %s2745_s22  ;;  %v1234_v39 = vadd.f32 %v1229_v56, %v1212_v15  ;;  %s2467_s22 = sld [smem:[#allocation6 + $0x44]] }
 0x1e4   : > { %v1254_v30 = vadd.f32 %v1249_v58, %v1234_v39  ;;  %v1231_v13 = vpop.permute.xlu1 %1230  ;;  %v1712_v58 = vstv %s2465_s6  ;;  %s2480_s6 = sld [smem:[#allocation6 + $0x14]] }
 0x1e5   : > { %v1235_v18 = vadd.f32 %v1231_v13, %v1213_v48  ;;  %v1714_v12 = vmul.f32 %v3515_v52, %v1712_v58  ;;  %v1715_v1 = vmul.f32 %v3597_v10, %v1712_v58  ;;  %v1713_v47 = vmul.f32 %v3505_v7, %v1712_v58 }
 0x1e6   : > { %v1743_v48 = vsel %vm376_vm5, %v1741_v45, %v1742_v6  ;;  %v1818_v58 = vstv %s2470_s13  ;;  %s2486_s13 = sld [smem:[#allocation6 + $0x29]] }
 0x1e7   : > { %1671 = vrot.lane.b32.xlu0 %v1666_v36, %s2746_s8  ;;  %1669 = vrot.lane.b32.xlu2 %v1665_v54, %s2746_s8  ;;  %v1720_v17 = vrot.slane %v1714_v12, 1  ;;  %v1722_v21 = vrot.slane %v1715_v1, 1  ;;  %v1719_v61 = vrot.slane %v1713_v47, 1  ;;  %v1745_v36 = vsel %vm376_vm5, %v1742_v6, %v1744_v50 }
 0x1e8   : > { %v1754_v42 = vstv %s2467_s22  ;;  %v1820_v1 = vmul.f32 %v3478_v27, %v1818_v58  ;;  %v1799_v47 = vmul.f32 %v3597_v10, %v1796_v53  ;;  %v1838_v6 = vstv %s2471_s4  ;;  %s2483_s22 = sld [smem:[#allocation6 + $0x4c]] }
 0x1e9   : > { %v1251_v38 = vpop.permute.xlu0 %1250  ;;  %v1335_v51 = vpop.permute.xlu2 %1334  ;;  %v1721_v23 = vsel %vm341_vm4, %v1719_v61, %v1720_v17  ;;  %v1756_v14 = vmul.f32 %v3515_v52, %v1754_v42  ;;  %v1755_v0 = vmul.f32 %v3505_v7, %v1754_v42  ;;  %v1757_v15 = vmul.f32 %v3597_v10, %v1754_v42  ;;  %s2487_s4 = sld [smem:[#allocation6 + $0x5a]] }
 0x1ea   : > { %1682 = vrot.lane.b32.xlu1 %v1678_v40, %s2746_s8  ;;  %v1255_v31 = vadd.f32 %v1251_v38, %v1235_v18 }
 0x1eb   : > { %v1762_v43 = vrot.slane %v1756_v14, 2  ;;  %v1764_v57 = vrot.slane %v1757_v15, 2  ;;  %v1839_v14 = vmul.f32 %v3505_v7, %v1838_v6 }
 0x1ec   : > { %v1277_v46 = vadd.f32 %v1273_v62, %v1255_v31  ;;  %v1271_v20 = vpop.permute.xlu1 %1270  ;;  %v1723_v62 = vsel %vm341_vm4, %v1720_v17, %v1722_v21  ;;  %v1806_v21 = vrot.slane %v1799_v47, 3 }
 0x1ed   : > { %v1276_v5 = vadd.f32 %v1271_v20, %v1254_v30  ;;  %v1776_v30 = vstv %s2468_s24  ;;  %v1765_v40 = vsel %vm376_vm5, %v1762_v43, %v1764_v57  ;;  %s2484_s24 = sld [smem:[#allocation6 + $0x22]] }
 0x1ee   : > { %v1778_v18 = vmul.f32 %v3478_v27, %v1776_v30  ;;  %v1779_v54 = vmul.f32 %v3495_v11, %v1776_v30  ;;  %v1777_v26 = vmul.f32 %v3768_v35, %v1776_v30  ;;  %v1826_v27 = vrot.slane %v1820_v1, 4 }
 0x1ef   : > { %1704 = vrot.lane.b32.xlu0 %v1701_v60, %s2746_s8  ;;  %1684 = vrot.lane.b32.xlu2 %v1679_v44, %s2746_s8 }
 0x1f0   : > { %v1784_v31 = vrot.slane %v1778_v18, 3  ;;  %v1786_v25 = vrot.slane %v1779_v54, 3  ;;  %v1783_v28 = vrot.slane %v1777_v26, 3  ;;  %v3803_v18 = vld [vmem:[#allocation4 + $0x10] sm:$0x3f] }
 0x1f1   : > { %v1291_v41 = vpop.permute.xlu0 %1290  ;;  %v1375_v59 = vpop.permute.xlu2 %1374  ;;  %v1863_v54 = vmul.f32 %v3803_v18, %v1860_v9 }
 0x1f2   : > { %1706 = vrot.lane.b32.xlu1 %v1703_v22, %s2746_s8  ;;  %v1296_v33 = vadd.f32 %v1291_v41, %v1276_v5  ;;  %v1787_v60 = vsel %vm411_vm6, %v1784_v31, %v1786_v25  ;;  %v1785_v12 = vsel %vm411_vm6, %v1783_v28, %v1784_v31  ;;  %v1819_v22 = vmul.f32 %v3768_v35, %v1818_v58 }
 0x1f4   : > { %v1318_v19 = vadd.f32 %v1313_v29, %v1296_v33  ;;  %v1293_v4 = vpop.permute.xlu1 %1292  ;;  %v1761_v29 = vrot.slane %v1755_v0, 2  ;;  %v1821_v33 = vmul.f32 %v3495_v11, %v1818_v58  ;;  %v1841_v11 = vmul.f32 %v3597_v10, %v1838_v6 }
 0x1f5   : > { %v1297_v24 = vadd.f32 %v1293_v4, %v1277_v46  ;;  %v1797_v46 = vmul.f32 %v3505_v7, %v1796_v53  ;;  %v1902_v58 = vstv %s2474_s12  ;;  %s2386_s12 = sshll.u32 %s2878_s21, 4 }
 0x1f6   : > { %v1763_v13 = vsel %vm376_vm5, %v1761_v29, %v1762_v43  ;;  %v1861_v43 = vmul.f32 %v3768_v35, %v1860_v9  ;;  %v1905_v47 = vmul.f32 %v3803_v18, %v1902_v58 }
 0x1f7   : > { %1726 = vrot.lane.b32.xlu0 %v1723_v62, %s2746_s8  ;;  %1724 = vrot.lane.b32.xlu2 %v1721_v23, %s2746_s8  ;;  %v1803_v3 = vrot.slane %v1797_v46, 3  ;;  %v1840_v23 = vmul.f32 %v3515_v52, %v1838_v6  ;;  %v1870_v46 = vrot.slane %v1863_v54, 5 }
 0x1f8   : > { %v1867_v26 = vrot.slane %v1861_v43, 5 }
 0x1f9   : > { %v1315_v37 = vpop.permute.xlu0 %1314  ;;  %v1392_v32 = vpop.permute.xlu2 %1391  ;;  %v1846_v15 = vrot.slane %v1840_v23, 4 }
 0x1fa   : > { %1746 = vrot.lane.b32.xlu1 %v1743_v48, %s2746_s8  ;;  %v1319_v2 = vadd.f32 %v1315_v37, %v1297_v24  ;;  %v1828_v24 = vrot.slane %v1821_v33, 4  ;;  %v3793_v37 = vld [vmem:[#allocation4 + $0x8] sm:$0xff] }
 0x1fb   : > { %v1904_v1 = vmul.f32 %v3793_v37, %v1902_v58 }
 0x1fc   : > { %v1339_v34 = vadd.f32 %v1335_v51, %v1319_v2  ;;  %v1333_v56 = vpop.permute.xlu1 %1332  ;;  %v1798_v51 = vmul.f32 %v3515_v52, %v1796_v53  ;;  %v1829_v45 = vsel %vm446_vm7, %v1826_v27, %v1828_v24  ;;  %v1848_v2 = vrot.slane %v1841_v11, 4  ;;  %v3808_v53 = vld [vmem:[#allocation4 + $0x18] sm:$0xff] }
 0x1fd   : > { %v1338_v39 = vadd.f32 %v1333_v56, %v1318_v19  ;;  %v1825_v19 = vrot.slane %v1819_v22, 4  ;;  %v1922_v22 = vstv %s2475_s1  ;;  %s2498_s1 = sshll.u32 %s2727_s17, 4  ;;  %s222_s17 = scalar_lea.vmem [#allocation11], %s2386_s12 }
 0x1fe   : > { %v1804_v55 = vrot.slane %v1798_v51, 3  ;;  %v1849_v57 = vsel %vm446_vm7, %v1846_v15, %v1848_v2  ;;  %v1925_v23 = vmul.f32 %v3597_v10, %v1922_v22 }
 0x1ff   : > { %1766 = vrot.lane.b32.xlu0 %v1763_v13, %s2746_s8  ;;  %1748 = vrot.lane.b32.xlu2 %v1745_v36, %s2746_s8  ;;  %v1827_v42 = vsel %vm446_vm7, %v1825_v19, %v1826_v27  ;;  %v3800_v13 = vld [vmem:[#allocation4 + $0x20] sm:$0xff]  ;;  %v1910_v27 = vrot.slane %v1904_v1, 6 }
 0x200   : > { %v1805_v41 = vsel %vm411_vm6, %v1803_v3, %v1804_v55  ;;  %v1807_v62 = vsel %vm411_vm6, %v1804_v55, %v1806_v21  ;;  %v1903_v3 = vmul.f32 %v3768_v35, %v1902_v58  ;;  %v1924_v33 = vmul.f32 %v3800_v13, %v1922_v22 }
 0x201   : > { %v1355_v16 = vpop.permute.xlu0 %1354  ;;  %v1425_v38 = vpop.permute.xlu2 %1424  ;;  %v1912_v21 = vrot.slane %v1905_v47, 6 }
 0x202   : > { %1768 = vrot.lane.b32.xlu1 %v1765_v40, %s2746_s8  ;;  %v1360_v49 = vadd.f32 %v1355_v16, %v1338_v39  ;;  %v1880_v39 = vstv %s2473_s11  ;;  %v1930_v6 = vrot.slane %v1924_v33, 6  ;;  %s2489_s11 = sld [smem:[#allocation6 + $0x61]] }
 0x203   : > { %v1882_v36 = vmul.f32 %v3800_v13, %v1880_v39  ;;  %v1881_v40 = vmul.f32 %v3808_v53, %v1880_v39 }
 0x204   : > { %v1357_v20 = vpop.permute.xlu1 %1356  ;;  %v1380_v5 = vadd.f32 %v1375_v59, %v1360_v49  ;;  %v1883_v49 = vmul.f32 %v3597_v10, %v1880_v39 }
 0x205   : > { %v1361_v44 = vadd.f32 %v1357_v20, %v1339_v34  ;;  %v1845_v34 = vrot.slane %v1839_v14, 4  ;;  %v1888_v25 = vrot.slane %v1882_v36, 5  ;;  %v1887_v28 = vrot.slane %v1881_v40, 5 }
 0x206   : > { %v1890_v55 = vrot.slane %v1883_v49, 5  ;;  %v1992_v49 = vstv %s2479_s29  ;;  %s2276_s29 = sshll.u32 %s222_s17, 4  ;;  %s2277_s29 = int_to_ptr.vmem [resolvable:$true] %s2276_s29 }
 0x207   : > { %1790 = vrot.lane.b32.xlu0 %v1787_v60, %s2746_s8  ;;  %1788 = vrot.lane.b32.xlu2 %v1785_v12, %s2746_s8  ;;  %v1847_v30 = vsel %vm446_vm7, %v1845_v34, %v1846_v15  ;;  %v1889_v60 = vsel %vm481_vm8, %v1887_v28, %v1888_v25 }
 0x209   : > { %v1377_v59 = vpop.permute.xlu0 %1376  ;;  %v1447_v8 = vpop.permute.xlu2 %1446 }
 0x20a   : > { %1808 = vrot.lane.b32.xlu1 %v1805_v41, %s2746_s8  ;;  %v1381_v17 = vadd.f32 %v1377_v59, %v1361_v44  ;;  %v1891_v41 = vsel %vm481_vm8, %v1888_v25, %v1890_v55  ;;  %v1995_v55 = vmul.f32 %v3597_v10, %v1992_v49 }
 0x20c   : > { %v1390_v63 = vpop.permute.xlu1 %1389  ;;  %v1396_v4 = vadd.f32 %v1392_v32, %v1381_v17  ;;  %v1862_v32 = vmul.f32 %v3793_v37, %v1860_v9 }
 0x20d   : > { %v1395_v61 = vadd.f32 %v1390_v63, %v1380_v5  ;;  %v1923_v63 = vmul.f32 %v3808_v53, %v1922_v22 }
 0x20e   : > { %v1868_v29 = vrot.slane %v1862_v32, 5  ;;  %v1932_v32 = vrot.slane %v1925_v23, 6 }
 0x20f   : > { %1830 = vrot.lane.b32.xlu0 %v1827_v42, %s2746_s8  ;;  %1810 = vrot.lane.b32.xlu2 %v1807_v62, %s2746_s8  ;;  %v1913_v42 = vsel %vm516_vm9, %v1910_v27, %v1912_v21  ;;  %v1929_v11 = vrot.slane %v1923_v63, 6 }
 0x210   : > { %v1869_v16 = vsel %vm481_vm8, %v1867_v26, %v1868_v29  ;;  %v1871_v12 = vsel %vm481_vm8, %v1868_v29, %v1870_v46 }
 0x211   : > { %v1403_v0 = vpop.permute.xlu0 %1402  ;;  %v1487_v48 = vpop.permute.xlu2 %1486  ;;  %v1931_v14 = vsel %vm516_vm9, %v1929_v11, %v1930_v6 }
 0x212   : > { %1832 = vrot.lane.b32.xlu1 %v1829_v45, %s2746_s8  ;;  %v1408_v52 = vadd.f32 %v1403_v0, %v1395_v61 }
 0x214   : > { %v1405_v50 = vpop.permute.xlu1 %1404  ;;  %v1430_v56 = vadd.f32 %v1425_v38, %v1408_v52 }
 0x215   : > { %v1409_v7 = vadd.f32 %v1405_v50, %v1396_v4  ;;  %v1909_v4 = vrot.slane %v1903_v3, 6  ;;  %v1933_v50 = vsel %vm516_vm9, %v1930_v6, %v1932_v32 }
 0x217   : > { %1852 = vrot.lane.b32.xlu0 %v1849_v57, %s2746_s8  ;;  %1850 = vrot.lane.b32.xlu2 %v1847_v30, %s2746_s8  ;;  %v1911_v62 = vsel %vm516_vm9, %v1909_v4, %v1910_v27  ;;  %v1957_v30 = vstv %s2477_s28  ;;  %s2275_s28 = scalar_lea.hbm %s3975_s3, %s2498_s1 }
 0x218   : > { %v1959_v26 = vmul.f32 %v3800_v13, %v1957_v30 }
 0x219   : > { %v1427_v38 = vpop.permute.xlu0 %1426  ;;  %v1511_v51 = vpop.permute.xlu2 %1510 }
 0x21a   : > { %1872 = vrot.lane.b32.xlu1 %v1869_v16, %s2746_s8  ;;  %v1431_v31 = vadd.f32 %v1427_v38, %v1409_v7  ;;  %v1958_v38 = vmul.f32 %v3808_v53, %v1957_v30 }
 0x21c   : > { %v1445_v20 = vpop.permute.xlu1 %1444  ;;  %v1451_v5 = vadd.f32 %v1447_v8, %v1431_v31  ;;  %v1994_v31 = vmul.f32 %v3800_v13, %v1992_v49 }
 0x21d   : > { %v1450_v44 = vadd.f32 %v1445_v20, %v1430_v56  ;;  %v1972_v56 = vstv %s2478_s27  ;;  %v1993_v20 = vmul.f32 %v3808_v53, %v1992_v49 }
 0x21e   : > { %v1974_v39 = vmul.f32 %v3793_v37, %v1972_v56  ;;  %v1973_v36 = vmul.f32 %v3768_v35, %v1972_v56  ;;  %v1975_v25 = vmul.f32 %v3803_v18, %v1972_v56 }
 0x21f   : > { %1892 = vrot.lane.b32.xlu0 %v1889_v60, %s2746_s8  ;;  %1874 = vrot.lane.b32.xlu2 %v1871_v12, %s2746_s8  ;;  %v2000_v60 = vrot.slane %v1994_v31, 1  ;;  %v1999_v47 = vrot.slane %v1993_v20, 1  ;;  %v2098_v20 = vstv %s2484_s24 }
 0x220   : > { %v1979_v46 = vrot.slane %v1973_v36, 1  ;;  %v1982_v12 = vrot.slane %v1975_v25, 1 }
 0x221   : > { %v1467_v59 = vpop.permute.xlu0 %1466  ;;  %v1551_v8 = vpop.permute.xlu2 %1550 }
 0x222   : > { %1894 = vrot.lane.b32.xlu1 %v1891_v41, %s2746_s8  ;;  %v1472_v17 = vadd.f32 %v1467_v59, %v1450_v44  ;;  %v2002_v41 = vrot.slane %v1995_v55, 1  ;;  %v2014_v59 = vstv %s2480_s6  ;;  %v2100_v55 = vmul.f32 %v3793_v37, %v2098_v20  ;;  %s2264_s6 = scalar_lea.sflag [#allocation8], %s2878_s21 }
 0x223   : > { %v2017_v10 = vmul.f32 %v3803_v18, %v2014_v59  ;;  %v2015_v27 = vmul.f32 %v3768_v35, %v2014_v59 }
 0x224   : > { %v1469_v19 = vpop.permute.xlu1 %1468  ;;  %v1492_v61 = vadd.f32 %v1487_v48, %v1472_v17  ;;  %v1944_v48 = vstv %s3824_s20  ;;  %v2016_v17 = vmul.f32 %v3793_v37, %v2014_v59  ;;  %v2003_v63 = vsel %vm341_vm4, %v2000_v60, %v2002_v41 }
 0x225   : > { %v1473_v24 = vadd.f32 %v1469_v19, %v1451_v5  ;;  %v1945_v43 = vmul.f32 %v3768_v35, %v1944_v48  ;;  %v1946_v34 = vmul.f32 %v3793_v37, %v1944_v48  ;;  %v2021_v11 = vrot.slane %v2015_v27, 2 }
 0x226   : > { %v2022_v6 = vrot.slane %v2016_v17, 2  ;;  %v2106_v59 = vrot.slane %v2100_v55, 4  ;;  %v2101_v27 = vmul.f32 %v3803_v18, %v2098_v20 }
 0x227   : > { %1916 = vrot.lane.b32.xlu0 %v1913_v42, %s2746_s8  ;;  %1914 = vrot.lane.b32.xlu2 %v1911_v62, %s2746_s8  ;;  %v2024_v42 = vrot.slane %v2017_v10, 2 }
 0x228   : > { %v2023_v32 = vsel %vm376_vm5, %v2021_v11, %v2022_v6 }
 0x229   : > { %v1489_v9 = vpop.permute.xlu0 %1488  ;;  %v1573_v45 = vpop.permute.xlu2 %1572  ;;  %v2025_v48 = vsel %vm376_vm5, %v2022_v6, %v2024_v42 }
 0x22a   : > { %1934 = vrot.lane.b32.xlu1 %v1931_v14, %s2746_s8  ;;  %v1493_v0 = vadd.f32 %v1489_v9, %v1473_v24 }
 0x22c   : > { %v1509_v52 = vpop.permute.xlu1 %1508  ;;  %v1515_v15 = vadd.f32 %v1511_v51, %v1493_v0  ;;  %v1980_v51 = vrot.slane %v1974_v39, 1  ;;  %v2056_v0 = vstv %s2482_s9 }
 0x22d   : > { %v1514_v2 = vadd.f32 %v1509_v52, %v1492_v61  ;;  %v2058_v52 = vmul.f32 %v3793_v37, %v2056_v0 }
 0x22e   : > { %v1981_v28 = vsel %vm341_vm4, %v1979_v46, %v1980_v51  ;;  %v1983_v33 = vsel %vm341_vm4, %v1980_v51, %v1982_v12 }
 0x22f   : > { %1949 = vrot.lane.b32.xlu0 %v1945_v43, %s2747_s7  ;;  %1936 = vrot.lane.b32.xlu2 %v1933_v50, %s2746_s8  ;;  %s2481_s8 = sld [smem:[#allocation6 + $0x45]]  ;;  %v2057_v50 = vmul.f32 %v3768_v35, %v2056_v0 }
 0x231   : > { %v1529_v7 = vpop.permute.xlu0 %1528  ;;  %v1613_v29 = vpop.permute.xlu2 %1612 }
 0x232   : > { %1951 = vrot.lane.b32.xlu1 %v1946_v34, %s2747_s7  ;;  %v1534_v57 = vadd.f32 %v1529_v7, %v1514_v2 }
 0x234   : > { %v1531_v54 = vpop.permute.xlu1 %1530  ;;  %v1556_v40 = vadd.f32 %v1551_v8, %v1534_v57  ;;  %v2001_v8 = vsel %vm341_vm4, %v1999_v47, %v2000_v60  ;;  %v2064_v57 = vrot.slane %v2058_v52, 3 }
 0x235   : > { %v1535_v16 = vadd.f32 %v1531_v54, %v1515_v15  ;;  %v2034_v21 = vstv %s2481_s8  ;;  %v3867_v15 = vld [vmem:[#allocation4 + $0x28] sm:$0x3f]  ;;  %v2063_v54 = vrot.slane %v2057_v50, 3  ;;  %v2160_v50 = vstv %s2487_s4 }
 0x236   : > { %v2036_v61 = vmul.f32 %v3800_v13, %v2034_v21  ;;  %v2035_v62 = vmul.f32 %v3808_v53, %v2034_v21  ;;  %v2037_v2 = vmul.f32 %v3867_v15, %v2034_v21 }
 0x237   : > { %1964 = vrot.lane.b32.xlu0 %v1959_v26, %s2747_s7  ;;  %1962 = vrot.lane.b32.xlu2 %v1958_v38, %s2747_s7  ;;  %v2076_v38 = vstv %s2483_s22  ;;  %v2065_v51 = vsel %vm411_vm6, %v2063_v54, %v2064_v57 }
 0x238   : > { %v2041_v43 = vrot.slane %v2035_v62, 2  ;;  %v2044_v30 = vrot.slane %v2037_v2, 2  ;;  %v2078_v31 = vmul.f32 %v3800_v13, %v2076_v38  ;;  %v2079_v25 = vmul.f32 %v3867_v15, %v2076_v38 }
 0x239   : > { %v1553_v5 = vpop.permute.xlu0 %1552  ;;  %v1637_v44 = vpop.permute.xlu2 %1636  ;;  %v2077_v46 = vmul.f32 %v3808_v53, %v2076_v38  ;;  %v2108_v62 = vrot.slane %v2101_v27, 4 }
 0x23a   : > { %1984 = vrot.lane.b32.xlu1 %v1981_v28, %s2747_s7  ;;  %v1557_v58 = vadd.f32 %v1553_v5, %v1535_v16  ;;  %v2084_v60 = vrot.slane %v2078_v31, 3  ;;  %v2086_v12 = vrot.slane %v2079_v25, 3 }
 0x23c   : > { %v1571_v1 = vpop.permute.xlu1 %1570  ;;  %v1577_v3 = vadd.f32 %v1573_v45, %v1557_v58  ;;  %v2042_v45 = vrot.slane %v2036_v61, 2 }
 0x23d   : > { %v1576_v22 = vadd.f32 %v1571_v1, %v1556_v40  ;;  %v2099_v1 = vmul.f32 %v3768_v35, %v2098_v20 }
 0x23e   : > { %v2043_v34 = vsel %vm376_vm5, %v2041_v43, %v2042_v45  ;;  %v2045_v49 = vsel %vm376_vm5, %v2042_v45, %v2044_v30 }
 0x23f   : > { %2004 = vrot.lane.b32.xlu0 %v2001_v8, %s2747_s7  ;;  %1986 = vrot.lane.b32.xlu2 %v1983_v33, %s2747_s7  ;;  %v2118_v8 = vstv %s2485_s30  ;;  %v2087_v33 = vsel %vm411_vm6, %v2084_v60, %v2086_v12  ;;  %v2105_v21 = vrot.slane %v2099_v1, 4  ;;  %s2669_s30 = scalar_lea.hbm %s3975_s3, 32 }
 0x240   : > { %v2120_v10 = vmul.f32 %v3800_v13, %v2118_v8 }
 0x241   : > { %v1593_v19 = vpop.permute.xlu0 %1592  ;;  %v1670_v4 = vpop.permute.xlu2 %1669 }
 0x242   : > { %2006 = vrot.lane.b32.xlu1 %v2003_v63, %s2747_s7  ;;  %v1598_v24 = vadd.f32 %v1593_v19, %v1576_v22  ;;  %v2119_v63 = vmul.f32 %v3808_v53, %v2118_v8  ;;  %v2107_v19 = vsel %vm446_vm7, %v2105_v21, %v2106_v59  ;;  %v2126_v42 = vrot.slane %v2120_v10, 4 }
 0x244   : > { %v1595_v23 = vpop.permute.xlu1 %1594  ;;  %v1618_v14 = vadd.f32 %v1613_v29, %v1598_v24  ;;  %v2059_v29 = vmul.f32 %v3803_v18, %v2056_v0  ;;  %v2121_v24 = vmul.f32 %v3867_v15, %v2118_v8  ;;  %v2125_v11 = vrot.slane %v2119_v63, 4 }
 0x245   : > { %v1599_v9 = vadd.f32 %v1595_v23, %v1577_v3  ;;  %v2083_v3 = vrot.slane %v2077_v46, 3  ;;  %v2140_v0 = vstv %s2486_s13  ;;  %v2163_v46 = vmul.f32 %v3867_v15, %v2160_v50 }
 0x246   : > { %v2066_v16 = vrot.slane %v2059_v29, 3  ;;  %v2128_v45 = vrot.slane %v2121_v24, 4  ;;  %v2142_v52 = vmul.f32 %v3793_v37, %v2140_v0  ;;  %v2143_v2 = vmul.f32 %v3803_v18, %v2140_v0 }
 0x247   : > { %2028 = vrot.lane.b32.xlu0 %v2025_v48, %s2747_s7  ;;  %2026 = vrot.lane.b32.xlu2 %v2023_v32, %s2747_s7  ;;  %v2085_v17 = vsel %vm411_vm6, %v2083_v3, %v2084_v60  ;;  %v2127_v48 = vsel %vm446_vm7, %v2125_v11, %v2126_v42  ;;  %v2109_v32 = vsel %vm446_vm7, %v2106_v59, %v2108_v62  ;;  %v2202_v59 = vstv %s2489_s11 }
 0x248   : > { %v2067_v28 = vsel %vm411_vm6, %v2064_v57, %v2066_v16  ;;  %v2141_v43 = vmul.f32 %v3768_v35, %v2140_v0  ;;  %v2162_v29 = vmul.f32 %v3800_v13, %v2160_v50  ;;  %v2148_v57 = vrot.slane %v2142_v52, 5 }
 0x249   : > { %v1615_v56 = vpop.permute.xlu0 %1614  ;;  %v1685_v7 = vpop.permute.xlu2 %1684  ;;  %v2150_v30 = vrot.slane %v2143_v2, 5 }
 0x24a   : > { %2046 = vrot.lane.b32.xlu1 %v2043_v34, %s2747_s7  ;;  %v1619_v39 = vadd.f32 %v1615_v56, %v1599_v9  ;;  %v2129_v34 = vsel %vm446_vm7, %v2126_v42, %v2128_v45  ;;  %v2168_v38 = vrot.slane %v2162_v29, 5 }
 0x24c   : > { %v1635_v36 = vpop.permute.xlu1 %1634  ;;  %v1641_v26 = vadd.f32 %v1637_v44, %v1619_v39 }
 0x24d   : > { %v1640_v40 = vadd.f32 %v1635_v36, %v1618_v14  ;;  %v2161_v36 = vmul.f32 %v3808_v53, %v2160_v50 }
 0x24f   : > { %2068 = vrot.lane.b32.xlu0 %v2065_v51, %s2747_s7  ;;  %2048 = vrot.lane.b32.xlu2 %v2045_v49, %s2747_s7  ;;  %v2182_v51 = vstv %s2488_s10  ;;  %v2151_v49 = vsel %vm481_vm8, %v2148_v57, %v2150_v30  ;;  %v2167_v20 = vrot.slane %v2161_v36, 5 }
 0x250   : > { %v2184_v25 = vmul.f32 %v3793_v37, %v2182_v51  ;;  %v2170_v37 = vrot.slane %v2163_v46, 5 }
 0x251   : > { %v1655_v5 = vpop.permute.xlu0 %1654  ;;  %v1725_v44 = vpop.permute.xlu2 %1724 }
 0x252   : > { %2070 = vrot.lane.b32.xlu1 %v2067_v28, %s2747_s7  ;;  %v1660_v58 = vadd.f32 %v1655_v5, %v1640_v40  ;;  %v2183_v28 = vmul.f32 %v3768_v35, %v2182_v51  ;;  %v2169_v5 = vsel %vm481_vm8, %v2167_v20, %v2168_v38  ;;  %v2190_v12 = vrot.slane %v2184_v25, 6 }
 0x253   : > { %v2171_v35 = vsel %vm481_vm8, %v2168_v38, %v2170_v37 }
 0x254   : > { %v1657_v47 = vpop.permute.xlu1 %1656  ;;  %v1675_v22 = vadd.f32 %v1670_v4, %v1660_v58  ;;  %v2185_v58 = vmul.f32 %v3803_v18, %v2182_v51  ;;  %v2203_v18 = vmul.f32 %v3808_v53, %v2202_v59 }
 0x255   : > { %v1661_v41 = vadd.f32 %v1657_v47, %v1641_v26  ;;  %v2147_v26 = vrot.slane %v2141_v43, 5  ;;  %v2189_v47 = vrot.slane %v2183_v28, 6 }
 0x256   : > { %v2209_v24 = vrot.slane %v2203_v18, 6 }
 0x257   : > { %2090 = vrot.lane.b32.xlu0 %v2087_v33, %s2747_s7  ;;  %2088 = vrot.lane.b32.xlu2 %v2085_v17, %s2747_s7  ;;  %v2149_v31 = vsel %vm481_vm8, %v2147_v26, %v2148_v57  ;;  %v2191_v8 = vsel %vm516_vm9, %v2189_v47, %v2190_v12  ;;  %v2204_v33 = vmul.f32 %v3800_v13, %v2202_v59 }
 0x258   : > { %v2205_v17 = vmul.f32 %v3867_v15, %v2202_v59 }
 0x259   : > { %v1672_v4 = vpop.permute.xlu0 %1671  ;;  %v1749_v61 = vpop.permute.xlu2 %1748 }
 0x25a   : > { %2110 = vrot.lane.b32.xlu1 %v2107_v19, %s2747_s7  ;;  %v1676_v6 = vadd.f32 %v1672_v4, %v1661_v41  ;;  %v2192_v41 = vrot.slane %v2185_v58, 6  ;;  %v2210_v19 = vrot.slane %v2204_v33, 6  ;;  %v2212_v4 = vrot.slane %v2205_v17, 6 }
 0x25c   : > { %v1683_v23 = vpop.permute.xlu1 %1682  ;;  %v1689_v14 = vadd.f32 %v1685_v7, %v1676_v6  ;;  %v2193_v10 = vsel %vm516_vm9, %v2190_v12, %v2192_v41  ;;  %v2213_v15 = vsel %vm516_vm9, %v2210_v19, %v2212_v4  ;;  %v2211_v42 = vsel %vm516_vm9, %v2209_v24, %v2210_v19 }
 0x25d   : > { %v1688_v9 = vadd.f32 %v1683_v23, %v1675_v22 }
 0x25f   : > { %2130 = vrot.lane.b32.xlu0 %v2127_v48, %s2747_s7  ;;  %2112 = vrot.lane.b32.xlu2 %v2109_v32, %s2747_s7 }
 0x261   : > { %v1705_v56 = vpop.permute.xlu0 %1704  ;;  %v1789_v7 = vpop.permute.xlu2 %1788 }
 0x262   : > { %2132 = vrot.lane.b32.xlu1 %v2129_v34, %s2747_s7  ;;  %v1710_v39 = vadd.f32 %v1705_v56, %v1688_v9 }
 0x264   : > { %v1707_v54 = vpop.permute.xlu1 %1706  ;;  %v1730_v40 = vadd.f32 %v1725_v44, %v1710_v39 }
 0x265   : > { %v1711_v16 = vadd.f32 %v1707_v54, %v1689_v14 }
 0x267   : > { %2154 = vrot.lane.b32.xlu0 %v2151_v49, %s2747_s7  ;;  %2152 = vrot.lane.b32.xlu2 %v2149_v31, %s2747_s7 }
 0x269   : > { %v1727_v44 = vpop.permute.xlu0 %1726  ;;  %v1811_v55 = vpop.permute.xlu2 %1810 }
 0x26a   : > { %2172 = vrot.lane.b32.xlu1 %v2169_v5, %s2747_s7  ;;  %v1731_v60 = vadd.f32 %v1727_v44, %v1711_v16 }
 0x26c   : > { %v1747_v1 = vpop.permute.xlu1 %1746  ;;  %v1753_v3 = vadd.f32 %v1749_v61, %v1731_v60 }
 0x26d   : > { %v1752_v22 = vadd.f32 %v1747_v1, %v1730_v40 }
 0x26f   : > { %2194 = vrot.lane.b32.xlu0 %v2191_v8, %s2747_s7  ;;  %2174 = vrot.lane.b32.xlu2 %v2171_v35, %s2747_s7 }
 0x271   : > { %v1767_v27 = vpop.permute.xlu0 %1766  ;;  %v1851_v21 = vpop.permute.xlu2 %1850 }
 0x272   : > { %2196 = vrot.lane.b32.xlu1 %v2193_v10, %s2747_s7  ;;  %v1772_v63 = vadd.f32 %v1767_v27, %v1752_v22 }
 0x274   : > { %v1769_v61 = vpop.permute.xlu1 %1768  ;;  %v1794_v13 = vadd.f32 %v1789_v7, %v1772_v63 }
 0x275   : > { %v1773_v6 = vadd.f32 %v1769_v61, %v1753_v3 }
 0x277   : > { %2216 = vrot.lane.b32.xlu0 %v2213_v15, %s2747_s7  ;;  %2214 = vrot.lane.b32.xlu2 %v2211_v42, %s2747_s7  ;;  %s2278_s7 = sshll.u32 %s2275_s28, 4  ;;  %s2279_s7 = int_to_ptr.hbm [resolvable:$true] %s2278_s7 }
 0x278   : > { %s2663_s8 = sshra.s32 %s2279_s7, 4  ;;  %s2664_s8 = int_to_ptr.hbm [resolvable:$true] %s2663_s8 }
 0x279   : > { %v1791_v53 = vpop.permute.xlu0 %1790  ;;  %v1875_v62 = vpop.permute.xlu2 %1874  ;;  %s2665_s9 = scalar_lea.hbm %s2664_s8, 16  ;;  %p2670_p11 = scmp.lt.s32.totalorder %s2664_s8, %s3975_s3 }
 0x27a   : > { %v1795_v23 = vadd.f32 %v1791_v53, %v1773_v6  ;;  %p2666_p3 = scmp.ne.s32.totalorder %s2664_s8, %s2665_s9  ;;  %p2671_p12 = scmp.lt.s32.totalorder %s2669_s30, %s2665_s9 }
 0x27c   : > { %v1809_v11 = vpop.permute.xlu1 %1808  ;;  %v1815_v14 = vadd.f32 %v1811_v55, %v1795_v23  ;;  %p2667_p5 = pnand %p2666_p3, %p2825_p8  ;;  %p2672_p0 = por %p2671_p12, %p2670_p11 }
 0x27d   : > { %v1814_v54 = vadd.f32 %v1809_v11, %v1794_v13 }
 0x27e   : > { %p2668_p7 = pneg %p2667_p5 }
 0x280   : > { %p2673_p1 = pnand %p2672_p0, %p2668_p7 }
 0x281   : > { %v1831_v9 = vpop.permute.xlu0 %1830  ;;  %v1915_v45 = vpop.permute.xlu2 %1914 }
 0x282   : > { %v1836_v16 = vadd.f32 %v1831_v9, %v1814_v54 }
 0x284   : > { %v1833_v0 = vpop.permute.xlu1 %1832  ;;  %v1856_v51 = vadd.f32 %v1851_v21, %v1836_v16 }
 0x285   : > { %v1837_v49 = vadd.f32 %v1833_v0, %v1815_v14 }
 0x289   : > { %v1853_v48 = vpop.permute.xlu0 %1852  ;;  %v1937_v32 = vpop.permute.xlu2 %1936 }
 0x28a   : > { %v1857_v46 = vadd.f32 %v1853_v48, %v1837_v49 }
 0x28c   : > { %v1873_v52 = vpop.permute.xlu1 %1872  ;;  %v1879_v44 = vadd.f32 %v1875_v62, %v1857_v46 }
 0x28d   : > { %v1878_v31 = vadd.f32 %v1873_v52, %v1856_v51 }
 0x291   : > { %v1893_v2 = vpop.permute.xlu0 %1892  ;;  %v1963_v43 = vpop.permute.xlu2 %1962 }
 0x292   : > { %v1898_v20 = vadd.f32 %v1893_v2, %v1878_v31 }
 0x294   : > { %v1895_v50 = vpop.permute.xlu1 %1894  ;;  %v1920_v55 = vadd.f32 %v1915_v45, %v1898_v20 }
 0x295   : > { %v1899_v58 = vadd.f32 %v1895_v50, %v1879_v44 }
 0x299   : > { %v1917_v34 = vpop.permute.xlu0 %1916  ;;  %v1987_v7 = vpop.permute.xlu2 %1986 }
 0x29a   : > { %v1921_v37 = vadd.f32 %v1917_v34, %v1899_v58 }
 0x29c   : > { %v1935_v56 = vpop.permute.xlu1 %1934  ;;  %v1941_v22 = vadd.f32 %v1937_v32, %v1921_v37 }
 0x29d   : > { %v1940_v60 = vadd.f32 %v1935_v56, %v1920_v55 }
 0x2a1   : > { %v1950_v29 = vpop.permute.xlu0 %1949  ;;  %v2027_v57 = vpop.permute.xlu2 %2026 }
 0x2a2   : > { %v1955_v1 = vadd.f32 %v1950_v29, %v1940_v60 }
 0x2a4   : > { %v1952_v39 = vpop.permute.xlu1 %1951  ;;  %v1968_v41 = vadd.f32 %v1963_v43, %v1955_v1 }
 0x2a5   : > { %v1956_v59 = vadd.f32 %v1952_v39, %v1941_v22 }
 0x2a9   : > { %v1965_v30 = vpop.permute.xlu0 %1964  ;;  %v2049_v26 = vpop.permute.xlu2 %2048 }
 0x2aa   : > { %v1969_v33 = vadd.f32 %v1965_v30, %v1956_v59 }
 0x2ac   : > { %v1985_v36 = vpop.permute.xlu1 %1984  ;;  %v1991_v10 = vadd.f32 %v1987_v7, %v1969_v33 }
 0x2ad   : > { %v1990_v8 = vadd.f32 %v1985_v36, %v1968_v41 }
 0x2b1   : > { %v2005_v40 = vpop.permute.xlu0 %2004  ;;  %v2089_v28 = vpop.permute.xlu2 %2088 }
 0x2b2   : > { %v2010_v17 = vadd.f32 %v2005_v40, %v1990_v8 }
 0x2b4   : > { %v2007_v38 = vpop.permute.xlu1 %2006  ;;  %v2032_v27 = vadd.f32 %v2027_v57, %v2010_v17 }
 0x2b5   : > { %v2011_v63 = vadd.f32 %v2007_v38, %v1991_v10 }
 0x2b9   : > { %v2029_v25 = vpop.permute.xlu0 %2028  ;;  %v2113_v3 = vpop.permute.xlu2 %2112 }
 0x2ba   : > { %v2033_v61 = vadd.f32 %v2029_v25, %v2011_v63 }
 0x2bc   : > { %v2047_v5 = vpop.permute.xlu1 %2046  ;;  %v2053_v6 = vadd.f32 %v2049_v26, %v2033_v61 }
 0x2bd   : > { %v2052_v19 = vadd.f32 %v2047_v5, %v2032_v27 }
 0x2c1   : > { %v2069_v12 = vpop.permute.xlu0 %2068  ;;  %v2153_v21 = vpop.permute.xlu2 %2152 }
 0x2c2   : > { %v2074_v24 = vadd.f32 %v2069_v12, %v2052_v19 }
 0x2c4   : > { %v2071_v47 = vpop.permute.xlu1 %2070  ;;  %v2094_v15 = vadd.f32 %v2089_v28, %v2074_v24 }
 0x2c5   : > { %v2075_v42 = vadd.f32 %v2071_v47, %v2053_v6 }
 0x2c9   : > { %v2091_v35 = vpop.permute.xlu0 %2090  ;;  %v2175_v62 = vpop.permute.xlu2 %2174 }
 0x2ca   : > { %v2095_v11 = vadd.f32 %v2091_v35, %v2075_v42 }
 0x2cc   : > { %v2111_v18 = vpop.permute.xlu1 %2110  ;;  %v2117_v45 = vadd.f32 %v2113_v3, %v2095_v11 }
 0x2cd   : > { %v2116_v53 = vadd.f32 %v2111_v18, %v2094_v15 }
 0x2d1   : > { %v2131_v4 = vpop.permute.xlu0 %2130  ;;  %v2215_v50 = vpop.permute.xlu2 %2214 }
 0x2d2   : > { %v2136_v14 = vadd.f32 %v2131_v4, %v2116_v53 }
 0x2d4   : > { %v2133_v13 = vpop.permute.xlu1 %2132  ;;  %v2158_v0 = vadd.f32 %v2153_v21, %v2136_v14 }
 0x2d5   : > { %v2137_v48 = vadd.f32 %v2133_v13, %v2117_v45 }
 0x2d9   : > { %v2155_v23 = vpop.permute.xlu0 %2154 }
 0x2da   : > { %v2159_v2 = vadd.f32 %v2155_v23, %v2137_v48 }
 0x2dc   : > { %v2173_v9 = vpop.permute.xlu1 %2172  ;;  %v2179_v29 = vadd.f32 %v2175_v62, %v2159_v2 }
 0x2dd   : > { %v2178_v32 = vadd.f32 %v2173_v9, %v2158_v0 }
 0x2e1   : > { %v2195_v52 = vpop.permute.xlu0 %2194 }
 0x2e2   : > { %v2200_v43 = vadd.f32 %v2195_v52, %v2178_v32 }
 0x2e4   : > { %v2220_v34 = vadd.f32 %v2215_v50, %v2200_v43  ;;  %v2197_v56 = vpop.permute.xlu1 %2196 }
 0x2e5   : > { %v2201_v39 = vadd.f32 %v2197_v56, %v2179_v29 }
 0x2e6   : > { %v2490_v7 = vmul.f32 -1.442695, %v2220_v34 }
 0x2e8   : > { %2584 = vpow2.f32 %v2490_v7 }
 0x2e9   : > { %v2217_v57 = vpop.permute.xlu0 %2216 }
 0x2ea   : > { %v2221_v30 = vadd.f32 %v2217_v57, %v2201_v39 }
 0x2ec   : > { %v2491_v36 = vmul.f32 -1.442695, %v2221_v30 }
 0x2ee   : > { %v2585_v54 = vpop.eup %2584  ;;  %2586 = vpow2.f32 %v2491_v36 }
 0x2ef   : > { %v2228_v26 = vadd.f32 1.0, %v2585_v54 }
 0x2f1   : > { %2588 = vrcp.f32 %v2228_v26  ;;  %v2241_v31 = vand.u32 2147483648, %v2228_v26  ;;  %v2239_v46 = vand.u32 2147483647, %v2228_v26  ;;  %vm2235_vm11 = vweird.f32 %v2228_v26 }
 0x2f3   : > { %v2242_v44 = vor.u32 1.1754944e-38, %v2241_v31  ;;  %vm2240_vm13 = vcmp.eq.f32.partialorder %v2239_v46, 8.507059e+37 }
 0x2f4   : > { %v2587_v40 = vpop.eup %2586 }
 0x2f5   : > { %v2229_v16 = vadd.f32 1.0, %v2587_v40 }
 0x2f7   : > { %v2589_v38 = vpop.eup %2588  ;;  %2590 = vrcp.f32 %v2229_v16  ;;  %v2256_v60 = vand.u32 2147483648, %v2229_v16  ;;  %v2254_v1 = vand.u32 2147483647, %v2229_v16  ;;  %vm2250_vm15 = vweird.f32 %v2229_v16 }
 0x2f8   : > { %v2231_v51 = vmul.f32 %v2589_v38, %v2228_v26  ;;  %vm2236_vm10 = vweird.f32 %v2589_v38 }
 0x2f9   : > { %vm2237_vm12 = vmor %vm2235_vm11, %vm2236_vm10  ;;  %v2257_v3 = vor.u32 1.1754944e-38, %v2256_v60  ;;  %vm2255_vm2 = vcmp.eq.f32.partialorder %v2254_v1, 8.507059e+37 }
 0x2fa   : > { %v2232_v49 = vsub.f32 1.0, %v2231_v51 }
 0x2fc   : > { %v2233_v25 = vmul.f32 %v2589_v38, %v2232_v49 }
 0x2fd   : > { %v2591_v20 = vpop.eup %2590 }
 0x2fe   : > { %v2246_v28 = vmul.f32 %v2591_v20, %v2229_v16  ;;  %v2234_v5 = vadd.f32 %v2589_v38, %v2233_v25  ;;  %vm2251_vm14 = vweird.f32 %v2591_v20 }
 0x2ff   : > { %vm2252_vm0 = vmor %vm2250_vm15, %vm2251_vm14 }
 0x300   : > { %v2247_v55 = vsub.f32 1.0, %v2246_v28  ;;  %v2238_v58 = vsel %vm2237_vm12, %v2589_v38, %v2234_v5 }
 0x301   : > { %v2243_v12 = vsel %vm2240_vm13, %v2242_v44, %v2238_v58 }
 0x302   : > { %v2248_v37 = vmul.f32 %v2591_v20, %v2247_v55  ;;  %2261 = vst.msk [vmem:[%s222_s17] sm:$0xff] %vm251_vm1, %v2243_v12 }
 0x304   : > { %v2249_v47 = vadd.f32 %v2591_v20, %v2248_v37 }
 0x306   : > { %v2253_v22 = vsel %vm2252_vm0, %v2591_v20, %v2249_v47 }
 0x307   : > { %v2258_v41 = vsel %vm2255_vm2, %v2257_v3, %v2253_v22 }
 0x308   : > { %2262 = vst.msk [vmem:[%s222_s17 + $0x8] sm:$0xff] %vm251_vm1, %v2258_v41 }
 0x309   : > { %2676 = shalt.err (!%p2673_p1)
}
 0x30a   : > { %s2748_s21 = smov 128   ;;  %s2749_s10 = smov 8  }
 0x30b   : > { %2505 = dma.vmem_to_hbm [thread:$0]  (%p2825_p8), %s2277_s29, 256, %s2279_s7, %s2264_s6, %s2748_s21, %s2748_s21, %s2749_s10  }
 0x30c PF: > { %s2293_s11 = sand.u32 1, %s2715_s14   ;;  %p2516_p2 = pnand %p2379_p13, %p2829_p9 }
 0x30d   : > { %s2294_s12 = scalar_lea.sflag [#allocation8], %s2293_s11 }
 0x30e   : > { %p2517_p4 = pneg %p2516_p2 }
 0x310   : > { %2710 = dma.done.wait (%p2517_p4), %s2294_s12, 256  }
 0x311   : > { %2712 = vsyncadd (%p2517_p4), %s2294_s12, 4294967040  ;;  %s21_s19 = sadd.s32 1, %s2735_s19   ;;  %s3989_s14 = smov %s2719_s15 }
 0x312   : > { %p18_p6 = scmp.ge.s32.totalorder %s21_s19, 4   ;;  %s3990_s15 = smov %s2723_s16 }
 0x313   : > { %s3991_s16 = smov %s2867_s23  ;;  %s3992_s17 = smov %s2731_s18 }
 0x314   : > { %s3993_s18 = smov %s3995_s5  ;;  %20 = sbr.rel (!%p18_p6) target bundleno = 9 (0x9), region = 98 }
 0x319   :  { %2300 = vsyncpa [#allocation7], 1 }
 0x31a   :  { %2302 = vsyncpa [#allocation7 + $0x1], 1 }
 0x31b   :  { %2303 = vsyncpa [#allocation8], 1 }
 0x31c   :  { %2305 = vsyncpa [#allocation8 + $0x1], 1 }
 0x31d   :  { %2306 = vsyncpa [#allocation9], 1 }
 0x31e   :  { %2308 = vsyncpa [#allocation9 + $0x1], 1 }

</bundles_post_ra>
